<compile_context>
chip_gen: v7x
topology: tpu7x:2x2x1
jax: 0.10.0
libtpu: 0.0.40
codegen_flags: <defaults>
</compile_context>

<pallas_src>
import math

import jax
import jax.numpy as jnp
from jax import lax
from jax.experimental import pallas as pl
from jax.experimental.pallas import tpu as pltpu


# ----------------------------------------------------------------------------- helpers
_INV_SQRT2 = 0.7071067811865476  # Python float -> literal inside the kernel (no capture)


def _gelu_exact(x):
    # PyTorch F.gelu default: 0.5 * x * (1 + erf(x / sqrt(2)))
    return 0.5 * x * (1.0 + lax.erf(x * _INV_SQRT2))


def _full_spec(shape):
    # Whole array as a single VMEM block (trivial grid of size 1).
    return pl.BlockSpec(shape, lambda i: (0,) * len(shape))


# ----------------------------------------------------------------------------- fused RNN kernel
def make_fused_rnn_kernel(n_layers, B, S):
    """kernel: x(B,S,n_in), [Wx', Wh', b', Wio, bio]*n_layers, W_out, b_out -> (B, n_out)."""
    bf16 = jnp.bfloat16
    f32 = jnp.float32

    def kernel(*refs):
        x_ref = refs[0]
        layer_refs = [refs[1 + 5 * l: 1 + 5 * (l + 1)] for l in range(n_layers)]
        w_out_ref = refs[1 + 5 * n_layers]
        b_out_ref = refs[2 + 5 * n_layers]
        out_ref = refs[3 + 5 * n_layers]
        zx_scr = refs[4 + 5 * n_layers]    # (B, S, d_hidden) f32 VMEM scratch
        h_scr = refs[5 + 5 * n_layers]     # (B, S, d_hidden) f32 VMEM scratch

        n_in0 = x_ref.shape[-1]
        # Batch-major rows: row = b*S + s.  Layout-trivial merge because S == 8
        # (sublane tile); no transpose of x anywhere.
        cur = x_ref[...].reshape(B * S, n_in0)

        for l in range(n_layers):
            wx_ref, wh_ref, b_ref, wio_ref, bio_ref = layer_refs[l]
            d_hidden = wh_ref.shape[0]
            last = l == n_layers - 1

            # Hoist weight casts out of the timestep loop (cast once per layer).
            wh_bf = wh_ref[...].astype(bf16)
            wio_bf = wio_ref[...].astype(bf16)

            # Hoisted input projection for ALL timesteps: one MXU matmul
            # (bf16 operands, f32 accumulation); BN + i2h bias already folded in.
            zx = jnp.dot(cur.astype(bf16), wx_ref[...].astype(bf16),
                         preferred_element_type=f32) + b_ref[...]          # (B*S, d)
            zx_scr[...] = zx.reshape(B, S, d_hidden)

            h = jnp.zeros((B, d_hidden), f32)
            for t in range(S):                    # static unroll: S small & fixed
                h = _gelu_exact(
                    zx_scr[:, t, :]
                    + jnp.dot(h.astype(bf16), wh_bf, preferred_element_type=f32))
                if not last:
                    # Store is off the critical path (does not feed the next h).
                    h_scr[:, t, :] = h

            if last:
                # Only out[:, -1, :] feeds ln_out -> skip i2o for t < S-1.
                o_last = _gelu_exact(
                    jnp.dot(h.astype(bf16), wio_bf, preferred_element_type=f32)
                    + bio_ref[...])                                         # (B, n_out_l)
                out_ref[...] = (
                    jnp.dot(o_last.astype(bf16), w_out_ref[...].astype(bf16),
                            preferred_element_type=f32)
                    + b_out_ref[...]).astype(out_ref.dtype)
            else:
                # Batched i2o for all timesteps: one matmul + one GELU, in VMEM.
                h_all = h_scr[...].reshape(B * S, d_hidden)
                cur = _gelu_exact(
                    jnp.dot(h_all.astype(bf16), wio_bf, preferred_element_type=f32)
                    + bio_ref[...])                                         # (B*S, n_out_l)

    return kernel


@jax.jit
def rnn_forward(x_bsf, layer_params, w_out, b_out):
    """x_bsf: (B, S, n_inputs) -> (B, n_outputs). Single fused pallas_call, jitted."""
    B, S, _ = x_bsf.shape
    n_layers = len(layer_params)
    n_outputs = w_out.shape[1]
    d_hidden = layer_params[0]["wh_f"].shape[0]

    operands = [x_bsf]
    in_specs = [_full_spec(x_bsf.shape)]
    for p in layer_params:
        for name in ("wx_f", "wh_f", "b_f", "wio", "bio"):
            arr = p[name]
            operands.append(arr)
            in_specs.append(_full_spec(arr.shape))
    operands += [w_out, b_out]
    in_specs += [_full_spec(w_out.shape), _full_spec(b_out.shape)]

    return pl.pallas_call(
        make_fused_rnn_kernel(n_layers, B, S),
        out_shape=jax.ShapeDtypeStruct((B, n_outputs), jnp.float32),
        grid=(1,),
        in_specs=in_specs,
        out_specs=_full_spec((B, n_outputs)),
        scratch_shapes=[
            pltpu.VMEM((B, S, d_hidden), jnp.float32),   # zx_scr: hoisted input proj
            pltpu.VMEM((B, S, d_hidden), jnp.float32),   # h_scr : per-step hidden states
        ],
        compiler_params=pltpu.CompilerParams(dimension_semantics=("arbitrary",)),
    )(*operands)


# ----------------------------------------------------------------------------- parameter init (deterministic, PyTorch-Linear-like)
def _linear_params(key, fan_in, fan_out):
    k = 1.0 / math.sqrt(fan_in)
    kw, kb = jax.random.split(key)
    w = jax.random.uniform(kw, (fan_in, fan_out), jnp.float32, -k, k)
    b = jax.random.uniform(kb, (1, fan_out), jnp.float32, -k, k)
    return w, b


def make_rec_block_params(key, n_in, n_out, d_hidden, eps=1e-5):
    k1, k2 = jax.random.split(key)
    # i2h: Linear(n_in + d_hidden, d_hidden) -> split weight into Wx / Wh
    w_ih, b_ih = _linear_params(k1, n_in + d_hidden, d_hidden)
    wx, wh = w_ih[:n_in, :], w_ih[n_in:, :]
    # i2o: Linear(d_hidden, n_out)
    wio, bio = _linear_params(k2, d_hidden, n_out)
    # BatchNorm1d eval-mode fold (default gamma=1, beta=0, mean=0, var=1)
    gamma = jnp.ones((1, d_hidden), jnp.float32)
    beta = jnp.zeros((1, d_hidden), jnp.float32)
    running_mean = jnp.zeros((1, d_hidden), jnp.float32)
    running_var = jnp.ones((1, d_hidden), jnp.float32)
    bn_scale = gamma / jnp.sqrt(running_var + eps)
    bn_shift = beta - running_mean * bn_scale
    # Fold BN + i2h bias into the weights (trace-time, outside the kernel).
    wx_f = wx * bn_scale
    wh_f = wh * bn_scale
    b_f = b_ih * bn_scale + bn_shift
    return dict(wx=wx, wh=wh, bih=b_ih, bn_scale=bn_scale, bn_shift=bn_shift,
                wio=wio, bio=bio, wx_f=wx_f, wh_f=wh_f, b_f=b_f)


# ----------------------------------------------------------------------------- references
def rec_block_ref(x_bsf, p):
    """Faithful f32 RecBlock.forward (eval mode), unfolded params, exact GELU."""
    B, S, _ = x_bsf.shape
    d_hidden = p["wh"].shape[0]
    h = jnp.zeros((B, d_hidden), jnp.float32)
    outs = []
    for t in range(S):
        z = x_bsf[:, t, :] @ p["wx"] + h @ p["wh"] + p["bih"]
        z = z * p["bn_scale"] + p["bn_shift"]
        h = _gelu_exact(z)
        outs.append(_gelu_exact(h @ p["wio"] + p["bio"]))
    return jnp.stack(outs, axis=1)


def rnn_ref(x_bsf, layer_params, w_out, b_out):
    out = x_bsf
    for p in layer_params:
        out = rec_block_ref(out, p)
    return out[:, -1, :] @ w_out + b_out


def rnn_ref_kernel_math(x_bsf, layer_params, w_out, b_out):
    """Pure-JAX mirror of the kernel math (folded BN, bf16 operands, f32 accumulate)."""
    def dot(a, b):
        return jnp.dot(a.astype(jnp.bfloat16), b.astype(jnp.bfloat16),
                       preferred_element_type=jnp.float32)
    B, S, _ = x_bsf.shape
    cur = x_bsf.reshape(B * S, -1)
    n_layers = len(layer_params)
    for li, p in enumerate(layer_params):
        d = p["wh_f"].shape[0]
        zx = (dot(cur, p["wx_f"]) + p["b_f"]).reshape(B, S, d)
        h = jnp.zeros((B, d), jnp.float32)
        hs = []
        for t in range(S):
            h = _gelu_exact(zx[:, t, :] + dot(h, p["wh_f"]))
            hs.append(h)
        if li == n_layers - 1:
            o_last = _gelu_exact(dot(h, p["wio"]) + p["bio"])
            return dot(o_last, w_out) + b_out
        h_all = jnp.stack(hs, axis=1).reshape(B * S, d)
        cur = _gelu_exact(dot(h_all, p["wio"]) + p["bio"])


# ----------------------------------------------------------------------------- main
if __name__ == "__main__":
    # Model config (small, consistent with the module's forward).
    B, S = 8, 8
    n_inputs, n_outputs = 16, 8
    n_layers, d_hidden = 2, 32
    d_model = d_hidden  # d_model=None -> d_hidden

    root = jax.random.PRNGKey(0)
    keys = jax.random.split(root, n_layers + 2)
    kx, k_out = keys[0], keys[-1]
    lkeys = keys[1:-1]

    x = jax.random.normal(kx, (B, S, n_inputs), jnp.float32)

    layer_params = []
    n_in = n_inputs
    for li in range(n_layers):
        layer_params.append(make_rec_block_params(lkeys[li], n_in, d_model, d_hidden))
        n_in = d_model
    w_out, b_out = _linear_params(k_out, n_in, n_outputs)

    y = jax.block_until_ready(rnn_forward(x, layer_params, w_out, b_out))
    assert y.shape == (B, n_outputs), y.shape

    # Tight check: kernel exactly implements the intended (bf16-operand, f32-acc) math.
    y_kref = rnn_ref_kernel_math(x, layer_params, w_out, b_out)
    assert jnp.allclose(y, y_kref, atol=2e-3, rtol=2e-3), (
        float(jnp.max(jnp.abs(y - y_kref))))

    # Loose check: numerics vs. the faithful full-f32 / exact-GELU PyTorch reference
    # (difference is purely bf16 matmul-operand quantization; accumulation is f32).
    y_ref = rnn_ref(x, layer_params, w_out, b_out)
    assert jnp.allclose(y, y_ref, atol=3e-2, rtol=3e-2), (
        float(jnp.max(jnp.abs(y - y_ref))))

    print("KERNEL_OK")
</pallas_src>

<mosaic_0001>
module attributes {stable_mosaic.version = 11 : i64} {
  func.func @kernel(%arg0: i32, %arg1: memref<8x8x16xf32, #tpu.memory_space<vmem>>, %arg2: memref<16x32xf32, #tpu.memory_space<vmem>>, %arg3: memref<32x32xf32, #tpu.memory_space<vmem>>, %arg4: memref<1x32xf32, #tpu.memory_space<vmem>>, %arg5: memref<32x32xf32, #tpu.memory_space<vmem>>, %arg6: memref<1x32xf32, #tpu.memory_space<vmem>>, %arg7: memref<32x32xf32, #tpu.memory_space<vmem>>, %arg8: memref<32x32xf32, #tpu.memory_space<vmem>>, %arg9: memref<1x32xf32, #tpu.memory_space<vmem>>, %arg10: memref<32x32xf32, #tpu.memory_space<vmem>>, %arg11: memref<1x32xf32, #tpu.memory_space<vmem>>, %arg12: memref<32x8xf32, #tpu.memory_space<vmem>>, %arg13: memref<1x8xf32, #tpu.memory_space<vmem>>, %arg14: memref<8x8xf32, #tpu.memory_space<vmem>>, %arg15: memref<8x8x32xf32, #tpu.memory_space<vmem>>, %arg16: memref<8x8x32xf32, #tpu.memory_space<vmem>>) attributes {dimension_semantics = [#tpu.dimension_semantics<arbitrary>], iteration_bounds = array<i64: 1>, scalar_prefetch = 0 : i64, scratch_operands = 2 : i64, tpu.core_type = #tpu.core_type<tc>, window_params = [{pipeline_mode = #tpu.pipeline_mode<synchronous>, transform_indices = @transform_0, window_bounds = array<i64: 8, 8, 16>}, {pipeline_mode = #tpu.pipeline_mode<synchronous>, transform_indices = @transform_1, window_bounds = array<i64: 16, 32>}, {pipeline_mode = #tpu.pipeline_mode<synchronous>, transform_indices = @transform_2, window_bounds = array<i64: 32, 32>}, {pipeline_mode = #tpu.pipeline_mode<synchronous>, transform_indices = @transform_3, window_bounds = array<i64: 1, 32>}, {pipeline_mode = #tpu.pipeline_mode<synchronous>, transform_indices = @transform_4, window_bounds = array<i64: 32, 32>}, {pipeline_mode = #tpu.pipeline_mode<synchronous>, transform_indices = @transform_5, window_bounds = array<i64: 1, 32>}, {pipeline_mode = #tpu.pipeline_mode<synchronous>, transform_indices = @transform_6, window_bounds = array<i64: 32, 32>}, {pipeline_mode = #tpu.pipeline_mode<synchronous>, transform_indices = @transform_7, window_bounds = array<i64: 32, 32>}, {pipeline_mode = #tpu.pipeline_mode<synchronous>, transform_indices = @transform_8, window_bounds = array<i64: 1, 32>}, {pipeline_mode = #tpu.pipeline_mode<synchronous>, transform_indices = @transform_9, window_bounds = array<i64: 32, 32>}, {pipeline_mode = #tpu.pipeline_mode<synchronous>, transform_indices = @transform_10, window_bounds = array<i64: 1, 32>}, {pipeline_mode = #tpu.pipeline_mode<synchronous>, transform_indices = @transform_11, window_bounds = array<i64: 32, 8>}, {pipeline_mode = #tpu.pipeline_mode<synchronous>, transform_indices = @transform_12, window_bounds = array<i64: 1, 8>}, {pipeline_mode = #tpu.pipeline_mode<synchronous>, transform_indices = @transform_13, window_bounds = array<i64: 8, 8>}]} {
    %c0 = arith.constant 0 : index
    %c0_0 = arith.constant 0 : index
    %c0_1 = arith.constant 0 : index
    %0 = vector.load %arg1[%c0, %c0_0, %c0_1] : memref<8x8x16xf32, #tpu.memory_space<vmem>>, vector<8x8x16xf32>
    %1 = vector.shape_cast %0 : vector<8x8x16xf32> to vector<64x16xf32>
    %c0_2 = arith.constant 0 : index
    %c0_3 = arith.constant 0 : index
    %2 = vector.load %arg3[%c0_2, %c0_3] : memref<32x32xf32, #tpu.memory_space<vmem>>, vector<32x32xf32>
    %3 = arith.truncf %2 : vector<32x32xf32> to vector<32x32xbf16>
    %c0_4 = arith.constant 0 : index
    %c0_5 = arith.constant 0 : index
    %4 = vector.load %arg5[%c0_4, %c0_5] : memref<32x32xf32, #tpu.memory_space<vmem>>, vector<32x32xf32>
    %5 = arith.truncf %4 : vector<32x32xf32> to vector<32x32xbf16>
    %6 = arith.truncf %1 : vector<64x16xf32> to vector<64x16xbf16>
    %c0_6 = arith.constant 0 : index
    %c0_7 = arith.constant 0 : index
    %7 = vector.load %arg2[%c0_6, %c0_7] : memref<16x32xf32, #tpu.memory_space<vmem>>, vector<16x32xf32>
    %8 = arith.truncf %7 : vector<16x32xf32> to vector<16x32xbf16>
    %cst = arith.constant dense<0.000000e+00> : vector<64x32xf32>
    %9 = tpu.matmul %6, %8, %cst {dimension_numbers = #tpu.dot_dimension_numbers<[1], [0], [0], [1], [0, 0, 1, 1], [], []>} : vector<64x16xbf16>, vector<16x32xbf16>, vector<64x32xf32> -> vector<64x32xf32>
    %c0_8 = arith.constant 0 : index
    %c0_9 = arith.constant 0 : index
    %10 = vector.load %arg4[%c0_8, %c0_9] : memref<1x32xf32, #tpu.memory_space<vmem>>, vector<1x32xf32>
    %11 = vector.broadcast %10 : vector<1x32xf32> to vector<64x32xf32>
    %12 = arith.addf %9, %11 : vector<64x32xf32>
    %13 = vector.shape_cast %12 : vector<64x32xf32> to vector<8x8x32xf32>
    %c0_10 = arith.constant 0 : index
    %c0_11 = arith.constant 0 : index
    %c0_12 = arith.constant 0 : index
    %14 = vector.load %arg15[%c0_10, %c0_11, %c0_12] : memref<8x8x32xf32, #tpu.memory_space<vmem>>, vector<8x8x32xf32>
    tpu.vector_store %arg15[%c0_10, %c0_11, %c0_12], %13 {strides = array<i32>} : memref<8x8x32xf32, #tpu.memory_space<vmem>>, vector<8x8x32xf32>,
    %cst_13 = arith.constant 0.000000e+00 : f32
    %15 = vector.broadcast %cst_13 : f32 to vector<8x32xf32>
    %c0_14 = arith.constant 0 : index
    %c0_15 = arith.constant 0 : index
    %c0_16 = arith.constant 0 : index
    %16 = vector.load %arg15[%c0_14, %c0_15, %c0_16] : memref<8x8x32xf32, #tpu.memory_space<vmem>>, vector<8x1x32xf32>
    %17 = vector.shape_cast %16 : vector<8x1x32xf32> to vector<8x32xf32>
    %18 = arith.truncf %15 : vector<8x32xf32> to vector<8x32xbf16>
    %cst_17 = arith.constant dense<0.000000e+00> : vector<8x32xf32>
    %19 = tpu.matmul %18, %3, %cst_17 {dimension_numbers = #tpu.dot_dimension_numbers<[1], [0], [0], [1], [0, 0, 1, 1], [], []>} : vector<8x32xbf16>, vector<32x32xbf16>, vector<8x32xf32> -> vector<8x32xf32>
    %20 = arith.addf %17, %19 : vector<8x32xf32>
    %cst_18 = arith.constant 5.000000e-01 : f32
    %21 = vector.broadcast %cst_18 : f32 to vector<8x32xf32>
    %22 = arith.mulf %21, %20 : vector<8x32xf32>
    %cst_19 = arith.constant 0.707106769 : f32
    %23 = vector.broadcast %cst_19 : f32 to vector<8x32xf32>
    %24 = arith.mulf %20, %23 : vector<8x32xf32>
    %25 = math.erf %24 : vector<8x32xf32>
    %cst_20 = arith.constant 1.000000e+00 : f32
    %26 = vector.broadcast %cst_20 : f32 to vector<8x32xf32>
    %27 = arith.addf %26, %25 : vector<8x32xf32>
    %28 = arith.mulf %22, %27 : vector<8x32xf32>
    %c0_21 = arith.constant 0 : index
    %c0_22 = arith.constant 0 : index
    %c0_23 = arith.constant 0 : index
    %29 = vector.load %arg16[%c0_21, %c0_22, %c0_23] : memref<8x8x32xf32, #tpu.memory_space<vmem>>, vector<8x1x32xf32>
    %30 = vector.shape_cast %29 : vector<8x1x32xf32> to vector<8x32xf32>
    %31 = vector.shape_cast %28 : vector<8x32xf32> to vector<8x1x32xf32>
    tpu.vector_store %arg16[%c0_21, %c0_22, %c0_23], %31 {strides = array<i32>} : memref<8x8x32xf32, #tpu.memory_space<vmem>>, vector<8x1x32xf32>,
    %c0_24 = arith.constant 0 : index
    %c1 = arith.constant 1 : index
    %c0_25 = arith.constant 0 : index
    %32 = vector.load %arg15[%c0_24, %c1, %c0_25] : memref<8x8x32xf32, #tpu.memory_space<vmem>>, vector<8x1x32xf32>
    %33 = vector.shape_cast %32 : vector<8x1x32xf32> to vector<8x32xf32>
    %34 = arith.truncf %28 : vector<8x32xf32> to vector<8x32xbf16>
    %cst_26 = arith.constant dense<0.000000e+00> : vector<8x32xf32>
    %35 = tpu.matmul %34, %3, %cst_26 {dimension_numbers = #tpu.dot_dimension_numbers<[1], [0], [0], [1], [0, 0, 1, 1], [], []>} : vector<8x32xbf16>, vector<32x32xbf16>, vector<8x32xf32> -> vector<8x32xf32>
    %36 = arith.addf %33, %35 : vector<8x32xf32>
    %cst_27 = arith.constant 5.000000e-01 : f32
    %37 = vector.broadcast %cst_27 : f32 to vector<8x32xf32>
    %38 = arith.mulf %37, %36 : vector<8x32xf32>
    %cst_28 = arith.constant 0.707106769 : f32
    %39 = vector.broadcast %cst_28 : f32 to vector<8x32xf32>
    %40 = arith.mulf %36, %39 : vector<8x32xf32>
    %41 = math.erf %40 : vector<8x32xf32>
    %cst_29 = arith.constant 1.000000e+00 : f32
    %42 = vector.broadcast %cst_29 : f32 to vector<8x32xf32>
    %43 = arith.addf %42, %41 : vector<8x32xf32>
    %44 = arith.mulf %38, %43 : vector<8x32xf32>
    %c0_30 = arith.constant 0 : index
    %c1_31 = arith.constant 1 : index
    %c0_32 = arith.constant 0 : index
    %45 = vector.load %arg16[%c0_30, %c1_31, %c0_32] : memref<8x8x32xf32, #tpu.memory_space<vmem>>, vector<8x1x32xf32>
    %46 = vector.shape_cast %45 : vector<8x1x32xf32> to vector<8x32xf32>
    %47 = vector.shape_cast %44 : vector<8x32xf32> to vector<8x1x32xf32>
    tpu.vector_store %arg16[%c0_30, %c1_31, %c0_32], %47 {strides = array<i32>} : memref<8x8x32xf32, #tpu.memory_space<vmem>>, vector<8x1x32xf32>,
    %c0_33 = arith.constant 0 : index
    %c2 = arith.constant 2 : index
    %c0_34 = arith.constant 0 : index
    %48 = vector.load %arg15[%c0_33, %c2, %c0_34] : memref<8x8x32xf32, #tpu.memory_space<vmem>>, vector<8x1x32xf32>
    %49 = vector.shape_cast %48 : vector<8x1x32xf32> to vector<8x32xf32>
    %50 = arith.truncf %44 : vector<8x32xf32> to vector<8x32xbf16>
    %cst_35 = arith.constant dense<0.000000e+00> : vector<8x32xf32>
    %51 = tpu.matmul %50, %3, %cst_35 {dimension_numbers = #tpu.dot_dimension_numbers<[1], [0], [0], [1], [0, 0, 1, 1], [], []>} : vector<8x32xbf16>, vector<32x32xbf16>, vector<8x32xf32> -> vector<8x32xf32>
    %52 = arith.addf %49, %51 : vector<8x32xf32>
    %cst_36 = arith.constant 5.000000e-01 : f32
    %53 = vector.broadcast %cst_36 : f32 to vector<8x32xf32>
    %54 = arith.mulf %53, %52 : vector<8x32xf32>
    %cst_37 = arith.constant 0.707106769 : f32
    %55 = vector.broadcast %cst_37 : f32 to vector<8x32xf32>
    %56 = arith.mulf %52, %55 : vector<8x32xf32>
    %57 = math.erf %56 : vector<8x32xf32>
    %cst_38 = arith.constant 1.000000e+00 : f32
    %58 = vector.broadcast %cst_38 : f32 to vector<8x32xf32>
    %59 = arith.addf %58, %57 : vector<8x32xf32>
    %60 = arith.mulf %54, %59 : vector<8x32xf32>
    %c0_39 = arith.constant 0 : index
    %c2_40 = arith.constant 2 : index
    %c0_41 = arith.constant 0 : index
    %61 = vector.load %arg16[%c0_39, %c2_40, %c0_41] : memref<8x8x32xf32, #tpu.memory_space<vmem>>, vector<8x1x32xf32>
    %62 = vector.shape_cast %61 : vector<8x1x32xf32> to vector<8x32xf32>
    %63 = vector.shape_cast %60 : vector<8x32xf32> to vector<8x1x32xf32>
    tpu.vector_store %arg16[%c0_39, %c2_40, %c0_41], %63 {strides = array<i32>} : memref<8x8x32xf32, #tpu.memory_space<vmem>>, vector<8x1x32xf32>,
    %c0_42 = arith.constant 0 : index
    %c3 = arith.constant 3 : index
    %c0_43 = arith.constant 0 : index
    %64 = vector.load %arg15[%c0_42, %c3, %c0_43] : memref<8x8x32xf32, #tpu.memory_space<vmem>>, vector<8x1x32xf32>
    %65 = vector.shape_cast %64 : vector<8x1x32xf32> to vector<8x32xf32>
    %66 = arith.truncf %60 : vector<8x32xf32> to vector<8x32xbf16>
    %cst_44 = arith.constant dense<0.000000e+00> : vector<8x32xf32>
    %67 = tpu.matmul %66, %3, %cst_44 {dimension_numbers = #tpu.dot_dimension_numbers<[1], [0], [0], [1], [0, 0, 1, 1], [], []>} : vector<8x32xbf16>, vector<32x32xbf16>, vector<8x32xf32> -> vector<8x32xf32>
    %68 = arith.addf %65, %67 : vector<8x32xf32>
    %cst_45 = arith.constant 5.000000e-01 : f32
    %69 = vector.broadcast %cst_45 : f32 to vector<8x32xf32>
    %70 = arith.mulf %69, %68 : vector<8x32xf32>
    %cst_46 = arith.constant 0.707106769 : f32
    %71 = vector.broadcast %cst_46 : f32 to vector<8x32xf32>
    %72 = arith.mulf %68, %71 : vector<8x32xf32>
    %73 = math.erf %72 : vector<8x32xf32>
    %cst_47 = arith.constant 1.000000e+00 : f32
    %74 = vector.broadcast %cst_47 : f32 to vector<8x32xf32>
    %75 = arith.addf %74, %73 : vector<8x32xf32>
    %76 = arith.mulf %70, %75 : vector<8x32xf32>
    %c0_48 = arith.constant 0 : index
    %c3_49 = arith.constant 3 : index
    %c0_50 = arith.constant 0 : index
    %77 = vector.load %arg16[%c0_48, %c3_49, %c0_50] : memref<8x8x32xf32, #tpu.memory_space<vmem>>, vector<8x1x32xf32>
    %78 = vector.shape_cast %77 : vector<8x1x32xf32> to vector<8x32xf32>
    %79 = vector.shape_cast %76 : vector<8x32xf32> to vector<8x1x32xf32>
    tpu.vector_store %arg16[%c0_48, %c3_49, %c0_50], %79 {strides = array<i32>} : memref<8x8x32xf32, #tpu.memory_space<vmem>>, vector<8x1x32xf32>,
    %c0_51 = arith.constant 0 : index
    %c4 = arith.constant 4 : index
    %c0_52 = arith.constant 0 : index
    %80 = vector.load %arg15[%c0_51, %c4, %c0_52] : memref<8x8x32xf32, #tpu.memory_space<vmem>>, vector<8x1x32xf32>
    %81 = vector.shape_cast %80 : vector<8x1x32xf32> to vector<8x32xf32>
    %82 = arith.truncf %76 : vector<8x32xf32> to vector<8x32xbf16>
    %cst_53 = arith.constant dense<0.000000e+00> : vector<8x32xf32>
    %83 = tpu.matmul %82, %3, %cst_53 {dimension_numbers = #tpu.dot_dimension_numbers<[1], [0], [0], [1], [0, 0, 1, 1], [], []>} : vector<8x32xbf16>, vector<32x32xbf16>, vector<8x32xf32> -> vector<8x32xf32>
    %84 = arith.addf %81, %83 : vector<8x32xf32>
    %cst_54 = arith.constant 5.000000e-01 : f32
    %85 = vector.broadcast %cst_54 : f32 to vector<8x32xf32>
    %86 = arith.mulf %85, %84 : vector<8x32xf32>
    %cst_55 = arith.constant 0.707106769 : f32
    %87 = vector.broadcast %cst_55 : f32 to vector<8x32xf32>
    %88 = arith.mulf %84, %87 : vector<8x32xf32>
    %89 = math.erf %88 : vector<8x32xf32>
    %cst_56 = arith.constant 1.000000e+00 : f32
    %90 = vector.broadcast %cst_56 : f32 to vector<8x32xf32>
    %91 = arith.addf %90, %89 : vector<8x32xf32>
    %92 = arith.mulf %86, %91 : vector<8x32xf32>
    %c0_57 = arith.constant 0 : index
    %c4_58 = arith.constant 4 : index
    %c0_59 = arith.constant 0 : index
    %93 = vector.load %arg16[%c0_57, %c4_58, %c0_59] : memref<8x8x32xf32, #tpu.memory_space<vmem>>, vector<8x1x32xf32>
    %94 = vector.shape_cast %93 : vector<8x1x32xf32> to vector<8x32xf32>
    %95 = vector.shape_cast %92 : vector<8x32xf32> to vector<8x1x32xf32>
    tpu.vector_store %arg16[%c0_57, %c4_58, %c0_59], %95 {strides = array<i32>} : memref<8x8x32xf32, #tpu.memory_space<vmem>>, vector<8x1x32xf32>,
    %c0_60 = arith.constant 0 : index
    %c5 = arith.constant 5 : index
    %c0_61 = arith.constant 0 : index
    %96 = vector.load %arg15[%c0_60, %c5, %c0_61] : memref<8x8x32xf32, #tpu.memory_space<vmem>>, vector<8x1x32xf32>
    %97 = vector.shape_cast %96 : vector<8x1x32xf32> to vector<8x32xf32>
    %98 = arith.truncf %92 : vector<8x32xf32> to vector<8x32xbf16>
    %cst_62 = arith.constant dense<0.000000e+00> : vector<8x32xf32>
    %99 = tpu.matmul %98, %3, %cst_62 {dimension_numbers = #tpu.dot_dimension_numbers<[1], [0], [0], [1], [0, 0, 1, 1], [], []>} : vector<8x32xbf16>, vector<32x32xbf16>, vector<8x32xf32> -> vector<8x32xf32>
    %100 = arith.addf %97, %99 : vector<8x32xf32>
    %cst_63 = arith.constant 5.000000e-01 : f32
    %101 = vector.broadcast %cst_63 : f32 to vector<8x32xf32>
    %102 = arith.mulf %101, %100 : vector<8x32xf32>
    %cst_64 = arith.constant 0.707106769 : f32
    %103 = vector.broadcast %cst_64 : f32 to vector<8x32xf32>
    %104 = arith.mulf %100, %103 : vector<8x32xf32>
    %105 = math.erf %104 : vector<8x32xf32>
    %cst_65 = arith.constant 1.000000e+00 : f32
    %106 = vector.broadcast %cst_65 : f32 to vector<8x32xf32>
    %107 = arith.addf %106, %105 : vector<8x32xf32>
    %108 = arith.mulf %102, %107 : vector<8x32xf32>
    %c0_66 = arith.constant 0 : index
    %c5_67 = arith.constant 5 : index
    %c0_68 = arith.constant 0 : index
    %109 = vector.load %arg16[%c0_66, %c5_67, %c0_68] : memref<8x8x32xf32, #tpu.memory_space<vmem>>, vector<8x1x32xf32>
    %110 = vector.shape_cast %109 : vector<8x1x32xf32> to vector<8x32xf32>
    %111 = vector.shape_cast %108 : vector<8x32xf32> to vector<8x1x32xf32>
    tpu.vector_store %arg16[%c0_66, %c5_67, %c0_68], %111 {strides = array<i32>} : memref<8x8x32xf32, #tpu.memory_space<vmem>>, vector<8x1x32xf32>,
    %c0_69 = arith.constant 0 : index
    %c6 = arith.constant 6 : index
    %c0_70 = arith.constant 0 : index
    %112 = vector.load %arg15[%c0_69, %c6, %c0_70] : memref<8x8x32xf32, #tpu.memory_space<vmem>>, vector<8x1x32xf32>
    %113 = vector.shape_cast %112 : vector<8x1x32xf32> to vector<8x32xf32>
    %114 = arith.truncf %108 : vector<8x32xf32> to vector<8x32xbf16>
    %cst_71 = arith.constant dense<0.000000e+00> : vector<8x32xf32>
    %115 = tpu.matmul %114, %3, %cst_71 {dimension_numbers = #tpu.dot_dimension_numbers<[1], [0], [0], [1], [0, 0, 1, 1], [], []>} : vector<8x32xbf16>, vector<32x32xbf16>, vector<8x32xf32> -> vector<8x32xf32>
    %116 = arith.addf %113, %115 : vector<8x32xf32>
    %cst_72 = arith.constant 5.000000e-01 : f32
    %117 = vector.broadcast %cst_72 : f32 to vector<8x32xf32>
    %118 = arith.mulf %117, %116 : vector<8x32xf32>
    %cst_73 = arith.constant 0.707106769 : f32
    %119 = vector.broadcast %cst_73 : f32 to vector<8x32xf32>
    %120 = arith.mulf %116, %119 : vector<8x32xf32>
    %121 = math.erf %120 : vector<8x32xf32>
    %cst_74 = arith.constant 1.000000e+00 : f32
    %122 = vector.broadcast %cst_74 : f32 to vector<8x32xf32>
    %123 = arith.addf %122, %121 : vector<8x32xf32>
    %124 = arith.mulf %118, %123 : vector<8x32xf32>
    %c0_75 = arith.constant 0 : index
    %c6_76 = arith.constant 6 : index
    %c0_77 = arith.constant 0 : index
    %125 = vector.load %arg16[%c0_75, %c6_76, %c0_77] : memref<8x8x32xf32, #tpu.memory_space<vmem>>, vector<8x1x32xf32>
    %126 = vector.shape_cast %125 : vector<8x1x32xf32> to vector<8x32xf32>
    %127 = vector.shape_cast %124 : vector<8x32xf32> to vector<8x1x32xf32>
    tpu.vector_store %arg16[%c0_75, %c6_76, %c0_77], %127 {strides = array<i32>} : memref<8x8x32xf32, #tpu.memory_space<vmem>>, vector<8x1x32xf32>,
    %c0_78 = arith.constant 0 : index
    %c7 = arith.constant 7 : index
    %c0_79 = arith.constant 0 : index
    %128 = vector.load %arg15[%c0_78, %c7, %c0_79] : memref<8x8x32xf32, #tpu.memory_space<vmem>>, vector<8x1x32xf32>
    %129 = vector.shape_cast %128 : vector<8x1x32xf32> to vector<8x32xf32>
    %130 = arith.truncf %124 : vector<8x32xf32> to vector<8x32xbf16>
    %cst_80 = arith.constant dense<0.000000e+00> : vector<8x32xf32>
    %131 = tpu.matmul %130, %3, %cst_80 {dimension_numbers = #tpu.dot_dimension_numbers<[1], [0], [0], [1], [0, 0, 1, 1], [], []>} : vector<8x32xbf16>, vector<32x32xbf16>, vector<8x32xf32> -> vector<8x32xf32>
    %132 = arith.addf %129, %131 : vector<8x32xf32>
    %cst_81 = arith.constant 5.000000e-01 : f32
    %133 = vector.broadcast %cst_81 : f32 to vector<8x32xf32>
    %134 = arith.mulf %133, %132 : vector<8x32xf32>
    %cst_82 = arith.constant 0.707106769 : f32
    %135 = vector.broadcast %cst_82 : f32 to vector<8x32xf32>
    %136 = arith.mulf %132, %135 : vector<8x32xf32>
    %137 = math.erf %136 : vector<8x32xf32>
    %cst_83 = arith.constant 1.000000e+00 : f32
    %138 = vector.broadcast %cst_83 : f32 to vector<8x32xf32>
    %139 = arith.addf %138, %137 : vector<8x32xf32>
    %140 = arith.mulf %134, %139 : vector<8x32xf32>
    %c0_84 = arith.constant 0 : index
    %c7_85 = arith.constant 7 : index
    %c0_86 = arith.constant 0 : index
    %141 = vector.load %arg16[%c0_84, %c7_85, %c0_86] : memref<8x8x32xf32, #tpu.memory_space<vmem>>, vector<8x1x32xf32>
    %142 = vector.shape_cast %141 : vector<8x1x32xf32> to vector<8x32xf32>
    %143 = vector.shape_cast %140 : vector<8x32xf32> to vector<8x1x32xf32>
    tpu.vector_store %arg16[%c0_84, %c7_85, %c0_86], %143 {strides = array<i32>} : memref<8x8x32xf32, #tpu.memory_space<vmem>>, vector<8x1x32xf32>,
    %c0_87 = arith.constant 0 : index
    %c0_88 = arith.constant 0 : index
    %c0_89 = arith.constant 0 : index
    %144 = vector.load %arg16[%c0_87, %c0_88, %c0_89] : memref<8x8x32xf32, #tpu.memory_space<vmem>>, vector<8x8x32xf32>
    %145 = vector.shape_cast %144 : vector<8x8x32xf32> to vector<64x32xf32>
    %146 = arith.truncf %145 : vector<64x32xf32> to vector<64x32xbf16>
    %cst_90 = arith.constant dense<0.000000e+00> : vector<64x32xf32>
    %147 = tpu.matmul %146, %5, %cst_90 {dimension_numbers = #tpu.dot_dimension_numbers<[1], [0], [0], [1], [0, 0, 1, 1], [], []>} : vector<64x32xbf16>, vector<32x32xbf16>, vector<64x32xf32> -> vector<64x32xf32>
    %c0_91 = arith.constant 0 : index
    %c0_92 = arith.constant 0 : index
    %148 = vector.load %arg6[%c0_91, %c0_92] : memref<1x32xf32, #tpu.memory_space<vmem>>, vector<1x32xf32>
    %149 = vector.broadcast %148 : vector<1x32xf32> to vector<64x32xf32>
    %150 = arith.addf %147, %149 : vector<64x32xf32>
    %cst_93 = arith.constant 5.000000e-01 : f32
    %151 = vector.broadcast %cst_93 : f32 to vector<64x32xf32>
    %152 = arith.mulf %151, %150 : vector<64x32xf32>
    %cst_94 = arith.constant 0.707106769 : f32
    %153 = vector.broadcast %cst_94 : f32 to vector<64x32xf32>
    %154 = arith.mulf %150, %153 : vector<64x32xf32>
    %155 = math.erf %154 : vector<64x32xf32>
    %cst_95 = arith.constant 1.000000e+00 : f32
    %156 = vector.broadcast %cst_95 : f32 to vector<64x32xf32>
    %157 = arith.addf %156, %155 : vector<64x32xf32>
    %158 = arith.mulf %152, %157 : vector<64x32xf32>
    %c0_96 = arith.constant 0 : index
    %c0_97 = arith.constant 0 : index
    %159 = vector.load %arg8[%c0_96, %c0_97] : memref<32x32xf32, #tpu.memory_space<vmem>>, vector<32x32xf32>
    %160 = arith.truncf %159 : vector<32x32xf32> to vector<32x32xbf16>
    %c0_98 = arith.constant 0 : index
    %c0_99 = arith.constant 0 : index
    %161 = vector.load %arg10[%c0_98, %c0_99] : memref<32x32xf32, #tpu.memory_space<vmem>>, vector<32x32xf32>
    %162 = arith.truncf %161 : vector<32x32xf32> to vector<32x32xbf16>
    %163 = arith.truncf %158 : vector<64x32xf32> to vector<64x32xbf16>
    %c0_100 = arith.constant 0 : index
    %c0_101 = arith.constant 0 : index
    %164 = vector.load %arg7[%c0_100, %c0_101] : memref<32x32xf32, #tpu.memory_space<vmem>>, vector<32x32xf32>
    %165 = arith.truncf %164 : vector<32x32xf32> to vector<32x32xbf16>
    %cst_102 = arith.constant dense<0.000000e+00> : vector<64x32xf32>
    %166 = tpu.matmul %163, %165, %cst_102 {dimension_numbers = #tpu.dot_dimension_numbers<[1], [0], [0], [1], [0, 0, 1, 1], [], []>} : vector<64x32xbf16>, vector<32x32xbf16>, vector<64x32xf32> -> vector<64x32xf32>
    %c0_103 = arith.constant 0 : index
    %c0_104 = arith.constant 0 : index
    %167 = vector.load %arg9[%c0_103, %c0_104] : memref<1x32xf32, #tpu.memory_space<vmem>>, vector<1x32xf32>
    %168 = vector.broadcast %167 : vector<1x32xf32> to vector<64x32xf32>
    %169 = arith.addf %166, %168 : vector<64x32xf32>
    %170 = vector.shape_cast %169 : vector<64x32xf32> to vector<8x8x32xf32>
    %c0_105 = arith.constant 0 : index
    %c0_106 = arith.constant 0 : index
    %c0_107 = arith.constant 0 : index
    %171 = vector.load %arg15[%c0_105, %c0_106, %c0_107] : memref<8x8x32xf32, #tpu.memory_space<vmem>>, vector<8x8x32xf32>
    tpu.vector_store %arg15[%c0_105, %c0_106, %c0_107], %170 {strides = array<i32>} : memref<8x8x32xf32, #tpu.memory_space<vmem>>, vector<8x8x32xf32>,
    %cst_108 = arith.constant 0.000000e+00 : f32
    %172 = vector.broadcast %cst_108 : f32 to vector<8x32xf32>
    %c0_109 = arith.constant 0 : index
    %c0_110 = arith.constant 0 : index
    %c0_111 = arith.constant 0 : index
    %173 = vector.load %arg15[%c0_109, %c0_110, %c0_111] : memref<8x8x32xf32, #tpu.memory_space<vmem>>, vector<8x1x32xf32>
    %174 = vector.shape_cast %173 : vector<8x1x32xf32> to vector<8x32xf32>
    %175 = arith.truncf %172 : vector<8x32xf32> to vector<8x32xbf16>
    %cst_112 = arith.constant dense<0.000000e+00> : vector<8x32xf32>
    %176 = tpu.matmul %175, %160, %cst_112 {dimension_numbers = #tpu.dot_dimension_numbers<[1], [0], [0], [1], [0, 0, 1, 1], [], []>} : vector<8x32xbf16>, vector<32x32xbf16>, vector<8x32xf32> -> vector<8x32xf32>
    %177 = arith.addf %174, %176 : vector<8x32xf32>
    %cst_113 = arith.constant 5.000000e-01 : f32
    %178 = vector.broadcast %cst_113 : f32 to vector<8x32xf32>
    %179 = arith.mulf %178, %177 : vector<8x32xf32>
    %cst_114 = arith.constant 0.707106769 : f32
    %180 = vector.broadcast %cst_114 : f32 to vector<8x32xf32>
    %181 = arith.mulf %177, %180 : vector<8x32xf32>
    %182 = math.erf %181 : vector<8x32xf32>
    %cst_115 = arith.constant 1.000000e+00 : f32
    %183 = vector.broadcast %cst_115 : f32 to vector<8x32xf32>
    %184 = arith.addf %183, %182 : vector<8x32xf32>
    %185 = arith.mulf %179, %184 : vector<8x32xf32>
    %c0_116 = arith.constant 0 : index
    %c1_117 = arith.constant 1 : index
    %c0_118 = arith.constant 0 : index
    %186 = vector.load %arg15[%c0_116, %c1_117, %c0_118] : memref<8x8x32xf32, #tpu.memory_space<vmem>>, vector<8x1x32xf32>
    %187 = vector.shape_cast %186 : vector<8x1x32xf32> to vector<8x32xf32>
    %188 = arith.truncf %185 : vector<8x32xf32> to vector<8x32xbf16>
    %cst_119 = arith.constant dense<0.000000e+00> : vector<8x32xf32>
    %189 = tpu.matmul %188, %160, %cst_119 {dimension_numbers = #tpu.dot_dimension_numbers<[1], [0], [0], [1], [0, 0, 1, 1], [], []>} : vector<8x32xbf16>, vector<32x32xbf16>, vector<8x32xf32> -> vector<8x32xf32>
    %190 = arith.addf %187, %189 : vector<8x32xf32>
    %cst_120 = arith.constant 5.000000e-01 : f32
    %191 = vector.broadcast %cst_120 : f32 to vector<8x32xf32>
    %192 = arith.mulf %191, %190 : vector<8x32xf32>
    %cst_121 = arith.constant 0.707106769 : f32
    %193 = vector.broadcast %cst_121 : f32 to vector<8x32xf32>
    %194 = arith.mulf %190, %193 : vector<8x32xf32>
    %195 = math.erf %194 : vector<8x32xf32>
    %cst_122 = arith.constant 1.000000e+00 : f32
    %196 = vector.broadcast %cst_122 : f32 to vector<8x32xf32>
    %197 = arith.addf %196, %195 : vector<8x32xf32>
    %198 = arith.mulf %192, %197 : vector<8x32xf32>
    %c0_123 = arith.constant 0 : index
    %c2_124 = arith.constant 2 : index
    %c0_125 = arith.constant 0 : index
    %199 = vector.load %arg15[%c0_123, %c2_124, %c0_125] : memref<8x8x32xf32, #tpu.memory_space<vmem>>, vector<8x1x32xf32>
    %200 = vector.shape_cast %199 : vector<8x1x32xf32> to vector<8x32xf32>
    %201 = arith.truncf %198 : vector<8x32xf32> to vector<8x32xbf16>
    %cst_126 = arith.constant dense<0.000000e+00> : vector<8x32xf32>
    %202 = tpu.matmul %201, %160, %cst_126 {dimension_numbers = #tpu.dot_dimension_numbers<[1], [0], [0], [1], [0, 0, 1, 1], [], []>} : vector<8x32xbf16>, vector<32x32xbf16>, vector<8x32xf32> -> vector<8x32xf32>
    %203 = arith.addf %200, %202 : vector<8x32xf32>
    %cst_127 = arith.constant 5.000000e-01 : f32
    %204 = vector.broadcast %cst_127 : f32 to vector<8x32xf32>
    %205 = arith.mulf %204, %203 : vector<8x32xf32>
    %cst_128 = arith.constant 0.707106769 : f32
    %206 = vector.broadcast %cst_128 : f32 to vector<8x32xf32>
    %207 = arith.mulf %203, %206 : vector<8x32xf32>
    %208 = math.erf %207 : vector<8x32xf32>
    %cst_129 = arith.constant 1.000000e+00 : f32
    %209 = vector.broadcast %cst_129 : f32 to vector<8x32xf32>
    %210 = arith.addf %209, %208 : vector<8x32xf32>
    %211 = arith.mulf %205, %210 : vector<8x32xf32>
    %c0_130 = arith.constant 0 : index
    %c3_131 = arith.constant 3 : index
    %c0_132 = arith.constant 0 : index
    %212 = vector.load %arg15[%c0_130, %c3_131, %c0_132] : memref<8x8x32xf32, #tpu.memory_space<vmem>>, vector<8x1x32xf32>
    %213 = vector.shape_cast %212 : vector<8x1x32xf32> to vector<8x32xf32>
    %214 = arith.truncf %211 : vector<8x32xf32> to vector<8x32xbf16>
    %cst_133 = arith.constant dense<0.000000e+00> : vector<8x32xf32>
    %215 = tpu.matmul %214, %160, %cst_133 {dimension_numbers = #tpu.dot_dimension_numbers<[1], [0], [0], [1], [0, 0, 1, 1], [], []>} : vector<8x32xbf16>, vector<32x32xbf16>, vector<8x32xf32> -> vector<8x32xf32>
    %216 = arith.addf %213, %215 : vector<8x32xf32>
    %cst_134 = arith.constant 5.000000e-01 : f32
    %217 = vector.broadcast %cst_134 : f32 to vector<8x32xf32>
    %218 = arith.mulf %217, %216 : vector<8x32xf32>
    %cst_135 = arith.constant 0.707106769 : f32
    %219 = vector.broadcast %cst_135 : f32 to vector<8x32xf32>
    %220 = arith.mulf %216, %219 : vector<8x32xf32>
    %221 = math.erf %220 : vector<8x32xf32>
    %cst_136 = arith.constant 1.000000e+00 : f32
    %222 = vector.broadcast %cst_136 : f32 to vector<8x32xf32>
    %223 = arith.addf %222, %221 : vector<8x32xf32>
    %224 = arith.mulf %218, %223 : vector<8x32xf32>
    %c0_137 = arith.constant 0 : index
    %c4_138 = arith.constant 4 : index
    %c0_139 = arith.constant 0 : index
    %225 = vector.load %arg15[%c0_137, %c4_138, %c0_139] : memref<8x8x32xf32, #tpu.memory_space<vmem>>, vector<8x1x32xf32>
    %226 = vector.shape_cast %225 : vector<8x1x32xf32> to vector<8x32xf32>
    %227 = arith.truncf %224 : vector<8x32xf32> to vector<8x32xbf16>
    %cst_140 = arith.constant dense<0.000000e+00> : vector<8x32xf32>
    %228 = tpu.matmul %227, %160, %cst_140 {dimension_numbers = #tpu.dot_dimension_numbers<[1], [0], [0], [1], [0, 0, 1, 1], [], []>} : vector<8x32xbf16>, vector<32x32xbf16>, vector<8x32xf32> -> vector<8x32xf32>
    %229 = arith.addf %226, %228 : vector<8x32xf32>
    %cst_141 = arith.constant 5.000000e-01 : f32
    %230 = vector.broadcast %cst_141 : f32 to vector<8x32xf32>
    %231 = arith.mulf %230, %229 : vector<8x32xf32>
    %cst_142 = arith.constant 0.707106769 : f32
    %232 = vector.broadcast %cst_142 : f32 to vector<8x32xf32>
    %233 = arith.mulf %229, %232 : vector<8x32xf32>
    %234 = math.erf %233 : vector<8x32xf32>
    %cst_143 = arith.constant 1.000000e+00 : f32
    %235 = vector.broadcast %cst_143 : f32 to vector<8x32xf32>
    %236 = arith.addf %235, %234 : vector<8x32xf32>
    %237 = arith.mulf %231, %236 : vector<8x32xf32>
    %c0_144 = arith.constant 0 : index
    %c5_145 = arith.constant 5 : index
    %c0_146 = arith.constant 0 : index
    %238 = vector.load %arg15[%c0_144, %c5_145, %c0_146] : memref<8x8x32xf32, #tpu.memory_space<vmem>>, vector<8x1x32xf32>
    %239 = vector.shape_cast %238 : vector<8x1x32xf32> to vector<8x32xf32>
    %240 = arith.truncf %237 : vector<8x32xf32> to vector<8x32xbf16>
    %cst_147 = arith.constant dense<0.000000e+00> : vector<8x32xf32>
    %241 = tpu.matmul %240, %160, %cst_147 {dimension_numbers = #tpu.dot_dimension_numbers<[1], [0], [0], [1], [0, 0, 1, 1], [], []>} : vector<8x32xbf16>, vector<32x32xbf16>, vector<8x32xf32> -> vector<8x32xf32>
    %242 = arith.addf %239, %241 : vector<8x32xf32>
    %cst_148 = arith.constant 5.000000e-01 : f32
    %243 = vector.broadcast %cst_148 : f32 to vector<8x32xf32>
    %244 = arith.mulf %243, %242 : vector<8x32xf32>
    %cst_149 = arith.constant 0.707106769 : f32
    %245 = vector.broadcast %cst_149 : f32 to vector<8x32xf32>
    %246 = arith.mulf %242, %245 : vector<8x32xf32>
    %247 = math.erf %246 : vector<8x32xf32>
    %cst_150 = arith.constant 1.000000e+00 : f32
    %248 = vector.broadcast %cst_150 : f32 to vector<8x32xf32>
    %249 = arith.addf %248, %247 : vector<8x32xf32>
    %250 = arith.mulf %244, %249 : vector<8x32xf32>
    %c0_151 = arith.constant 0 : index
    %c6_152 = arith.constant 6 : index
    %c0_153 = arith.constant 0 : index
    %251 = vector.load %arg15[%c0_151, %c6_152, %c0_153] : memref<8x8x32xf32, #tpu.memory_space<vmem>>, vector<8x1x32xf32>
    %252 = vector.shape_cast %251 : vector<8x1x32xf32> to vector<8x32xf32>
    %253 = arith.truncf %250 : vector<8x32xf32> to vector<8x32xbf16>
    %cst_154 = arith.constant dense<0.000000e+00> : vector<8x32xf32>
    %254 = tpu.matmul %253, %160, %cst_154 {dimension_numbers = #tpu.dot_dimension_numbers<[1], [0], [0], [1], [0, 0, 1, 1], [], []>} : vector<8x32xbf16>, vector<32x32xbf16>, vector<8x32xf32> -> vector<8x32xf32>
    %255 = arith.addf %252, %254 : vector<8x32xf32>
    %cst_155 = arith.constant 5.000000e-01 : f32
    %256 = vector.broadcast %cst_155 : f32 to vector<8x32xf32>
    %257 = arith.mulf %256, %255 : vector<8x32xf32>
    %cst_156 = arith.constant 0.707106769 : f32
    %258 = vector.broadcast %cst_156 : f32 to vector<8x32xf32>
    %259 = arith.mulf %255, %258 : vector<8x32xf32>
    %260 = math.erf %259 : vector<8x32xf32>
    %cst_157 = arith.constant 1.000000e+00 : f32
    %261 = vector.broadcast %cst_157 : f32 to vector<8x32xf32>
    %262 = arith.addf %261, %260 : vector<8x32xf32>
    %263 = arith.mulf %257, %262 : vector<8x32xf32>
    %c0_158 = arith.constant 0 : index
    %c7_159 = arith.constant 7 : index
    %c0_160 = arith.constant 0 : index
    %264 = vector.load %arg15[%c0_158, %c7_159, %c0_160] : memref<8x8x32xf32, #tpu.memory_space<vmem>>, vector<8x1x32xf32>
    %265 = vector.shape_cast %264 : vector<8x1x32xf32> to vector<8x32xf32>
    %266 = arith.truncf %263 : vector<8x32xf32> to vector<8x32xbf16>
    %cst_161 = arith.constant dense<0.000000e+00> : vector<8x32xf32>
    %267 = tpu.matmul %266, %160, %cst_161 {dimension_numbers = #tpu.dot_dimension_numbers<[1], [0], [0], [1], [0, 0, 1, 1], [], []>} : vector<8x32xbf16>, vector<32x32xbf16>, vector<8x32xf32> -> vector<8x32xf32>
    %268 = arith.addf %265, %267 : vector<8x32xf32>
    %cst_162 = arith.constant 5.000000e-01 : f32
    %269 = vector.broadcast %cst_162 : f32 to vector<8x32xf32>
    %270 = arith.mulf %269, %268 : vector<8x32xf32>
    %cst_163 = arith.constant 0.707106769 : f32
    %271 = vector.broadcast %cst_163 : f32 to vector<8x32xf32>
    %272 = arith.mulf %268, %271 : vector<8x32xf32>
    %273 = math.erf %272 : vector<8x32xf32>
    %cst_164 = arith.constant 1.000000e+00 : f32
    %274 = vector.broadcast %cst_164 : f32 to vector<8x32xf32>
    %275 = arith.addf %274, %273 : vector<8x32xf32>
    %276 = arith.mulf %270, %275 : vector<8x32xf32>
    %277 = arith.truncf %276 : vector<8x32xf32> to vector<8x32xbf16>
    %cst_165 = arith.constant dense<0.000000e+00> : vector<8x32xf32>
    %278 = tpu.matmul %277, %162, %cst_165 {dimension_numbers = #tpu.dot_dimension_numbers<[1], [0], [0], [1], [0, 0, 1, 1], [], []>} : vector<8x32xbf16>, vector<32x32xbf16>, vector<8x32xf32> -> vector<8x32xf32>
    %c0_166 = arith.constant 0 : index
    %c0_167 = arith.constant 0 : index
    %279 = vector.load %arg11[%c0_166, %c0_167] : memref<1x32xf32, #tpu.memory_space<vmem>>, vector<1x32xf32>
    %280 = vector.broadcast %279 : vector<1x32xf32> to vector<8x32xf32>
    %281 = arith.addf %278, %280 : vector<8x32xf32>
    %cst_168 = arith.constant 5.000000e-01 : f32
    %282 = vector.broadcast %cst_168 : f32 to vector<8x32xf32>
    %283 = arith.mulf %282, %281 : vector<8x32xf32>
    %cst_169 = arith.constant 0.707106769 : f32
    %284 = vector.broadcast %cst_169 : f32 to vector<8x32xf32>
    %285 = arith.mulf %281, %284 : vector<8x32xf32>
    %286 = math.erf %285 : vector<8x32xf32>
    %cst_170 = arith.constant 1.000000e+00 : f32
    %287 = vector.broadcast %cst_170 : f32 to vector<8x32xf32>
    %288 = arith.addf %287, %286 : vector<8x32xf32>
    %289 = arith.mulf %283, %288 : vector<8x32xf32>
    %290 = arith.truncf %289 : vector<8x32xf32> to vector<8x32xbf16>
    %c0_171 = arith.constant 0 : index
    %c0_172 = arith.constant 0 : index
    %291 = vector.load %arg12[%c0_171, %c0_172] : memref<32x8xf32, #tpu.memory_space<vmem>>, vector<32x8xf32>
    %292 = arith.truncf %291 : vector<32x8xf32> to vector<32x8xbf16>
    %cst_173 = arith.constant dense<0.000000e+00> : vector<8x8xf32>
    %293 = tpu.matmul %290, %292, %cst_173 {dimension_numbers = #tpu.dot_dimension_numbers<[1], [0], [0], [1], [0, 0, 1, 1], [], []>} : vector<8x32xbf16>, vector<32x8xbf16>, vector<8x8xf32> -> vector<8x8xf32>
    %c0_174 = arith.constant 0 : index
    %c0_175 = arith.constant 0 : index
    %294 = vector.load %arg13[%c0_174, %c0_175] : memref<1x8xf32, #tpu.memory_space<vmem>>, vector<1x8xf32>
    %295 = vector.broadcast %294 : vector<1x8xf32> to vector<8x8xf32>
    %296 = arith.addf %293, %295 : vector<8x8xf32>
    %c0_176 = arith.constant 0 : index
    %c0_177 = arith.constant 0 : index
    %297 = vector.load %arg14[%c0_176, %c0_177] : memref<8x8xf32, #tpu.memory_space<vmem>>, vector<8x8xf32>
    tpu.vector_store %arg14[%c0_176, %c0_177], %296 {strides = array<i32>} : memref<8x8xf32, #tpu.memory_space<vmem>>, vector<8x8xf32>,
    return
  }
  func.func @transform_0(%arg0: i32) -> (i32, i32, i32) {
    %c0_i32 = arith.constant 0 : i32
    %c0_i32_0 = arith.constant 0 : i32
    %c0_i32_1 = arith.constant 0 : i32
    %c0_i32_2 = arith.constant 0 : i32
    return %c0_i32, %c0_i32_0, %c0_i32_1 : i32, i32, i32
  }
  func.func @transform_1(%arg0: i32) -> (i32, i32) {
    %c0_i32 = arith.constant 0 : i32
    %c0_i32_0 = arith.constant 0 : i32
    %c0_i32_1 = arith.constant 0 : i32
    return %c0_i32, %c0_i32_0 : i32, i32
  }
  func.func @transform_2(%arg0: i32) -> (i32, i32) {
    %c0_i32 = arith.constant 0 : i32
    %c0_i32_0 = arith.constant 0 : i32
    %c0_i32_1 = arith.constant 0 : i32
    return %c0_i32, %c0_i32_0 : i32, i32
  }
  func.func @transform_3(%arg0: i32) -> (i32, i32) {
    %c0_i32 = arith.constant 0 : i32
    %c0_i32_0 = arith.constant 0 : i32
    %c0_i32_1 = arith.constant 0 : i32
    return %c0_i32, %c0_i32_0 : i32, i32
  }
  func.func @transform_4(%arg0: i32) -> (i32, i32) {
    %c0_i32 = arith.constant 0 : i32
    %c0_i32_0 = arith.constant 0 : i32
    %c0_i32_1 = arith.constant 0 : i32
    return %c0_i32, %c0_i32_0 : i32, i32
  }
  func.func @transform_5(%arg0: i32) -> (i32, i32) {
    %c0_i32 = arith.constant 0 : i32
    %c0_i32_0 = arith.constant 0 : i32
    %c0_i32_1 = arith.constant 0 : i32
    return %c0_i32, %c0_i32_0 : i32, i32
  }
  func.func @transform_6(%arg0: i32) -> (i32, i32) {
    %c0_i32 = arith.constant 0 : i32
    %c0_i32_0 = arith.constant 0 : i32
    %c0_i32_1 = arith.constant 0 : i32
    return %c0_i32, %c0_i32_0 : i32, i32
  }
  func.func @transform_7(%arg0: i32) -> (i32, i32) {
    %c0_i32 = arith.constant 0 : i32
    %c0_i32_0 = arith.constant 0 : i32
    %c0_i32_1 = arith.constant 0 : i32
    return %c0_i32, %c0_i32_0 : i32, i32
  }
  func.func @transform_8(%arg0: i32) -> (i32, i32) {
    %c0_i32 = arith.constant 0 : i32
    %c0_i32_0 = arith.constant 0 : i32
    %c0_i32_1 = arith.constant 0 : i32
    return %c0_i32, %c0_i32_0 : i32, i32
  }
  func.func @transform_9(%arg0: i32) -> (i32, i32) {
    %c0_i32 = arith.constant 0 : i32
    %c0_i32_0 = arith.constant 0 : i32
    %c0_i32_1 = arith.constant 0 : i32
    return %c0_i32, %c0_i32_0 : i32, i32
  }
  func.func @transform_10(%arg0: i32) -> (i32, i32) {
    %c0_i32 = arith.constant 0 : i32
    %c0_i32_0 = arith.constant 0 : i32
    %c0_i32_1 = arith.constant 0 : i32
    return %c0_i32, %c0_i32_0 : i32, i32
  }
  func.func @transform_11(%arg0: i32) -> (i32, i32) {
    %c0_i32 = arith.constant 0 : i32
    %c0_i32_0 = arith.constant 0 : i32
    %c0_i32_1 = arith.constant 0 : i32
    return %c0_i32, %c0_i32_0 : i32, i32
  }
  func.func @transform_12(%arg0: i32) -> (i32, i32) {
    %c0_i32 = arith.constant 0 : i32
    %c0_i32_0 = arith.constant 0 : i32
    %c0_i32_1 = arith.constant 0 : i32
    return %c0_i32, %c0_i32_0 : i32, i32
  }
  func.func @transform_13(%arg0: i32) -> (i32, i32) {
    %c0_i32 = arith.constant 0 : i32
    %c0_i32_0 = arith.constant 0 : i32
    %c0_i32_1 = arith.constant 0 : i32
    return %c0_i32, %c0_i32_0 : i32, i32
  }
}

</mosaic_0001>

<bundles_post_ra>
// kernel: rnn_forward.1
= control target key start
LH: loop header
LB: loop body
LE: loop exit
PB: predicated region body
PF: predicated region fallthrough
CT: control target
= control target key end

     0   :  { %18 = vsyncpa [#allocation5], 0  ;;  %s4469_s0 = inlined_call_operand.hbm [shape: f32[8,8,16], index: 0, kind: input, shape index: {}]   ;;  %s4470_s1 = inlined_call_operand.hbm [shape: f32[16,32], index: 1, kind: input, shape index: {}]   ;;  %s4471_s2 = inlined_call_operand.vmem [shape: f32[32,32], index: 2, kind: input, shape index: {}]   ;;  %s4472_s3 = inlined_call_operand.vmem [shape: f32[1,32], index: 3, kind: input, shape index: {}]   ;;  %s4473_s4 = inlined_call_operand.hbm [shape: f32[32,32], index: 4, kind: input, shape index: {}]   ;;  %s4474_s5 = inlined_call_operand.vmem [shape: f32[1,32], index: 5, kind: input, shape index: {}]   ;;  %s4475_s6 = inlined_call_operand.vmem [shape: f32[32,32], index: 6, kind: input, shape index: {}]   ;;  %s4476_s7 = inlined_call_operand.hbm [shape: f32[32,32], index: 7, kind: input, shape index: {}]   ;;  %s4477_s8 = inlined_call_operand.hbm [shape: f32[1,32], index: 8, kind: input, shape index: {}]   ;;  %s4478_s9 = inlined_call_operand.hbm [shape: f32[32,32], index: 9, kind: input, shape index: {}]   ;;  %s4479_s10 = inlined_call_operand.hbm [shape: f32[1,32], index: 10, kind: input, shape index: {}]   ;;  %s4480_s11 = inlined_call_operand.vmem [shape: f32[32,8], index: 11, kind: input, shape index: {}]   ;;  %s4481_s12 = inlined_call_operand.vmem [shape: f32[1,8], index: 12, kind: input, shape index: {}]   ;;  %s4482_s13 = inlined_call_operand.hbm [shape: f32[8,8], index: 13, kind: output, shape index: {}]  }
   0x1   :  { %19 = vsyncpa [#allocation8], 0 }
   0x2   :  { %20 = vsyncpa [#allocation11], 0 }
   0x3   :  { %21 = vsyncpa [#allocation14], 0 }
   0x4   :  { %22 = vsyncpa [#allocation6], 0  ;;  %s3889_s25 = smov [#allocation7]   ;;  %s3890_s27 = smov [#allocation10]  }
   0x5   :  { %s40_s26 = sshll.u32 %s3889_s25, 4  ;;  %s72_s28 = sshll.u32 %s3890_s27, 4  ;;  %s41_s26 = int_to_ptr.vmem [resolvable:$true] %s40_s26  ;;  %s3972_s28 = int_to_ptr.vmem [resolvable:$true] %s72_s28 }
   0x6   :  { %s3703_s14 = scalar_lea.hbm %s4470_s1, 256 }
   0x7   :  { %p3704_p0 = scmp.ne.s32.totalorder %s4470_s1, %s3703_s14  ;;  %p3707_p1 = scmp.lt.u32.totalorder %s3703_s14, %s4470_s1 }
   0x9   :  { %p3709_p2 = pnand %p3707_p1, %p3704_p0 }
   0xb   :  { %3712 = shalt.err (!%p3709_p2)
}
   0xc   :  { %s3713_s19 = scalar_lea.vmem %s41_s26, 256  ;;  %p3718_p4 = scmp.lt.s32.totalorder %s41_s26, %s41_s26 }
   0xd   :  { %p3714_p3 = scmp.ne.s32.totalorder %s41_s26, %s3713_s19  ;;  %p3719_p5 = scmp.lt.s32.totalorder %s3713_s19, %s3713_s19 }
   0xf   :  { %p3720_p6 = por %p3719_p5, %p3718_p4 }
  0x11   :  { %p3721_p7 = pnand %p3720_p6, %p3714_p3 }
  0x13   :  { %3724 = shalt.err (!%p3721_p7)
}
  0x14   :  { %s3891_s20 = smov 128   ;;  %s3892_s21 = smov 8  }
  0x15   :  { %46 = dma.hbm_to_vmem [thread:$0]  %s4470_s1, 256, %s41_s26, [#allocation8], %s3891_s20, %s3891_s20, %s3892_s21  }
  0x16   :  { %s3725_s27 = scalar_lea.hbm %s4476_s7, 512 }
  0x17   :  { %p3726_p8 = scmp.ne.s32.totalorder %s4476_s7, %s3725_s27  ;;  %p3729_p9 = scmp.lt.u32.totalorder %s3725_s27, %s4476_s7 }
  0x19   :  { %p3731_p10 = pnand %p3729_p9, %p3726_p8 }
  0x1b   :  { %3734 = shalt.err (!%p3731_p10)
}
  0x1c   :  { %s3735_s16 = scalar_lea.vmem %s3972_s28, 512  ;;  %p3740_p12 = scmp.lt.s32.totalorder %s3972_s28, %s3972_s28 }
  0x1d   :  { %p3736_p11 = scmp.ne.s32.totalorder %s3972_s28, %s3735_s16  ;;  %p3741_p13 = scmp.lt.s32.totalorder %s3735_s16, %s3735_s16 }
  0x1f   :  { %p3742_p0 = por %p3741_p13, %p3740_p12 }
  0x21   :  { %p3743_p1 = pnand %p3742_p0, %p3736_p11 }
  0x23   :  { %3746 = shalt.err (!%p3743_p1)
}
  0x24   :  { %78 = dma.hbm_to_vmem [thread:$0]  %s4476_s7, 512, %s3972_s28, [#allocation11], %s3891_s20, %s3891_s20, %s3892_s21  }
  0x25   :  { %s3893_s17 = smov [#allocation13]   ;;  %s3894_s19 = smov [#allocation4]  }
  0x26   :  { %s94_s18 = sshll.u32 %s3893_s17, 4  ;;  %s28_s22 = sshll.u32 %s3894_s19, 4  ;;  %s95_s18 = int_to_ptr.vmem [resolvable:$true] %s94_s18  ;;  %s4009_s22 = int_to_ptr.vmem [resolvable:$true] %s28_s22 }
  0x27   :  { %s3747_s25 = scalar_lea.hbm %s4478_s9, 512 }
  0x28   :  { %p3748_p2 = scmp.ne.s32.totalorder %s4478_s9, %s3747_s25  ;;  %p3751_p3 = scmp.lt.u32.totalorder %s3747_s25, %s4478_s9 }
  0x2a   :  { %p3753_p4 = pnand %p3751_p3, %p3748_p2 }
  0x2c   :  { %3756 = shalt.err (!%p3753_p4)
}
  0x2d   :  { %s3757_s7 = scalar_lea.vmem %s95_s18, 512  ;;  %p3762_p6 = scmp.lt.s32.totalorder %s95_s18, %s95_s18 }
  0x2e   :  { %p3758_p5 = scmp.ne.s32.totalorder %s95_s18, %s3757_s7  ;;  %p3763_p7 = scmp.lt.s32.totalorder %s3757_s7, %s3757_s7 }
  0x30   :  { %p3764_p8 = por %p3763_p7, %p3762_p6 }
  0x32   :  { %p3765_p9 = pnand %p3764_p8, %p3758_p5 }
  0x34   :  { %3768 = shalt.err (!%p3765_p9)
}
  0x35   :  { %100 = dma.hbm_to_vmem [thread:$0]  %s4478_s9, 512, %s95_s18, [#allocation14], %s3891_s20, %s3891_s20, %s3892_s21  }
  0x36   :  { %s3769_s26 = scalar_lea.hbm %s4469_s0, 1024 }
  0x37   :  { %p3770_p10 = scmp.ne.s32.totalorder %s4469_s0, %s3769_s26  ;;  %p3773_p11 = scmp.lt.u32.totalorder %s3769_s26, %s4469_s0 }
  0x39   :  { %p3775_p12 = pnand %p3773_p11, %p3770_p10 }
  0x3b   :  { %3778 = shalt.err (!%p3775_p12)
}
  0x3c   :  { %s3779_s25 = scalar_lea.vmem %s4009_s22, 1024  ;;  %p3784_p0 = scmp.lt.s32.totalorder %s4009_s22, %s4009_s22 }
  0x3d   :  { %p3780_p13 = scmp.ne.s32.totalorder %s4009_s22, %s3779_s25  ;;  %p3785_p1 = scmp.lt.s32.totalorder %s3779_s25, %s3779_s25 }
  0x3f   :  { %p3786_p2 = por %p3785_p1, %p3784_p0 }
  0x41   :  { %p3787_p3 = pnand %p3786_p2, %p3780_p13 }
  0x43   :  { %3790 = shalt.err (!%p3787_p3)
}
  0x44   :  { %34 = dma.hbm_to_vmem [thread:$0]  %s4469_s0, 1024, %s4009_s22, [#allocation5], %s3891_s20, %s3891_s20, %s3892_s21  }
  0x45   :  { %s3895_s27 = smov [#allocation9]   ;;  %s3896_s30 = smov [#allocation12]  }
  0x46   :  { %s56_s29 = sshll.u32 %s3895_s27, 4  ;;  %s85_s14 = sshll.u32 %s3896_s30, 4  ;;  %s57_s29 = int_to_ptr.vmem [resolvable:$true] %s56_s29  ;;  %s86_s14 = int_to_ptr.vmem [resolvable:$true] %s85_s14 }
  0x47   :  { %s3791_s15 = scalar_lea.hbm %s4473_s4, 512 }
  0x48   :  { %p3792_p4 = scmp.ne.s32.totalorder %s4473_s4, %s3791_s15  ;;  %p3795_p5 = scmp.lt.u32.totalorder %s3791_s15, %s4473_s4 }
  0x4a   :  { %p3797_p6 = pnand %p3795_p5, %p3792_p4 }
  0x4c   :  { %3800 = shalt.err (!%p3797_p6)
}
  0x4d   :  { %s3801_s0 = scalar_lea.vmem %s57_s29, 512  ;;  %p3806_p8 = scmp.lt.s32.totalorder %s57_s29, %s57_s29 }
  0x4e   :  { %p3802_p7 = scmp.ne.s32.totalorder %s57_s29, %s3801_s0  ;;  %p3807_p9 = scmp.lt.s32.totalorder %s3801_s0, %s3801_s0 }
  0x50   :  { %p3808_p10 = por %p3807_p9, %p3806_p8 }
  0x52   :  { %p3809_p11 = pnand %p3808_p10, %p3802_p7 }
  0x54   :  { %3812 = shalt.err (!%p3809_p11)
}
  0x55   :  { %62 = dma.hbm_to_vmem [thread:$0]  %s4473_s4, 512, %s57_s29, [#allocation8], %s3891_s20, %s3891_s20, %s3892_s21  }
  0x56   :  { %s3813_s25 = scalar_lea.hbm %s4477_s8, 16 }
  0x57   :  { %p3814_p12 = scmp.ne.s32.totalorder %s4477_s8, %s3813_s25  ;;  %p3817_p13 = scmp.lt.u32.totalorder %s3813_s25, %s4477_s8 }
  0x59   :  { %p3819_p0 = pnand %p3817_p13, %p3814_p12 }
  0x5b   :  { %3822 = shalt.err (!%p3819_p0)
}
  0x5c   :  { %s3823_s7 = scalar_lea.vmem %s86_s14, 16  ;;  %s3827_s28 = scalar_lea.vmem %s86_s14, 32 }
  0x5d   :  { %p3824_p1 = scmp.ne.s32.totalorder %s86_s14, %s3823_s7  ;;  %p3828_p2 = scmp.lt.s32.totalorder %s86_s14, %s86_s14 }
  0x5e   :  { %p3829_p3 = scmp.lt.s32.totalorder %s3827_s28, %s3823_s7 }
  0x60   :  { %p3830_p4 = por %p3829_p3, %p3828_p2 }
  0x62   :  { %p3831_p5 = pnand %p3830_p4, %p3824_p1 }
  0x64   :  { %3834 = shalt.err (!%p3831_p5)
}
  0x65   :  { %88 = dma.hbm_to_vmem [thread:$0]  %s4477_s8, 16, %s86_s14, [#allocation11]  }
  0x66   :  { %s3897_s21 = smov [#allocation15]   ;;  %s3835_s1 = scalar_lea.hbm %s4479_s10, 16 }
  0x67   :  { %s107_s29 = sshll.u32 %s3897_s21, 4  ;;  %p3836_p6 = scmp.ne.s32.totalorder %s4479_s10, %s3835_s1  ;;  %s108_s29 = int_to_ptr.vmem [resolvable:$true] %s107_s29 }
  0x68   :  { %p3839_p7 = scmp.lt.u32.totalorder %s3835_s1, %s4479_s10 }
  0x6a   :  { %p3841_p8 = pnand %p3839_p7, %p3836_p6 }
  0x6c   :  { %3844 = shalt.err (!%p3841_p8)
}
  0x6d   :  { %s3845_s19 = scalar_lea.vmem %s108_s29, 16  ;;  %s3849_s8 = scalar_lea.vmem %s108_s29, 32 }
  0x6e   :  { %p3846_p9 = scmp.ne.s32.totalorder %s108_s29, %s3845_s19  ;;  %p3850_p10 = scmp.lt.s32.totalorder %s108_s29, %s108_s29 }
  0x6f   :  { %p3851_p11 = scmp.lt.s32.totalorder %s3849_s8, %s3845_s19 }
  0x71   :  { %p3852_p12 = por %p3851_p11, %p3850_p10 }
  0x73   :  { %p3853_p13 = pnand %p3852_p12, %p3846_p9 }
  0x75   :  { %3856 = shalt.err (!%p3853_p13)
}
  0x76   :  { %110 = dma.hbm_to_vmem [thread:$0]  %s4479_s10, 16, %s108_s29, [#allocation14]  }
  0x77   :  { %3879 = dma.done.wait [#allocation5], 1024  }
  0x78   :  { %3880 = vsyncadd [#allocation5], 4294966272 }
  0x79   :  { %3881 = dma.done.wait [#allocation8], 768  }
  0x7a   :  { %3882 = vsyncadd [#allocation8], 4294966528 }
  0x7b   :  { %3883 = dma.done.wait [#allocation11], 528  }
  0x7c   :  { %3884 = vsyncadd [#allocation11], 4294966768 }
  0x7d   :  { %3885 = dma.done.wait [#allocation14], 528  }
  0x7e   :  { %3886 = vsyncadd [#allocation14], 4294966768  ;;  %v3898_v0 = vmov 0.0   ;;  %vm3899_vm0 = vmmov 0   ;;  %v161_v1 = vld [vmem:[#allocation7] sm:$0xff]  ;;  %v162_v2 = vld [vmem:[#allocation7 + $0x8] sm:$0xff] }
  0x7f   :  { %3248 = vmatprep.subr.bf16.mxu1 %v3898_v0  ;;  %3252 = vmatprep.mubr.msk.bf16.mxu1 %vm3899_vm0, %v3898_v0  ;;  %v137_v3 = vld [vmem:[#allocation4] sm:$0xff]  ;;  %v163_v4 = vpack.c.bf16 %v162_v2, %v161_v1  ;;  %v138_v5 = vld [vmem:[#allocation4 + $0x8] sm:$0xff]  ;;  %vm171_vm1 = vcmask 130048   ;;  %v139_v6 = vld [vmem:[#allocation4 + $0x10] sm:$0xff]  ;;  %v3900_v22 = vmov 0   ;;  %vm249_vm2 = vcmask 261120  }
  0x80   :  { %v140_v7 = vld [vmem:[#allocation4 + $0x18] sm:$0xff]  ;;  %v157_v8 = vpack.c.bf16 %v138_v5, %v137_v3  ;;  %v145_v9 = vld [vmem:[%s4471_s2] sm:$0xff]  ;;  %v146_v10 = vld [vmem:[%s4471_s2 + $0x8] sm:$0xff]  ;;  %vm373_vm3 = vcmask 253952   ;;  %vm415_vm4 = vcmask 1041409   ;;  %vm418_vm5 = vcmask 1042434  }
  0x81   :  { %v147_v11 = vld [vmem:[%s4471_s2 + $0x10] sm:$0xff]  ;;  %3238 = vmatprep.subr.bf16.mxu0 %v163_v4  ;;  %v158_v12 = vpack.c.bf16 %v140_v7, %v139_v6  ;;  %v4097_v13 = vpack.c.bf16 %v146_v10, %v145_v9  ;;  %v148_v14 = vld [vmem:[%s4471_s2 + $0x18] sm:$0xff]  ;;  %v141_v15 = vld [vmem:[#allocation4 + $0x20] sm:$0xff]  ;;  %vm421_vm6 = vcmask 1043459   ;;  %vm424_vm7 = vcmask 1044484   ;;  %s3901_s24 = smov [#allocation16]  }
  0x82   :  { %v142_v16 = vld [vmem:[#allocation4 + $0x28] sm:$0xff]  ;;  %3239 = vmatpush3.bf16.msra.mxu0 %v163_v4  ;;  %3240 = vmatprep.mubr.msk.bf16.mxu0 %vm171_vm1, %v157_v8  ;;  %v4104_v18 = vpack.c.bf16 %v148_v14, %v147_v11  ;;  %v143_v19 = vld [vmem:[#allocation4 + $0x30] sm:$0xff]  ;;  %v144_v20 = vld [vmem:[#allocation4 + $0x38] sm:$0xff]  ;;  %vm427_vm8 = vcmask 1045509   ;;  %vm430_vm9 = vcmask 1046534   ;;  %vm433_vm10 = vcmask 1047559  }
  0x83   :  { %v159_v17 = vpack.c.bf16 %v142_v16, %v141_v15  ;;  %3249 = vmatpush3.bf16.msra.mxu1 %v4097_v13  ;;  %3264 = vmatprep.subr.bf16.mxu0 %v3898_v0  ;;  %v160_v21 = vpack.c.bf16 %v144_v20, %v143_v19  ;;  %v3134_v23 = vld [vmem:[%s4472_s3] ss:$0 sm:$0xff]  ;;  %s3122_s25 = sshll.u32 %s3901_s24, 4  ;;  %vm3114_vm11 = vcmask 64512   ;;  %s3123_s25 = int_to_ptr.vmem [resolvable:$true] %s3122_s25 }
  0x84   :  { %3250 = vmatprep.subr.bf16.mxu1 %v3898_v0  ;;  %s3857_s9 = scalar_lea.vmem %s3123_s25, 128  ;;  %p3862_p1 = scmp.lt.s32.totalorder %s3123_s25, %s3123_s25 }
  0x85   :  { %3241 = vmatmul.mubr.msk.bf16.vlgmr.msra.gmra.mrb[0].mxu0 %vm171_vm1, %v158_v12  ;;  %p3858_p0 = scmp.ne.s32.totalorder %s3123_s25, %s3857_s9  ;;  %p3863_p2 = scmp.lt.s32.totalorder %s3857_s9, %s3857_s9 }
  0x86   :  { %3244 = vmatprep.mubr.msk.bf16.mxu0 %vm171_vm1, %v159_v17  ;;  %3265 = vmatpush3.bf16.msra.mxu0 %v4097_v13 }
  0x87   :  { %3251 = vmatpush3.bf16.msra.mxu1 %v4104_v18  ;;  %3266 = vmatprep.subr.bf16.mxu0 %v3898_v0  ;;  %p3864_p3 = por %p3863_p2, %p3862_p1 }
  0x88   :  { %3256 = vmatprep.subr.bf16.mxu1 %v3898_v0 }
  0x89   :  { %p3865_p4 = pnand %p3864_p3, %p3858_p0 }
  0x8a   :  { %3253 = vmatmul.mubr.bf16.vlgmr.msra.gmra.mrb[0].mxu1 %v3900_v22  ;;  %3267 = vmatpush3.bf16.msra.mxu0 %v4104_v18 }
  0x8b   :  { %3257 = vmatpush3.bf16.msra.mxu1 %v4097_v13  ;;  %3260 = vmatprep.mubr.msk.bf16.mxu1 %vm3899_vm0, %v3898_v0 }
  0x8c   :  { %3258 = vmatprep.subr.bf16.mxu1 %v3898_v0  ;;  %3280 = vmatprep.subr.bf16.mxu0 %v3898_v0 }
  0x8d   :  { %3245 = vmatmul.mubr.msk.bf16.gmra.mrb[4].mxu0 %vm171_vm1, %v160_v21 }
  0x8e   :  { %3268 = vmatprep.mubr.msk.bf16.mxu0 %vm3899_vm0, %v3898_v0 }
  0x8f   :  { %3259 = vmatpush3.bf16.msra.mxu1 %v4104_v18 }
  0x90   :  { %3272 = vmatprep.subr.bf16.mxu1 %v3898_v0 }
 0x158   :  { %v3242_v24 = vpop.f32.mrb[0].mxu0 }
 0x159   :  { %v227_v25 = vadd.f32 %v3242_v24, %v3134_v23  ;;  %v218_v26 = vpop.f32.mrb[1].mxu0 }
 0x15a   :  { %v219_v27 = vadd.f32 %v3134_v23, %v218_v26  ;;  %v3243_v28 = vpop.f32.mrb[2].mxu0 }
 0x15b   :  { %252 = vst.msk [vmem:[#allocation2 + $0x10] sm:$0xff] %vm249_vm2, %v227_v25  ;;  %v230_v29 = vadd.f32 %v3243_v28, %v3134_v23  ;;  %v221_v30 = vpop.f32.mrb[3].mxu0 }
 0x15c   :  { %250 = vst.msk [vmem:[#allocation2] sm:$0xff] %vm249_vm2, %v219_v27  ;;  %v222_v31 = vadd.f32 %v3134_v23, %v221_v30 }
 0x15d   :  { %253 = vst.msk [vmem:[#allocation2 + $0x18] sm:$0xff] %vm249_vm2, %v230_v29  ;;  %v303_v32 = vpop.f32.mrb[0].mxu1 }
 0x15e   :  { %251 = vst.msk [vmem:[#allocation2 + $0x8] sm:$0xff] %vm249_vm2, %v222_v31  ;;  %v3254_v33 = vpop.f32.mrb[1].mxu1  ;;  %v311_v34 = vrot.slane %v303_v32, 2  ;;  %v312_v39 = vrot.slane %v303_v32, 3  ;;  %v310_v42 = vrot.slane %v303_v32, 1  ;;  %v315_v57 = vrot.slane %v303_v32, 6 }
 0x15f   :  { %v306_v35 = vpop.f32.mrb[2].mxu1  ;;  %v313_v61 = vrot.slane %v303_v32, 4  ;;  %v316_v62 = vrot.slane %v303_v32, 7  ;;  %v314_v2 = vrot.slane %v303_v32, 5 }
 0x160   :  { %v3246_v36 = vpop.f32.mrb[4].mxu0  ;;  %v3255_v37 = vpop.f32.mrb[3].mxu1 }
 0x161   :  { %v243_v38 = vadd.f32 %v3246_v36, %v3134_v23  ;;  %v234_v40 = vpop.f32.mrb[5].mxu0 }
 0x162   :  { %v260_v41 = vld [vmem:[#allocation2 + $0x10] sm:$0x1]  ;;  %v235_v43 = vadd.f32 %v3134_v23, %v234_v40  ;;  %v3247_v44 = vpop.f32.mrb[6].mxu0 }
 0x163   :  { %256 = vst.msk [vmem:[#allocation2 + $0x30] sm:$0xff] %vm249_vm2, %v243_v38  ;;  %v258_v45 = vld [vmem:[#allocation2] sm:$0x1]  ;;  %v327_v46 = vadd.f32 %v311_v34, %v260_v41  ;;  %v246_v47 = vadd.f32 %v3247_v44, %v3134_v23  ;;  %v237_v48 = vpop.f32.mrb[7].mxu0 }
 0x164   :  { %v261_v49 = vld [vmem:[#allocation2 + $0x18] sm:$0x1]  ;;  %v325_v50 = vadd.f32 %v303_v32, %v258_v45  ;;  %254 = vst.msk [vmem:[#allocation2 + $0x20] sm:$0xff] %vm249_vm2, %v235_v43  ;;  %v238_v51 = vadd.f32 %v3134_v23, %v237_v48 }
 0x165   :  { %v259_v52 = vld [vmem:[#allocation2 + $0x8] sm:$0x1]  ;;  %v328_v53 = vadd.f32 %v312_v39, %v261_v49  ;;  %v343_v54 = vmul.f32 0.70710677, %v327_v46  ;;  %257 = vst.msk [vmem:[#allocation2 + $0x38] sm:$0xff] %vm249_vm2, %v246_v47  ;;  %v335_v15 = vmul.f32 0.5, %v327_v46 }
 0x166   :  { %v326_v55 = vadd.f32 %v310_v42, %v259_v52  ;;  %v341_v56 = vmul.f32 0.70710677, %v325_v50  ;;  %255 = vst.msk [vmem:[#allocation2 + $0x28] sm:$0xff] %vm249_vm2, %v238_v51  ;;  %v333_v19 = vmul.f32 0.5, %v325_v50 }
 0x167   :  { %v344_v58 = vmul.f32 0.70710677, %v328_v53  ;;  %3429 = verf.f32 %v343_v54  ;;  %v336_v23 = vmul.f32 0.5, %v328_v53 }
 0x168   :  { %v342_v59 = vmul.f32 0.70710677, %v326_v55  ;;  %3431 = verf.f32 %v341_v56  ;;  %v334_v26 = vmul.f32 0.5, %v326_v55 }
 0x169   :  { %3433 = verf.f32 %v344_v58 }
 0x16a   :  { %v264_v60 = vld [vmem:[#allocation2 + $0x30] sm:$0x1]  ;;  %3435 = verf.f32 %v342_v59 }
 0x16b   :  { %v331_v63 = vadd.f32 %v315_v57, %v264_v60  ;;  %v262_v1 = vld [vmem:[#allocation2 + $0x20] sm:$0x1] }
 0x16c   :  { %v265_v3 = vld [vmem:[#allocation2 + $0x38] sm:$0x1]  ;;  %v329_v4 = vadd.f32 %v313_v61, %v262_v1 }
 0x16d   :  { %v347_v5 = vmul.f32 0.70710677, %v331_v63  ;;  %v263_v6 = vld [vmem:[#allocation2 + $0x28] sm:$0x1]  ;;  %v332_v7 = vadd.f32 %v316_v62, %v265_v3  ;;  %v339_v36 = vmul.f32 0.5, %v331_v63 }
 0x16e   :  { %v330_v8 = vadd.f32 %v314_v2, %v263_v6  ;;  %v345_v9 = vmul.f32 0.70710677, %v329_v4  ;;  %v337_v42 = vmul.f32 0.5, %v329_v4 }
 0x16f   :  { %3437 = verf.f32 %v347_v5  ;;  %v348_v10 = vmul.f32 0.70710677, %v332_v7  ;;  %v340_v46 = vmul.f32 0.5, %v332_v7 }
 0x170   :  { %v346_v11 = vmul.f32 0.70710677, %v330_v8  ;;  %3439 = verf.f32 %v345_v9  ;;  %v338_v45 = vmul.f32 0.5, %v330_v8 }
 0x171   :  { %v3430_v12 = vpop.eup %3429  ;;  %3441 = verf.f32 %v348_v10 }
 0x172   :  { %v3432_v14 = vpop.eup %3431  ;;  %v359_v16 = vadd.f32 1.0, %v3430_v12  ;;  %3443 = verf.f32 %v346_v11 }
 0x173   :  { %v3434_v17 = vpop.eup %3433  ;;  %v357_v20 = vadd.f32 1.0, %v3432_v14 }
 0x174   :  { %v3436_v21 = vpop.eup %3435  ;;  %v360_v24 = vadd.f32 1.0, %v3434_v17  ;;  %v367_v25 = vmul.f32 %v359_v16, %v335_v15  ;;  %v382_v16 = vld [vmem:[#allocation2 + $0x1] sm:$0x1]  ;;  %v384_v17 = vld [vmem:[#allocation2 + $0x11] sm:$0x1] }
 0x175   :  { %v358_v27 = vadd.f32 1.0, %v3436_v21  ;;  %v365_v28 = vmul.f32 %v357_v20, %v333_v19  ;;  %v385_v19 = vld [vmem:[#allocation2 + $0x19] sm:$0x1] }
 0x176   :  { %v368_v29 = vmul.f32 %v360_v24, %v336_v23  ;;  %376 = vst.msk [vmem:[#allocation3 + $0x10] sm:$0x1] %vm373_vm3, %v367_v25  ;;  %v392_v31 = vpack.c.bf16 %v367_v25, %v367_v25 }
 0x177   :  { %v366_v30 = vmul.f32 %v358_v27, %v334_v26  ;;  %374 = vst.msk [vmem:[#allocation3] sm:$0x1] %vm373_vm3, %v365_v28  ;;  %v390_v33 = vpack.c.bf16 %v365_v28, %v365_v28  ;;  %v383_v27 = vld [vmem:[#allocation2 + $0x9] sm:$0x1] }
 0x178   :  { %377 = vst.msk [vmem:[#allocation3 + $0x18] sm:$0x1] %vm373_vm3, %v368_v29  ;;  %v393_v38 = vpack.c.bf16 %v368_v29, %v368_v29  ;;  %v408_v41 = vunpack.c.l.b16 %v392_v31 }
 0x179   :  { %v3438_v32 = vpop.eup %3437  ;;  %375 = vst.msk [vmem:[#allocation3 + $0x8] sm:$0x1] %vm373_vm3, %v366_v30  ;;  %v391_v34 = vpack.c.bf16 %v366_v30, %v366_v30  ;;  %v406_v49 = vunpack.c.l.b16 %v390_v33 }
 0x17a   :  { %v3440_v35 = vpop.eup %3439  ;;  %v363_v37 = vadd.f32 1.0, %v3438_v32  ;;  %v409_v55 = vunpack.c.l.b16 %v393_v38  ;;  %v417_v59 = vrot.slane %v408_v41, 6  ;;  %v386_v32 = vld [vmem:[#allocation2 + $0x21] sm:$0x1]  ;;  %v387_v38 = vld [vmem:[#allocation2 + $0x29] sm:$0x1] }
 0x17b   :  { %v3442_v39 = vpop.eup %3441  ;;  %v407_v40 = vunpack.c.l.b16 %v391_v34  ;;  %v361_v43 = vadd.f32 1.0, %v3440_v35 }
 0x17c   :  { %v3444_v44 = vpop.eup %3443  ;;  %v364_v47 = vadd.f32 1.0, %v3442_v39  ;;  %v371_v48 = vmul.f32 %v363_v37, %v339_v36  ;;  %v420_v2 = vrot.slane %v409_v55, 5 }
 0x17d   :  { %v414_v50 = vrot.slane %v407_v40, 7  ;;  %v362_v51 = vadd.f32 1.0, %v3444_v44  ;;  %v369_v52 = vmul.f32 %v361_v43, %v337_v42  ;;  %v388_v40 = vld [vmem:[#allocation2 + $0x31] sm:$0x1]  ;;  %v389_v42 = vld [vmem:[#allocation2 + $0x39] sm:$0x1] }
 0x17e   :  { %v372_v53 = vmul.f32 %v364_v47, %v340_v46  ;;  %380 = vst.msk [vmem:[#allocation3 + $0x30] sm:$0x1] %vm373_vm3, %v371_v48  ;;  %v396_v54 = vpack.c.bf16 %v371_v48, %v371_v48 }
 0x17f   :  { %v370_v56 = vmul.f32 %v362_v51, %v338_v45  ;;  %378 = vst.msk [vmem:[#allocation3 + $0x20] sm:$0x1] %vm373_vm3, %v369_v52  ;;  %v394_v57 = vpack.c.bf16 %v369_v52, %v369_v52  ;;  %v416_v58 = vsel %vm415_vm4, %v414_v50, %v406_v49 }
 0x180   :  { %381 = vst.msk [vmem:[#allocation3 + $0x38] sm:$0x1] %vm373_vm3, %v372_v53  ;;  %v397_v60 = vpack.c.bf16 %v372_v53, %v372_v53  ;;  %v419_v63 = vsel %vm418_vm5, %v417_v59, %v416_v58  ;;  %v412_v1 = vunpack.c.l.b16 %v396_v54 }
 0x181   :  { %379 = vst.msk [vmem:[#allocation3 + $0x28] sm:$0x1] %vm373_vm3, %v370_v56  ;;  %v395_v61 = vpack.c.bf16 %v370_v56, %v370_v56  ;;  %v410_v62 = vunpack.c.l.b16 %v394_v57  ;;  %v422_v6 = vsel %vm421_vm6, %v420_v2, %v419_v63 }
 0x182   :  { %v413_v4 = vunpack.c.l.b16 %v397_v60  ;;  %v429_v9 = vrot.slane %v412_v1, 2 }
 0x183   :  { %v411_v3 = vunpack.c.l.b16 %v395_v61  ;;  %v423_v5 = vrot.slane %v410_v62, 4 }
 0x184   :  { %v432_v11 = vrot.slane %v413_v4, 1 }
 0x185   :  { %v425_v7 = vsel %vm424_vm7, %v423_v5, %v422_v6  ;;  %v426_v8 = vrot.slane %v411_v3, 3 }
 0x187   :  { %v428_v10 = vsel %vm427_vm8, %v426_v8, %v425_v7 }
 0x188   :  { %v431_v12 = vsel %vm430_vm9, %v429_v9, %v428_v10 }
 0x189   :  { %v434_v14 = vsel %vm433_vm10, %v432_v11, %v431_v12 }
 0x18a   :  { %v435_v15 = vpack.c.b16 %v434_v14, %v434_v14 }
 0x18c   :  { %3261 = vmatmul.mubr.msk.bf16.vlgmr.msra.gmra.mrb[4].mxu1 %vm249_vm2, %v435_v15 }
 0x18d   :  { %3273 = vmatpush3.bf16.msra.mxu1 %v4097_v13  ;;  %3276 = vmatprep.mubr.msk.bf16.mxu1 %vm3899_vm0, %v3898_v0 }
 0x18e   :  { %3274 = vmatprep.subr.bf16.mxu1 %v3898_v0 }
 0x191   :  { %3275 = vmatpush3.bf16.msra.mxu1 %v4104_v18 }
 0x192   :  { %3288 = vmatprep.subr.bf16.mxu1 %v3898_v0 }
 0x25f   :  { %v473_v20 = vpop.f32.mrb[4].mxu1 }
 0x260   :  { %v480_v21 = vrot.slane %v473_v20, 1  ;;  %v481_v23 = vrot.slane %v473_v20, 2  ;;  %v482_v24 = vrot.slane %v473_v20, 3  ;;  %v483_v25 = vrot.slane %v473_v20, 4  ;;  %v3262_v26 = vpop.f32.mrb[5].mxu1 }
 0x261   :  { %v484_v28 = vrot.slane %v473_v20, 5  ;;  %v485_v29 = vrot.slane %v473_v20, 6  ;;  %v495_v30 = vadd.f32 %v473_v20, %v382_v16  ;;  %v476_v31 = vpop.f32.mrb[6].mxu1  ;;  %v486_v33 = vrot.slane %v473_v20, 7 }
 0x262   :  { %v496_v34 = vadd.f32 %v480_v21, %v383_v27  ;;  %v497_v35 = vadd.f32 %v481_v23, %v384_v17  ;;  %v498_v36 = vadd.f32 %v482_v24, %v385_v19  ;;  %v3263_v37 = vpop.f32.mrb[7].mxu1  ;;  %v499_v39 = vadd.f32 %v483_v25, %v386_v32 }
 0x263   :  { %v500_v41 = vadd.f32 %v484_v28, %v387_v38  ;;  %v501_v43 = vadd.f32 %v485_v29, %v388_v40  ;;  %v511_v44 = vmul.f32 0.70710677, %v495_v30  ;;  %v502_v45 = vadd.f32 %v486_v33, %v389_v42 }
 0x264   :  { %v512_v46 = vmul.f32 0.70710677, %v496_v34  ;;  %v513_v47 = vmul.f32 0.70710677, %v497_v35  ;;  %v514_v48 = vmul.f32 0.70710677, %v498_v36 }
 0x265   :  { %v515_v49 = vmul.f32 0.70710677, %v499_v39  ;;  %3445 = verf.f32 %v511_v44  ;;  %v516_v50 = vmul.f32 0.70710677, %v500_v41  ;;  %v517_v51 = vmul.f32 0.70710677, %v501_v43 }
 0x266   :  { %3447 = verf.f32 %v512_v46  ;;  %v518_v52 = vmul.f32 0.70710677, %v502_v45  ;;  %v503_v55 = vmul.f32 0.5, %v495_v30  ;;  %v504_v58 = vmul.f32 0.5, %v496_v34 }
 0x267   :  { %3449 = verf.f32 %v513_v47  ;;  %v505_v61 = vmul.f32 0.5, %v497_v35  ;;  %v506_v2 = vmul.f32 0.5, %v498_v36  ;;  %v507_v3 = vmul.f32 0.5, %v499_v39 }
 0x268   :  { %3451 = verf.f32 %v514_v48  ;;  %v508_v7 = vmul.f32 0.5, %v500_v41  ;;  %v509_v12 = vmul.f32 0.5, %v501_v43  ;;  %v510_v19 = vmul.f32 0.5, %v502_v45 }
 0x269   :  { %3453 = verf.f32 %v515_v49 }
 0x26a   :  { %3455 = verf.f32 %v516_v50 }
 0x26b   :  { %3457 = verf.f32 %v517_v51 }
 0x26c   :  { %3459 = verf.f32 %v518_v52 }
 0x26f   :  { %v3446_v53 = vpop.eup %3445 }
 0x270   :  { %v3448_v54 = vpop.eup %3447  ;;  %v527_v56 = vadd.f32 1.0, %v3446_v53 }
 0x271   :  { %v3450_v57 = vpop.eup %3449  ;;  %v528_v59 = vadd.f32 1.0, %v3448_v54 }
 0x272   :  { %v3452_v60 = vpop.eup %3451  ;;  %v529_v62 = vadd.f32 1.0, %v3450_v57  ;;  %v535_v63 = vmul.f32 %v527_v56, %v503_v55  ;;  %v551_v56 = vld [vmem:[#allocation2 + $0x2] sm:$0x1]  ;;  %v552_v57 = vld [vmem:[#allocation2 + $0xa] sm:$0x1] }
 0x273   :  { %v3454_v1 = vpop.eup %3453  ;;  %v530_v4 = vadd.f32 1.0, %v3452_v60  ;;  %v536_v5 = vmul.f32 %v528_v59, %v504_v58  ;;  %v553_v58 = vld [vmem:[#allocation2 + $0x12] sm:$0x1] }
 0x274   :  { %v3456_v6 = vpop.eup %3455  ;;  %v531_v8 = vadd.f32 1.0, %v3454_v1  ;;  %v537_v9 = vmul.f32 %v529_v62, %v505_v61  ;;  %543 = vst.msk [vmem:[#allocation3 + $0x1] sm:$0x1] %vm373_vm3, %v535_v63  ;;  %v559_v10 = vpack.c.bf16 %v535_v63, %v535_v63 }
 0x275   :  { %v3458_v11 = vpop.eup %3457  ;;  %v532_v14 = vadd.f32 1.0, %v3456_v6  ;;  %v538_v15 = vmul.f32 %v530_v4, %v506_v2  ;;  %544 = vst.msk [vmem:[#allocation3 + $0x9] sm:$0x1] %vm373_vm3, %v536_v5  ;;  %v560_v16 = vpack.c.bf16 %v536_v5, %v536_v5  ;;  %v554_v2 = vld [vmem:[#allocation2 + $0x1a] sm:$0x1] }
 0x276   :  { %v3460_v17 = vpop.eup %3459  ;;  %v533_v20 = vadd.f32 1.0, %v3458_v11  ;;  %v539_v21 = vmul.f32 %v531_v8, %v507_v3  ;;  %545 = vst.msk [vmem:[#allocation3 + $0x11] sm:$0x1] %vm373_vm3, %v537_v9  ;;  %v561_v23 = vpack.c.bf16 %v537_v9, %v537_v9  ;;  %v575_v30 = vunpack.c.l.b16 %v559_v10 }
 0x277   :  { %v534_v24 = vadd.f32 1.0, %v3460_v17  ;;  %v540_v25 = vmul.f32 %v532_v14, %v508_v7  ;;  %546 = vst.msk [vmem:[#allocation3 + $0x19] sm:$0x1] %vm373_vm3, %v538_v15  ;;  %v562_v26 = vpack.c.bf16 %v538_v15, %v538_v15  ;;  %v576_v27 = vunpack.c.l.b16 %v560_v16  ;;  %v555_v7 = vld [vmem:[#allocation2 + $0x22] sm:$0x1] }
 0x278   :  { %v541_v28 = vmul.f32 %v533_v20, %v509_v12  ;;  %547 = vst.msk [vmem:[#allocation3 + $0x21] sm:$0x1] %vm373_vm3, %v539_v21  ;;  %v563_v29 = vpack.c.bf16 %v539_v21, %v539_v21  ;;  %v577_v31 = vunpack.c.l.b16 %v561_v23  ;;  %v556_v14 = vld [vmem:[#allocation2 + $0x2a] sm:$0x1]  ;;  %v557_v16 = vld [vmem:[#allocation2 + $0x32] sm:$0x1] }
 0x279   :  { %548 = vst.msk [vmem:[#allocation3 + $0x29] sm:$0x1] %vm373_vm3, %v540_v25  ;;  %v578_v32 = vunpack.c.l.b16 %v562_v26  ;;  %v583_v33 = vrot.slane %v576_v27, 7  ;;  %v542_v34 = vmul.f32 %v534_v24, %v510_v19  ;;  %v564_v35 = vpack.c.bf16 %v540_v25, %v540_v25  ;;  %v558_v19 = vld [vmem:[#allocation2 + $0x3a] sm:$0x1] }
 0x27a   :  { %549 = vst.msk [vmem:[#allocation3 + $0x31] sm:$0x1] %vm373_vm3, %v541_v28  ;;  %v579_v36 = vunpack.c.l.b16 %v563_v29  ;;  %v585_v37 = vrot.slane %v577_v31, 6  ;;  %v565_v38 = vpack.c.bf16 %v541_v28, %v541_v28 }
 0x27b   :  { %v584_v39 = vsel %vm415_vm4, %v583_v33, %v575_v30  ;;  %v587_v40 = vrot.slane %v578_v32, 5  ;;  %550 = vst.msk [vmem:[#allocation3 + $0x39] sm:$0x1] %vm373_vm3, %v542_v34  ;;  %v566_v41 = vpack.c.bf16 %v542_v34, %v542_v34  ;;  %v580_v42 = vunpack.c.l.b16 %v564_v35 }
 0x27c   :  { %v589_v43 = vrot.slane %v579_v36, 4  ;;  %v581_v44 = vunpack.c.l.b16 %v565_v38  ;;  %v586_v45 = vsel %vm418_vm5, %v585_v37, %v584_v39 }
 0x27d   :  { %v582_v46 = vunpack.c.l.b16 %v566_v41  ;;  %v588_v47 = vsel %vm421_vm6, %v587_v40, %v586_v45  ;;  %v591_v48 = vrot.slane %v580_v42, 3 }
 0x27e   :  { %v590_v49 = vsel %vm424_vm7, %v589_v43, %v588_v47  ;;  %v593_v50 = vrot.slane %v581_v44, 2 }
 0x27f   :  { %v592_v51 = vsel %vm427_vm8, %v591_v48, %v590_v49  ;;  %v595_v52 = vrot.slane %v582_v46, 1 }
 0x280   :  { %v594_v53 = vsel %vm430_vm9, %v593_v50, %v592_v51 }
 0x281   :  { %v596_v54 = vsel %vm433_vm10, %v595_v52, %v594_v53 }
 0x282   :  { %v597_v55 = vpack.c.b16 %v596_v54, %v596_v54 }
 0x284   :  { %3269 = vmatmul.mubr.msk.bf16.vlgmr.msra.gmra.mrb[8].mxu0 %vm249_vm2, %v597_v55 }
 0x285   :  { %3281 = vmatpush3.bf16.msra.mxu0 %v4097_v13  ;;  %3284 = vmatprep.mubr.msk.bf16.mxu0 %vm3899_vm0, %v3898_v0 }
 0x286   :  { %3282 = vmatprep.subr.bf16.mxu0 %v3898_v0 }
 0x289   :  { %3283 = vmatpush3.bf16.msra.mxu0 %v4104_v18 }
 0x28a   :  { %3296 = vmatprep.subr.bf16.mxu0 %v3898_v0 }
 0x357   :  { %v635_v59 = vpop.f32.mrb[8].mxu0 }
 0x358   :  { %v642_v60 = vrot.slane %v635_v59, 1  ;;  %v643_v61 = vrot.slane %v635_v59, 2  ;;  %v644_v62 = vrot.slane %v635_v59, 3  ;;  %v645_v63 = vrot.slane %v635_v59, 4  ;;  %v3270_v1 = vpop.f32.mrb[9].mxu0 }
 0x359   :  { %v646_v3 = vrot.slane %v635_v59, 5  ;;  %v647_v4 = vrot.slane %v635_v59, 6  ;;  %v657_v5 = vadd.f32 %v635_v59, %v551_v56  ;;  %v638_v6 = vpop.f32.mrb[10].mxu0  ;;  %v648_v8 = vrot.slane %v635_v59, 7 }
 0x35a   :  { %v658_v9 = vadd.f32 %v642_v60, %v552_v57  ;;  %v659_v10 = vadd.f32 %v643_v61, %v553_v58  ;;  %v660_v11 = vadd.f32 %v644_v62, %v554_v2  ;;  %v3271_v12 = vpop.f32.mrb[11].mxu0  ;;  %v661_v15 = vadd.f32 %v645_v63, %v555_v7 }
 0x35b   :  { %v662_v17 = vadd.f32 %v646_v3, %v556_v14  ;;  %v663_v20 = vadd.f32 %v647_v4, %v557_v16  ;;  %v673_v21 = vmul.f32 0.70710677, %v657_v5  ;;  %v664_v24 = vadd.f32 %v648_v8, %v558_v19 }
 0x35c   :  { %v674_v23 = vmul.f32 0.70710677, %v658_v9  ;;  %v675_v25 = vmul.f32 0.70710677, %v659_v10  ;;  %v676_v26 = vmul.f32 0.70710677, %v660_v11 }
 0x35d   :  { %v677_v27 = vmul.f32 0.70710677, %v661_v15  ;;  %3461 = verf.f32 %v673_v21  ;;  %v678_v28 = vmul.f32 0.70710677, %v662_v17  ;;  %v679_v29 = vmul.f32 0.70710677, %v663_v20 }
 0x35e   :  { %3463 = verf.f32 %v674_v23  ;;  %v680_v30 = vmul.f32 0.70710677, %v664_v24  ;;  %v665_v33 = vmul.f32 0.5, %v657_v5  ;;  %v666_v36 = vmul.f32 0.5, %v658_v9 }
 0x35f   :  { %3465 = verf.f32 %v675_v25  ;;  %v667_v39 = vmul.f32 0.5, %v659_v10  ;;  %v668_v43 = vmul.f32 0.5, %v660_v11  ;;  %v669_v44 = vmul.f32 0.5, %v661_v15 }
 0x360   :  { %3467 = verf.f32 %v676_v26  ;;  %v670_v48 = vmul.f32 0.5, %v662_v17  ;;  %v671_v53 = vmul.f32 0.5, %v663_v20  ;;  %v672_v60 = vmul.f32 0.5, %v664_v24 }
 0x361   :  { %3469 = verf.f32 %v677_v27 }
 0x362   :  { %3471 = verf.f32 %v678_v28 }
 0x363   :  { %3473 = verf.f32 %v679_v29 }
 0x364   :  { %3475 = verf.f32 %v680_v30 }
 0x367   :  { %v3462_v31 = vpop.eup %3461 }
 0x368   :  { %v3464_v32 = vpop.eup %3463  ;;  %v689_v34 = vadd.f32 1.0, %v3462_v31 }
 0x369   :  { %v3466_v35 = vpop.eup %3465  ;;  %v690_v37 = vadd.f32 1.0, %v3464_v32 }
 0x36a   :  { %v3468_v38 = vpop.eup %3467  ;;  %v691_v40 = vadd.f32 1.0, %v3466_v35  ;;  %v697_v41 = vmul.f32 %v689_v34, %v665_v33  ;;  %v713_v34 = vld [vmem:[#allocation2 + $0x3] sm:$0x1]  ;;  %v714_v35 = vld [vmem:[#allocation2 + $0xb] sm:$0x1] }
 0x36b   :  { %v3470_v42 = vpop.eup %3469  ;;  %v692_v45 = vadd.f32 1.0, %v3468_v38  ;;  %v698_v46 = vmul.f32 %v690_v37, %v666_v36  ;;  %v715_v36 = vld [vmem:[#allocation2 + $0x13] sm:$0x1] }
 0x36c   :  { %v3472_v47 = vpop.eup %3471  ;;  %v693_v49 = vadd.f32 1.0, %v3470_v42  ;;  %v699_v50 = vmul.f32 %v691_v40, %v667_v39  ;;  %705 = vst.msk [vmem:[#allocation3 + $0x2] sm:$0x1] %vm373_vm3, %v697_v41  ;;  %v721_v51 = vpack.c.bf16 %v697_v41, %v697_v41 }
 0x36d   :  { %v3474_v52 = vpop.eup %3473  ;;  %v700_v54 = vmul.f32 %v692_v45, %v668_v43  ;;  %706 = vst.msk [vmem:[#allocation3 + $0xa] sm:$0x1] %vm373_vm3, %v698_v46  ;;  %v722_v55 = vpack.c.bf16 %v698_v46, %v698_v46  ;;  %v694_v56 = vadd.f32 1.0, %v3472_v47  ;;  %v716_v43 = vld [vmem:[#allocation2 + $0x1b] sm:$0x1] }
 0x36e   :  { %v3476_v57 = vpop.eup %3475  ;;  %v701_v58 = vmul.f32 %v693_v49, %v669_v44  ;;  %707 = vst.msk [vmem:[#allocation3 + $0x12] sm:$0x1] %vm373_vm3, %v699_v50  ;;  %v723_v59 = vpack.c.bf16 %v699_v50, %v699_v50  ;;  %v695_v61 = vadd.f32 1.0, %v3474_v52  ;;  %v737_v3 = vunpack.c.l.b16 %v721_v51 }
 0x36f   :  { %708 = vst.msk [vmem:[#allocation3 + $0x1a] sm:$0x1] %vm373_vm3, %v700_v54  ;;  %v738_v62 = vunpack.c.l.b16 %v722_v55  ;;  %v696_v63 = vadd.f32 1.0, %v3476_v57  ;;  %v702_v1 = vmul.f32 %v694_v56, %v670_v48  ;;  %v724_v2 = vpack.c.bf16 %v700_v54, %v700_v54  ;;  %v717_v48 = vld [vmem:[#allocation2 + $0x23] sm:$0x1] }
 0x370   :  { %709 = vst.msk [vmem:[#allocation3 + $0x22] sm:$0x1] %vm373_vm3, %v701_v58  ;;  %v739_v4 = vunpack.c.l.b16 %v723_v59  ;;  %v703_v5 = vmul.f32 %v695_v61, %v671_v53  ;;  %v725_v6 = vpack.c.bf16 %v701_v58, %v701_v58  ;;  %v718_v54 = vld [vmem:[#allocation2 + $0x2b] sm:$0x1]  ;;  %v719_v56 = vld [vmem:[#allocation2 + $0x33] sm:$0x1] }
 0x371   :  { %v745_v7 = vrot.slane %v738_v62, 7  ;;  %v704_v8 = vmul.f32 %v696_v63, %v672_v60  ;;  %710 = vst.msk [vmem:[#allocation3 + $0x2a] sm:$0x1] %vm373_vm3, %v702_v1  ;;  %v726_v9 = vpack.c.bf16 %v702_v1, %v702_v1  ;;  %v740_v10 = vunpack.c.l.b16 %v724_v2  ;;  %v720_v58 = vld [vmem:[#allocation2 + $0x3b] sm:$0x1] }
 0x372   :  { %711 = vst.msk [vmem:[#allocation3 + $0x32] sm:$0x1] %vm373_vm3, %v703_v5  ;;  %v727_v11 = vpack.c.bf16 %v703_v5, %v703_v5  ;;  %v741_v12 = vunpack.c.l.b16 %v725_v6  ;;  %v747_v14 = vrot.slane %v739_v4, 6 }
 0x373   :  { %712 = vst.msk [vmem:[#allocation3 + $0x3a] sm:$0x1] %vm373_vm3, %v704_v8  ;;  %v728_v15 = vpack.c.bf16 %v704_v8, %v704_v8  ;;  %v742_v16 = vunpack.c.l.b16 %v726_v9  ;;  %v746_v17 = vsel %vm415_vm4, %v745_v7, %v737_v3  ;;  %v749_v19 = vrot.slane %v740_v10, 5 }
 0x374   :  { %v743_v20 = vunpack.c.l.b16 %v727_v11  ;;  %v748_v21 = vsel %vm418_vm5, %v747_v14, %v746_v17  ;;  %v751_v23 = vrot.slane %v741_v12, 4 }
 0x375   :  { %v744_v24 = vunpack.c.l.b16 %v728_v15  ;;  %v750_v25 = vsel %vm421_vm6, %v749_v19, %v748_v21  ;;  %v753_v26 = vrot.slane %v742_v16, 3 }
 0x376   :  { %v752_v27 = vsel %vm424_vm7, %v751_v23, %v750_v25  ;;  %v755_v28 = vrot.slane %v743_v20, 2 }
 0x377   :  { %v754_v29 = vsel %vm427_vm8, %v753_v26, %v752_v27  ;;  %v757_v30 = vrot.slane %v744_v24, 1 }
 0x378   :  { %v756_v31 = vsel %vm430_vm9, %v755_v28, %v754_v29 }
 0x379   :  { %v758_v32 = vsel %vm433_vm10, %v757_v30, %v756_v31 }
 0x37a   :  { %v759_v33 = vpack.c.b16 %v758_v32, %v758_v32 }
 0x37c   :  { %3277 = vmatmul.mubr.msk.bf16.vlgmr.msra.gmra.mrb[8].mxu1 %vm249_vm2, %v759_v33 }
 0x37d   :  { %3289 = vmatpush3.bf16.msra.mxu1 %v4097_v13  ;;  %3292 = vmatprep.mubr.msk.bf16.mxu1 %vm3899_vm0, %v3898_v0 }
 0x37e   :  { %3290 = vmatprep.subr.bf16.mxu1 %v3898_v0 }
 0x381   :  { %3291 = vmatpush3.bf16.msra.mxu1 %v4104_v18 }
 0x382   :  { %3304 = vmatprep.subr.bf16.mxu1 %v3898_v0 }
 0x44f   :  { %v797_v37 = vpop.f32.mrb[8].mxu1 }
 0x450   :  { %v804_v38 = vrot.slane %v797_v37, 1  ;;  %v805_v39 = vrot.slane %v797_v37, 2  ;;  %v806_v40 = vrot.slane %v797_v37, 3  ;;  %v807_v41 = vrot.slane %v797_v37, 4  ;;  %v3278_v42 = vpop.f32.mrb[9].mxu1 }
 0x451   :  { %v808_v44 = vrot.slane %v797_v37, 5  ;;  %v809_v45 = vrot.slane %v797_v37, 6  ;;  %v819_v46 = vadd.f32 %v797_v37, %v713_v34  ;;  %v800_v47 = vpop.f32.mrb[10].mxu1  ;;  %v810_v49 = vrot.slane %v797_v37, 7 }
 0x452   :  { %v820_v50 = vadd.f32 %v804_v38, %v714_v35  ;;  %v821_v51 = vadd.f32 %v805_v39, %v715_v36  ;;  %v822_v52 = vadd.f32 %v806_v40, %v716_v43  ;;  %v3279_v53 = vpop.f32.mrb[11].mxu1  ;;  %v823_v55 = vadd.f32 %v807_v41, %v717_v48 }
 0x453   :  { %v824_v57 = vadd.f32 %v808_v44, %v718_v54  ;;  %v825_v59 = vadd.f32 %v809_v45, %v719_v56  ;;  %v835_v60 = vmul.f32 0.70710677, %v819_v46  ;;  %v826_v62 = vadd.f32 %v810_v49, %v720_v58 }
 0x454   :  { %v836_v61 = vmul.f32 0.70710677, %v820_v50  ;;  %v837_v63 = vmul.f32 0.70710677, %v821_v51  ;;  %v838_v1 = vmul.f32 0.70710677, %v822_v52 }
 0x455   :  { %v839_v2 = vmul.f32 0.70710677, %v823_v55  ;;  %3477 = verf.f32 %v835_v60  ;;  %v840_v3 = vmul.f32 0.70710677, %v824_v57  ;;  %v841_v4 = vmul.f32 0.70710677, %v825_v59 }
 0x456   :  { %3479 = verf.f32 %v836_v61  ;;  %v842_v5 = vmul.f32 0.70710677, %v826_v62  ;;  %v827_v8 = vmul.f32 0.5, %v819_v46  ;;  %v828_v11 = vmul.f32 0.5, %v820_v50 }
 0x457   :  { %3481 = verf.f32 %v837_v63  ;;  %v829_v15 = vmul.f32 0.5, %v821_v51  ;;  %v830_v20 = vmul.f32 0.5, %v822_v52  ;;  %v831_v21 = vmul.f32 0.5, %v823_v55 }
 0x458   :  { %3483 = verf.f32 %v838_v1  ;;  %v832_v26 = vmul.f32 0.5, %v824_v57  ;;  %v833_v31 = vmul.f32 0.5, %v825_v59  ;;  %v834_v38 = vmul.f32 0.5, %v826_v62 }
 0x459   :  { %3485 = verf.f32 %v839_v2 }
 0x45a   :  { %3487 = verf.f32 %v840_v3 }
 0x45b   :  { %3489 = verf.f32 %v841_v4 }
 0x45c   :  { %3491 = verf.f32 %v842_v5 }
 0x45f   :  { %v3478_v6 = vpop.eup %3477 }
 0x460   :  { %v3480_v7 = vpop.eup %3479  ;;  %v851_v9 = vadd.f32 1.0, %v3478_v6 }
 0x461   :  { %v3482_v10 = vpop.eup %3481  ;;  %v852_v12 = vadd.f32 1.0, %v3480_v7 }
 0x462   :  { %v3484_v14 = vpop.eup %3483  ;;  %v853_v16 = vadd.f32 1.0, %v3482_v10  ;;  %v859_v17 = vmul.f32 %v851_v9, %v827_v8  ;;  %v875_v9 = vld [vmem:[#allocation2 + $0x4] sm:$0x1]  ;;  %v876_v10 = vld [vmem:[#allocation2 + $0xc] sm:$0x1] }
 0x463   :  { %v3486_v19 = vpop.eup %3485  ;;  %v854_v23 = vadd.f32 1.0, %v3484_v14  ;;  %v860_v24 = vmul.f32 %v852_v12, %v828_v11  ;;  %v877_v11 = vld [vmem:[#allocation2 + $0x14] sm:$0x1] }
 0x464   :  { %v3488_v25 = vpop.eup %3487  ;;  %v855_v27 = vadd.f32 1.0, %v3486_v19  ;;  %v861_v28 = vmul.f32 %v853_v16, %v829_v15  ;;  %867 = vst.msk [vmem:[#allocation3 + $0x3] sm:$0x1] %vm373_vm3, %v859_v17  ;;  %v883_v29 = vpack.c.bf16 %v859_v17, %v859_v17 }
 0x465   :  { %v3490_v30 = vpop.eup %3489  ;;  %v862_v32 = vmul.f32 %v854_v23, %v830_v20  ;;  %868 = vst.msk [vmem:[#allocation3 + $0xb] sm:$0x1] %vm373_vm3, %v860_v24  ;;  %v884_v33 = vpack.c.bf16 %v860_v24, %v860_v24  ;;  %v856_v34 = vadd.f32 1.0, %v3488_v25  ;;  %v878_v20 = vld [vmem:[#allocation2 + $0x1c] sm:$0x1] }
 0x466   :  { %v3492_v35 = vpop.eup %3491  ;;  %v863_v36 = vmul.f32 %v855_v27, %v831_v21  ;;  %869 = vst.msk [vmem:[#allocation3 + $0x13] sm:$0x1] %vm373_vm3, %v861_v28  ;;  %v885_v37 = vpack.c.bf16 %v861_v28, %v861_v28  ;;  %v857_v39 = vadd.f32 1.0, %v3490_v30  ;;  %v899_v44 = vunpack.c.l.b16 %v883_v29 }
 0x467   :  { %870 = vst.msk [vmem:[#allocation3 + $0x1b] sm:$0x1] %vm373_vm3, %v862_v32  ;;  %v900_v40 = vunpack.c.l.b16 %v884_v33  ;;  %v858_v41 = vadd.f32 1.0, %v3492_v35  ;;  %v864_v42 = vmul.f32 %v856_v34, %v832_v26  ;;  %v886_v43 = vpack.c.bf16 %v862_v32, %v862_v32  ;;  %v879_v26 = vld [vmem:[#allocation2 + $0x24] sm:$0x1] }
 0x468   :  { %871 = vst.msk [vmem:[#allocation3 + $0x23] sm:$0x1] %vm373_vm3, %v863_v36  ;;  %v901_v45 = vunpack.c.l.b16 %v885_v37  ;;  %v865_v46 = vmul.f32 %v857_v39, %v833_v31  ;;  %v887_v47 = vpack.c.bf16 %v863_v36, %v863_v36  ;;  %v880_v32 = vld [vmem:[#allocation2 + $0x2c] sm:$0x1]  ;;  %v881_v34 = vld [vmem:[#allocation2 + $0x34] sm:$0x1] }
 0x469   :  { %v907_v48 = vrot.slane %v900_v40, 7  ;;  %v866_v49 = vmul.f32 %v858_v41, %v834_v38  ;;  %872 = vst.msk [vmem:[#allocation3 + $0x2b] sm:$0x1] %vm373_vm3, %v864_v42  ;;  %v888_v50 = vpack.c.bf16 %v864_v42, %v864_v42  ;;  %v902_v51 = vunpack.c.l.b16 %v886_v43  ;;  %v882_v36 = vld [vmem:[#allocation2 + $0x3c] sm:$0x1] }
 0x46a   :  { %873 = vst.msk [vmem:[#allocation3 + $0x33] sm:$0x1] %vm373_vm3, %v865_v46  ;;  %v889_v52 = vpack.c.bf16 %v865_v46, %v865_v46  ;;  %v903_v53 = vunpack.c.l.b16 %v887_v47  ;;  %v909_v54 = vrot.slane %v901_v45, 6 }
 0x46b   :  { %874 = vst.msk [vmem:[#allocation3 + $0x3b] sm:$0x1] %vm373_vm3, %v866_v49  ;;  %v890_v55 = vpack.c.bf16 %v866_v49, %v866_v49  ;;  %v904_v56 = vunpack.c.l.b16 %v888_v50  ;;  %v908_v57 = vsel %vm415_vm4, %v907_v48, %v899_v44  ;;  %v911_v58 = vrot.slane %v902_v51, 5 }
 0x46c   :  { %v905_v59 = vunpack.c.l.b16 %v889_v52  ;;  %v910_v60 = vsel %vm418_vm5, %v909_v54, %v908_v57  ;;  %v913_v61 = vrot.slane %v903_v53, 4 }
 0x46d   :  { %v906_v62 = vunpack.c.l.b16 %v890_v55  ;;  %v912_v63 = vsel %vm421_vm6, %v911_v58, %v910_v60  ;;  %v915_v1 = vrot.slane %v904_v56, 3 }
 0x46e   :  { %v914_v2 = vsel %vm424_vm7, %v913_v61, %v912_v63  ;;  %v917_v3 = vrot.slane %v905_v59, 2 }
 0x46f   :  { %v916_v4 = vsel %vm427_vm8, %v915_v1, %v914_v2  ;;  %v919_v5 = vrot.slane %v906_v62, 1 }
 0x470   :  { %v918_v6 = vsel %vm430_vm9, %v917_v3, %v916_v4 }
 0x471   :  { %v920_v7 = vsel %vm433_vm10, %v919_v5, %v918_v6 }
 0x472   :  { %v921_v8 = vpack.c.b16 %v920_v7, %v920_v7 }
 0x474   :  { %3285 = vmatmul.mubr.msk.bf16.vlgmr.msra.gmra.mrb[12].mxu0 %vm249_vm2, %v921_v8 }
 0x475   :  { %3297 = vmatpush3.bf16.msra.mxu0 %v4097_v13  ;;  %3300 = vmatprep.mubr.msk.bf16.mxu0 %vm3899_vm0, %v3898_v0 }
 0x476   :  { %3298 = vmatprep.subr.bf16.mxu0 %v3898_v0 }
 0x479   :  { %3299 = vmatpush3.bf16.msra.mxu0 %v4104_v18 }
 0x547   :  { %v959_v12 = vpop.f32.mrb[12].mxu0 }
 0x548   :  { %v966_v14 = vrot.slane %v959_v12, 1  ;;  %v967_v15 = vrot.slane %v959_v12, 2  ;;  %v968_v16 = vrot.slane %v959_v12, 3  ;;  %v969_v17 = vrot.slane %v959_v12, 4  ;;  %v3286_v19 = vpop.f32.mrb[13].mxu0 }
 0x549   :  { %v970_v21 = vrot.slane %v959_v12, 5  ;;  %v971_v23 = vrot.slane %v959_v12, 6  ;;  %v981_v24 = vadd.f32 %v959_v12, %v875_v9  ;;  %v962_v25 = vpop.f32.mrb[14].mxu0  ;;  %v972_v27 = vrot.slane %v959_v12, 7 }
 0x54a   :  { %v982_v28 = vadd.f32 %v966_v14, %v876_v10  ;;  %v983_v29 = vadd.f32 %v967_v15, %v877_v11  ;;  %v984_v30 = vadd.f32 %v968_v16, %v878_v20  ;;  %v3287_v31 = vpop.f32.mrb[15].mxu0  ;;  %v985_v33 = vadd.f32 %v969_v17, %v879_v26 }
 0x54b   :  { %v986_v35 = vadd.f32 %v970_v21, %v880_v32  ;;  %v987_v37 = vadd.f32 %v971_v23, %v881_v34  ;;  %v997_v38 = vmul.f32 0.70710677, %v981_v24  ;;  %v988_v40 = vadd.f32 %v972_v27, %v882_v36 }
 0x54c   :  { %v998_v39 = vmul.f32 0.70710677, %v982_v28  ;;  %v999_v41 = vmul.f32 0.70710677, %v983_v29  ;;  %v1000_v42 = vmul.f32 0.70710677, %v984_v30 }
 0x54d   :  { %v1001_v43 = vmul.f32 0.70710677, %v985_v33  ;;  %3493 = verf.f32 %v997_v38  ;;  %v1002_v44 = vmul.f32 0.70710677, %v986_v35  ;;  %v1003_v45 = vmul.f32 0.70710677, %v987_v37 }
 0x54e   :  { %3495 = verf.f32 %v998_v39  ;;  %v1004_v46 = vmul.f32 0.70710677, %v988_v40  ;;  %v989_v49 = vmul.f32 0.5, %v981_v24  ;;  %v990_v52 = vmul.f32 0.5, %v982_v28 }
 0x54f   :  { %3497 = verf.f32 %v999_v41  ;;  %v991_v55 = vmul.f32 0.5, %v983_v29  ;;  %v992_v59 = vmul.f32 0.5, %v984_v30  ;;  %v993_v60 = vmul.f32 0.5, %v985_v33 }
 0x550   :  { %3499 = verf.f32 %v1000_v42  ;;  %v994_v1 = vmul.f32 0.5, %v986_v35  ;;  %v995_v6 = vmul.f32 0.5, %v987_v37  ;;  %v996_v14 = vmul.f32 0.5, %v988_v40 }
 0x551   :  { %3501 = verf.f32 %v1001_v43 }
 0x552   :  { %3503 = verf.f32 %v1002_v44 }
 0x553   :  { %3505 = verf.f32 %v1003_v45 }
 0x554   :  { %3507 = verf.f32 %v1004_v46 }
 0x557   :  { %v3494_v47 = vpop.eup %3493 }
 0x558   :  { %v3496_v48 = vpop.eup %3495  ;;  %v1013_v50 = vadd.f32 1.0, %v3494_v47 }
 0x559   :  { %v3498_v51 = vpop.eup %3497  ;;  %v1014_v53 = vadd.f32 1.0, %v3496_v48 }
 0x55a   :  { %v3500_v54 = vpop.eup %3499  ;;  %v1015_v56 = vadd.f32 1.0, %v3498_v51  ;;  %v1021_v57 = vmul.f32 %v1013_v50, %v989_v49  ;;  %v1037_v50 = vld [vmem:[#allocation2 + $0x5] sm:$0x1]  ;;  %v1038_v51 = vld [vmem:[#allocation2 + $0xd] sm:$0x1] }
 0x55b   :  { %v3502_v58 = vpop.eup %3501  ;;  %v1016_v61 = vadd.f32 1.0, %v3500_v54  ;;  %v1022_v62 = vmul.f32 %v1014_v53, %v990_v52  ;;  %v1039_v52 = vld [vmem:[#allocation2 + $0x15] sm:$0x1] }
 0x55c   :  { %v3504_v63 = vpop.eup %3503  ;;  %v1017_v2 = vadd.f32 1.0, %v3502_v58  ;;  %v1023_v3 = vmul.f32 %v1015_v56, %v991_v55  ;;  %1029 = vst.msk [vmem:[#allocation3 + $0x4] sm:$0x1] %vm373_vm3, %v1021_v57  ;;  %v1045_v4 = vpack.c.bf16 %v1021_v57, %v1021_v57 }
 0x55d   :  { %v3506_v5 = vpop.eup %3505  ;;  %v1024_v7 = vmul.f32 %v1016_v61, %v992_v59  ;;  %1030 = vst.msk [vmem:[#allocation3 + $0xc] sm:$0x1] %vm373_vm3, %v1022_v62  ;;  %v1046_v8 = vpack.c.bf16 %v1022_v62, %v1022_v62  ;;  %v1018_v9 = vadd.f32 1.0, %v3504_v63  ;;  %v1040_v59 = vld [vmem:[#allocation2 + $0x1d] sm:$0x1] }
 0x55e   :  { %v3508_v10 = vpop.eup %3507  ;;  %v1025_v11 = vmul.f32 %v1017_v2, %v993_v60  ;;  %1031 = vst.msk [vmem:[#allocation3 + $0x14] sm:$0x1] %vm373_vm3, %v1023_v3  ;;  %v1047_v12 = vpack.c.bf16 %v1023_v3, %v1023_v3  ;;  %v1019_v15 = vadd.f32 1.0, %v3506_v5  ;;  %v1061_v21 = vunpack.c.l.b16 %v1045_v4  ;;  %v1041_v63 = vld [vmem:[#allocation2 + $0x25] sm:$0x1] }
 0x55f   :  { %1032 = vst.msk [vmem:[#allocation3 + $0x1c] sm:$0x1] %vm373_vm3, %v1024_v7  ;;  %v1062_v16 = vunpack.c.l.b16 %v1046_v8  ;;  %v1020_v17 = vadd.f32 1.0, %v3508_v10  ;;  %v1026_v19 = vmul.f32 %v1018_v9, %v994_v1  ;;  %v1048_v20 = vpack.c.bf16 %v1024_v7, %v1024_v7  ;;  %v1042_v5 = vld [vmem:[#allocation2 + $0x2d] sm:$0x1] }
 0x560   :  { %1033 = vst.msk [vmem:[#allocation3 + $0x24] sm:$0x1] %vm373_vm3, %v1025_v11  ;;  %v1063_v23 = vunpack.c.l.b16 %v1047_v12  ;;  %v1027_v24 = vmul.f32 %v1019_v15, %v995_v6  ;;  %v1049_v25 = vpack.c.bf16 %v1025_v11, %v1025_v11  ;;  %v1043_v7 = vld [vmem:[#allocation2 + $0x35] sm:$0x1]  ;;  %v1044_v9 = vld [vmem:[#allocation2 + $0x3d] sm:$0x1] }
 0x561   :  { %v1069_v26 = vrot.slane %v1062_v16, 7  ;;  %v1028_v27 = vmul.f32 %v1020_v17, %v996_v14  ;;  %1034 = vst.msk [vmem:[#allocation3 + $0x2c] sm:$0x1] %vm373_vm3, %v1026_v19  ;;  %v1050_v28 = vpack.c.bf16 %v1026_v19, %v1026_v19  ;;  %v1064_v29 = vunpack.c.l.b16 %v1048_v20 }
 0x562   :  { %1035 = vst.msk [vmem:[#allocation3 + $0x34] sm:$0x1] %vm373_vm3, %v1027_v24  ;;  %v1051_v30 = vpack.c.bf16 %v1027_v24, %v1027_v24  ;;  %v1065_v31 = vunpack.c.l.b16 %v1049_v25  ;;  %v1071_v32 = vrot.slane %v1063_v23, 6 }
 0x563   :  { %1036 = vst.msk [vmem:[#allocation3 + $0x3c] sm:$0x1] %vm373_vm3, %v1028_v27  ;;  %v1052_v33 = vpack.c.bf16 %v1028_v27, %v1028_v27  ;;  %v1066_v34 = vunpack.c.l.b16 %v1050_v28  ;;  %v1070_v35 = vsel %vm415_vm4, %v1069_v26, %v1061_v21  ;;  %v1073_v36 = vrot.slane %v1064_v29, 5 }
 0x564   :  { %v1067_v37 = vunpack.c.l.b16 %v1051_v30  ;;  %v1072_v38 = vsel %vm418_vm5, %v1071_v32, %v1070_v35  ;;  %v1075_v39 = vrot.slane %v1065_v31, 4 }
 0x565   :  { %v1068_v40 = vunpack.c.l.b16 %v1052_v33  ;;  %v1074_v41 = vsel %vm421_vm6, %v1073_v36, %v1072_v38  ;;  %v1077_v42 = vrot.slane %v1066_v34, 3 }
 0x566   :  { %v1076_v43 = vsel %vm424_vm7, %v1075_v39, %v1074_v41  ;;  %v1079_v44 = vrot.slane %v1067_v37, 2 }
 0x567   :  { %v1078_v45 = vsel %vm427_vm8, %v1077_v42, %v1076_v43  ;;  %v1081_v46 = vrot.slane %v1068_v40, 1 }
 0x568   :  { %v1080_v47 = vsel %vm430_vm9, %v1079_v44, %v1078_v45 }
 0x569   :  { %v1082_v48 = vsel %vm433_vm10, %v1081_v46, %v1080_v47 }
 0x56a   :  { %v1083_v49 = vpack.c.b16 %v1082_v48, %v1082_v48 }
 0x56c   :  { %3293 = vmatmul.mubr.msk.bf16.vlgmr.msra.gmra.mrb[12].mxu1 %vm249_vm2, %v1083_v49 }
 0x56d   :  { %3305 = vmatpush3.bf16.msra.mxu1 %v4097_v13  ;;  %3308 = vmatprep.mubr.msk.bf16.mxu1 %vm3899_vm0, %v3898_v0 }
 0x56e   :  { %3306 = vmatprep.subr.bf16.mxu1 %v3898_v0 }
 0x571   :  { %3307 = vmatpush3.bf16.msra.mxu1 %v4104_v18 }
 0x63f   :  { %v1121_v53 = vpop.f32.mrb[12].mxu1 }
 0x640   :  { %v1128_v54 = vrot.slane %v1121_v53, 1  ;;  %v1129_v55 = vrot.slane %v1121_v53, 2  ;;  %v1130_v56 = vrot.slane %v1121_v53, 3  ;;  %v1131_v57 = vrot.slane %v1121_v53, 4  ;;  %v3294_v58 = vpop.f32.mrb[13].mxu1 }
 0x641   :  { %v1132_v60 = vrot.slane %v1121_v53, 5  ;;  %v1133_v61 = vrot.slane %v1121_v53, 6  ;;  %v1143_v13 = vadd.f32 %v1121_v53, %v1037_v50  ;;  %v1124_v62 = vpop.f32.mrb[14].mxu1  ;;  %v1134_v1 = vrot.slane %v1121_v53, 7 }
 0x642   :  { %v1144_v2 = vadd.f32 %v1128_v54, %v1038_v51  ;;  %v1145_v3 = vadd.f32 %v1129_v55, %v1039_v52  ;;  %v1146_v4 = vadd.f32 %v1130_v56, %v1040_v59  ;;  %v3295_v18 = vpop.f32.mrb[15].mxu1  ;;  %v1147_v6 = vadd.f32 %v1131_v57, %v1041_v63 }
 0x643   :  { %v1148_v8 = vadd.f32 %v1132_v60, %v1042_v5  ;;  %v1149_v10 = vadd.f32 %v1133_v61, %v1043_v7  ;;  %v1159_v11 = vmul.f32 0.70710677, %v1143_v13  ;;  %v1150_v14 = vadd.f32 %v1134_v1, %v1044_v9 }
 0x644   :  { %v1160_v12 = vmul.f32 0.70710677, %v1144_v2  ;;  %v1161_v15 = vmul.f32 0.70710677, %v1145_v3  ;;  %v1162_v16 = vmul.f32 0.70710677, %v1146_v4 }
 0x645   :  { %v1163_v17 = vmul.f32 0.70710677, %v1147_v6  ;;  %3509 = verf.f32 %v1159_v11  ;;  %v1164_v19 = vmul.f32 0.70710677, %v1148_v8  ;;  %v1165_v20 = vmul.f32 0.70710677, %v1149_v10 }
 0x646   :  { %3511 = verf.f32 %v1160_v12  ;;  %v1166_v21 = vmul.f32 0.70710677, %v1150_v14  ;;  %v1151_v25 = vmul.f32 0.5, %v1143_v13  ;;  %v1152_v28 = vmul.f32 0.5, %v1144_v2 }
 0x647   :  { %3513 = verf.f32 %v1161_v15  ;;  %v1153_v31 = vmul.f32 0.5, %v1145_v3  ;;  %v1154_v35 = vmul.f32 0.5, %v1146_v4  ;;  %v1155_v36 = vmul.f32 0.5, %v1147_v6 }
 0x648   :  { %3515 = verf.f32 %v1162_v16  ;;  %v1156_v40 = vmul.f32 0.5, %v1148_v8  ;;  %v1157_v45 = vmul.f32 0.5, %v1149_v10  ;;  %v1158_v52 = vmul.f32 0.5, %v1150_v14 }
 0x649   :  { %3517 = verf.f32 %v1163_v17 }
 0x64a   :  { %3519 = verf.f32 %v1164_v19 }
 0x64b   :  { %3521 = verf.f32 %v1165_v20 }
 0x64c   :  { %3523 = verf.f32 %v1166_v21 }
 0x64f   :  { %v3510_v23 = vpop.eup %3509 }
 0x650   :  { %v3512_v24 = vpop.eup %3511  ;;  %v1175_v26 = vadd.f32 1.0, %v3510_v23 }
 0x651   :  { %v3514_v27 = vpop.eup %3513  ;;  %v1176_v29 = vadd.f32 1.0, %v3512_v24  ;;  %v1199_v24 = vld [vmem:[#allocation2 + $0x6] sm:$0x1] }
 0x652   :  { %v3516_v30 = vpop.eup %3515  ;;  %v1177_v32 = vadd.f32 1.0, %v3514_v27  ;;  %v1183_v33 = vmul.f32 %v1175_v26, %v1151_v25  ;;  %v1200_v25 = vld [vmem:[#allocation2 + $0xe] sm:$0x1]  ;;  %v1201_v26 = vld [vmem:[#allocation2 + $0x16] sm:$0x1] }
 0x653   :  { %v3518_v34 = vpop.eup %3517  ;;  %v1178_v37 = vadd.f32 1.0, %v3516_v30  ;;  %v1184_v38 = vmul.f32 %v1176_v29, %v1152_v28 }
 0x654   :  { %v3520_v39 = vpop.eup %3519  ;;  %v1179_v41 = vadd.f32 1.0, %v3518_v34  ;;  %v1185_v42 = vmul.f32 %v1177_v32, %v1153_v31  ;;  %1191 = vst.msk [vmem:[#allocation3 + $0x5] sm:$0x1] %vm373_vm3, %v1183_v33  ;;  %v1207_v43 = vpack.c.bf16 %v1183_v33, %v1183_v33  ;;  %v1202_v33 = vld [vmem:[#allocation2 + $0x1e] sm:$0x1] }
 0x655   :  { %v3522_v44 = vpop.eup %3521  ;;  %v1186_v46 = vmul.f32 %v1178_v37, %v1154_v35  ;;  %1192 = vst.msk [vmem:[#allocation3 + $0xd] sm:$0x1] %vm373_vm3, %v1184_v38  ;;  %v1208_v47 = vpack.c.bf16 %v1184_v38, %v1184_v38  ;;  %v1180_v48 = vadd.f32 1.0, %v3520_v39  ;;  %v1203_v38 = vld [vmem:[#allocation2 + $0x26] sm:$0x1] }
 0x656   :  { %v3524_v49 = vpop.eup %3523  ;;  %v1187_v50 = vmul.f32 %v1179_v41, %v1155_v36  ;;  %1193 = vst.msk [vmem:[#allocation3 + $0x15] sm:$0x1] %vm373_vm3, %v1185_v42  ;;  %v1209_v51 = vpack.c.bf16 %v1185_v42, %v1185_v42  ;;  %v1181_v53 = vadd.f32 1.0, %v3522_v44  ;;  %v1223_v58 = vunpack.c.l.b16 %v1207_v43  ;;  %v1204_v44 = vld [vmem:[#allocation2 + $0x2e] sm:$0x1] }
 0x657   :  { %1194 = vst.msk [vmem:[#allocation3 + $0x1d] sm:$0x1] %vm373_vm3, %v1186_v46  ;;  %v1224_v54 = vunpack.c.l.b16 %v1208_v47  ;;  %v1182_v55 = vadd.f32 1.0, %v3524_v49  ;;  %v1188_v56 = vmul.f32 %v1180_v48, %v1156_v40  ;;  %v1210_v57 = vpack.c.bf16 %v1186_v46, %v1186_v46  ;;  %v1205_v46 = vld [vmem:[#allocation2 + $0x36] sm:$0x1] }
 0x658   :  { %1195 = vst.msk [vmem:[#allocation3 + $0x25] sm:$0x1] %vm373_vm3, %v1187_v50  ;;  %v1225_v59 = vunpack.c.l.b16 %v1209_v51  ;;  %v1189_v60 = vmul.f32 %v1181_v53, %v1157_v45  ;;  %v1211_v61 = vpack.c.bf16 %v1187_v50, %v1187_v50  ;;  %v1206_v48 = vld [vmem:[#allocation2 + $0x3e] sm:$0x1] }
 0x659   :  { %v1231_v13 = vrot.slane %v1224_v54, 7  ;;  %v1190_v62 = vmul.f32 %v1182_v55, %v1158_v52  ;;  %1196 = vst.msk [vmem:[#allocation3 + $0x2d] sm:$0x1] %vm373_vm3, %v1188_v56  ;;  %v1212_v63 = vpack.c.bf16 %v1188_v56, %v1188_v56  ;;  %v1226_v1 = vunpack.c.l.b16 %v1210_v57 }
 0x65a   :  { %1197 = vst.msk [vmem:[#allocation3 + $0x35] sm:$0x1] %vm373_vm3, %v1189_v60  ;;  %v1213_v2 = vpack.c.bf16 %v1189_v60, %v1189_v60  ;;  %v1227_v3 = vunpack.c.l.b16 %v1211_v61  ;;  %v1233_v4 = vrot.slane %v1225_v59, 6 }
 0x65b   :  { %1198 = vst.msk [vmem:[#allocation3 + $0x3d] sm:$0x1] %vm373_vm3, %v1190_v62  ;;  %v1214_v18 = vpack.c.bf16 %v1190_v62, %v1190_v62  ;;  %v1228_v5 = vunpack.c.l.b16 %v1212_v63  ;;  %v1232_v6 = vsel %vm415_vm4, %v1231_v13, %v1223_v58  ;;  %v1235_v7 = vrot.slane %v1226_v1, 5 }
 0x65c   :  { %v1229_v8 = vunpack.c.l.b16 %v1213_v2  ;;  %v1234_v9 = vsel %vm418_vm5, %v1233_v4, %v1232_v6  ;;  %v1237_v10 = vrot.slane %v1227_v3, 4 }
 0x65d   :  { %v1230_v11 = vunpack.c.l.b16 %v1214_v18  ;;  %v1236_v12 = vsel %vm421_vm6, %v1235_v7, %v1234_v9  ;;  %v1239_v14 = vrot.slane %v1228_v5, 3 }
 0x65e   :  { %v1238_v15 = vsel %vm424_vm7, %v1237_v10, %v1236_v12  ;;  %v1241_v16 = vrot.slane %v1229_v8, 2 }
 0x65f   :  { %v1240_v17 = vsel %vm427_vm8, %v1239_v14, %v1238_v15  ;;  %v1243_v19 = vrot.slane %v1230_v11, 1 }
 0x660   :  { %v1242_v20 = vsel %vm430_vm9, %v1241_v16, %v1240_v17 }
 0x661   :  { %v1244_v21 = vsel %vm433_vm10, %v1243_v19, %v1242_v20 }
 0x662   :  { %v1245_v23 = vpack.c.b16 %v1244_v21, %v1244_v21 }
 0x664   :  { %3301 = vmatmul.mubr.msk.bf16.vlgmr.msra.gmra.mrb[16].mxu0 %vm249_vm2, %v1245_v23 }
 0x737   :  { %v1283_v27 = vpop.f32.mrb[16].mxu0 }
 0x738   :  { %v1290_v28 = vrot.slane %v1283_v27, 1  ;;  %v1291_v29 = vrot.slane %v1283_v27, 2  ;;  %v1292_v30 = vrot.slane %v1283_v27, 3  ;;  %v1293_v31 = vrot.slane %v1283_v27, 4  ;;  %v3302_v32 = vpop.f32.mrb[17].mxu0 }
 0x739   :  { %v1294_v34 = vrot.slane %v1283_v27, 5  ;;  %v1295_v35 = vrot.slane %v1283_v27, 6  ;;  %v1305_v36 = vadd.f32 %v1283_v27, %v1199_v24  ;;  %v1286_v37 = vpop.f32.mrb[18].mxu0  ;;  %v1296_v39 = vrot.slane %v1283_v27, 7 }
 0x73a   :  { %v1306_v40 = vadd.f32 %v1290_v28, %v1200_v25  ;;  %v1307_v41 = vadd.f32 %v1291_v29, %v1201_v26  ;;  %v1308_v42 = vadd.f32 %v1292_v30, %v1202_v33  ;;  %v3303_v43 = vpop.f32.mrb[19].mxu0  ;;  %v1309_v45 = vadd.f32 %v1293_v31, %v1203_v38 }
 0x73b   :  { %v1310_v47 = vadd.f32 %v1294_v34, %v1204_v44  ;;  %v1311_v49 = vadd.f32 %v1295_v35, %v1205_v46  ;;  %v1321_v50 = vmul.f32 0.70710677, %v1305_v36  ;;  %v1312_v52 = vadd.f32 %v1296_v39, %v1206_v48 }
 0x73c   :  { %v1322_v51 = vmul.f32 0.70710677, %v1306_v40  ;;  %v1323_v53 = vmul.f32 0.70710677, %v1307_v41  ;;  %v1324_v54 = vmul.f32 0.70710677, %v1308_v42 }
 0x73d   :  { %v1325_v55 = vmul.f32 0.70710677, %v1309_v45  ;;  %3525 = verf.f32 %v1321_v50  ;;  %v1326_v56 = vmul.f32 0.70710677, %v1310_v47  ;;  %v1327_v57 = vmul.f32 0.70710677, %v1311_v49 }
 0x73e   :  { %3527 = verf.f32 %v1322_v51  ;;  %v1328_v58 = vmul.f32 0.70710677, %v1312_v52  ;;  %v1313_v61 = vmul.f32 0.5, %v1305_v36  ;;  %v1314_v63 = vmul.f32 0.5, %v1306_v40 }
 0x73f   :  { %3529 = verf.f32 %v1323_v53  ;;  %v1315_v3 = vmul.f32 0.5, %v1307_v41  ;;  %v1316_v6 = vmul.f32 0.5, %v1308_v42  ;;  %v1317_v7 = vmul.f32 0.5, %v1309_v45 }
 0x740   :  { %3531 = verf.f32 %v1324_v54  ;;  %v1318_v11 = vmul.f32 0.5, %v1310_v47  ;;  %v1319_v17 = vmul.f32 0.5, %v1311_v49  ;;  %v1320_v26 = vmul.f32 0.5, %v1312_v52 }
 0x741   :  { %3533 = verf.f32 %v1325_v55 }
 0x742   :  { %3535 = verf.f32 %v1326_v56 }
 0x743   :  { %3537 = verf.f32 %v1327_v57 }
 0x744   :  { %3539 = verf.f32 %v1328_v58 }
 0x747   :  { %v3526_v59 = vpop.eup %3525 }
 0x748   :  { %v3528_v60 = vpop.eup %3527  ;;  %v1337_v13 = vadd.f32 1.0, %v3526_v59 }
 0x749   :  { %v3530_v62 = vpop.eup %3529  ;;  %v1338_v1 = vadd.f32 1.0, %v3528_v60  ;;  %v151_v60 = vld [vmem:[#allocation9] sm:$0xff] }
 0x74a   :  { %v3532_v2 = vpop.eup %3531  ;;  %v1339_v4 = vadd.f32 1.0, %v3530_v62  ;;  %v1345_v18 = vmul.f32 %v1337_v13, %v1313_v61  ;;  %v152_v61 = vld [vmem:[#allocation9 + $0x8] sm:$0xff]  ;;  %v153_v13 = vld [vmem:[#allocation9 + $0x10] sm:$0xff] }
 0x74b   :  { %v3534_v5 = vpop.eup %3533  ;;  %v1340_v8 = vadd.f32 1.0, %v3532_v2  ;;  %v1346_v9 = vmul.f32 %v1338_v1, %v1314_v63  ;;  %v155_v62 = vpack.c.bf16 %v152_v61, %v151_v60  ;;  %v154_v63 = vld [vmem:[#allocation9 + $0x18] sm:$0xff]  ;;  %v1361_v2 = vld [vmem:[#allocation2 + $0x7] sm:$0x1] }
 0x74c   :  { %v3536_v10 = vpop.eup %3535  ;;  %v1341_v12 = vadd.f32 1.0, %v3534_v5  ;;  %v1347_v14 = vmul.f32 %v1339_v4, %v1315_v3  ;;  %1353 = vst.msk [vmem:[#allocation3 + $0x6] sm:$0x1] %vm373_vm3, %v1345_v18  ;;  %v1369_v15 = vpack.c.bf16 %v1345_v18, %v1345_v18  ;;  %v156_v1 = vpack.c.bf16 %v154_v63, %v153_v13  ;;  %v1362_v3 = vld [vmem:[#allocation2 + $0xf] sm:$0x1] }
 0x74d   :  { %v3538_v16 = vpop.eup %3537  ;;  %v1348_v19 = vmul.f32 %v1340_v8, %v1316_v6  ;;  %1354 = vst.msk [vmem:[#allocation3 + $0xe] sm:$0x1] %vm373_vm3, %v1346_v9  ;;  %v1370_v20 = vpack.c.bf16 %v1346_v9, %v1346_v9  ;;  %v1342_v21 = vadd.f32 1.0, %v3536_v10  ;;  %3312 = vmatprep.subr.bf16.mxu0 %v155_v62  ;;  %v1363_v4 = vld [vmem:[#allocation2 + $0x17] sm:$0x1] }
 0x74e   :  { %v3540_v23 = vpop.eup %3539  ;;  %v1349_v24 = vmul.f32 %v1341_v12, %v1317_v7  ;;  %1355 = vst.msk [vmem:[#allocation3 + $0x16] sm:$0x1] %vm373_vm3, %v1347_v14  ;;  %v1371_v25 = vpack.c.bf16 %v1347_v14, %v1347_v14  ;;  %v1343_v27 = vadd.f32 1.0, %v3538_v16  ;;  %v1385_v32 = vunpack.c.l.b16 %v1369_v15  ;;  %3313 = vmatpush3.bf16.msra.mxu0 %v155_v62  ;;  %v1364_v10 = vld [vmem:[#allocation2 + $0x1f] sm:$0x1] }
 0x74f   :  { %1356 = vst.msk [vmem:[#allocation3 + $0x1e] sm:$0x1] %vm373_vm3, %v1348_v19  ;;  %v1386_v28 = vunpack.c.l.b16 %v1370_v20  ;;  %v1344_v29 = vadd.f32 1.0, %v3540_v23  ;;  %v1350_v30 = vmul.f32 %v1342_v21, %v1318_v11  ;;  %v1372_v31 = vpack.c.bf16 %v1348_v19, %v1348_v19  ;;  %3314 = vmatprep.subr.bf16.mxu0 %v156_v1  ;;  %v1365_v16 = vld [vmem:[#allocation2 + $0x27] sm:$0x1] }
 0x750   :  { %1357 = vst.msk [vmem:[#allocation3 + $0x26] sm:$0x1] %vm373_vm3, %v1349_v24  ;;  %v1387_v33 = vunpack.c.l.b16 %v1371_v25  ;;  %v1351_v34 = vmul.f32 %v1343_v27, %v1319_v17  ;;  %v1373_v35 = vpack.c.bf16 %v1349_v24, %v1349_v24  ;;  %v1366_v24 = vld [vmem:[#allocation2 + $0x2f] sm:$0x1] }
 0x751   :  { %v1393_v36 = vrot.slane %v1386_v28, 7  ;;  %v1352_v37 = vmul.f32 %v1344_v29, %v1320_v26  ;;  %1358 = vst.msk [vmem:[#allocation3 + $0x2e] sm:$0x1] %vm373_vm3, %v1350_v30  ;;  %v1374_v38 = vpack.c.bf16 %v1350_v30, %v1350_v30  ;;  %v1388_v39 = vunpack.c.l.b16 %v1372_v31  ;;  %v1367_v26 = vld [vmem:[#allocation2 + $0x37] sm:$0x1] }
 0x752   :  { %1359 = vst.msk [vmem:[#allocation3 + $0x36] sm:$0x1] %vm373_vm3, %v1351_v34  ;;  %v1375_v40 = vpack.c.bf16 %v1351_v34, %v1351_v34  ;;  %v1389_v41 = vunpack.c.l.b16 %v1373_v35  ;;  %v1395_v42 = vrot.slane %v1387_v33, 6  ;;  %3315 = vmatpush3.bf16.msra.mxu0 %v156_v1  ;;  %v1368_v28 = vld [vmem:[#allocation2 + $0x3f] sm:$0x1] }
 0x753   :  { %1360 = vst.msk [vmem:[#allocation3 + $0x3e] sm:$0x1] %vm373_vm3, %v1352_v37  ;;  %v1376_v43 = vpack.c.bf16 %v1352_v37, %v1352_v37  ;;  %v1390_v44 = vunpack.c.l.b16 %v1374_v38  ;;  %v1394_v45 = vsel %vm415_vm4, %v1393_v36, %v1385_v32  ;;  %v1397_v46 = vrot.slane %v1388_v39, 5  ;;  %3336 = vmatprep.subr.bf16.mxu0 %v3898_v0 }
 0x754   :  { %v1391_v47 = vunpack.c.l.b16 %v1375_v40  ;;  %v1396_v48 = vsel %vm418_vm5, %v1395_v42, %v1394_v45  ;;  %v1399_v49 = vrot.slane %v1389_v41, 4 }
 0x755   :  { %v1392_v50 = vunpack.c.l.b16 %v1376_v43  ;;  %v1398_v51 = vsel %vm421_vm6, %v1397_v46, %v1396_v48  ;;  %v1401_v52 = vrot.slane %v1390_v44, 3 }
 0x756   :  { %v1400_v53 = vsel %vm424_vm7, %v1399_v49, %v1398_v51  ;;  %v1403_v54 = vrot.slane %v1391_v47, 2 }
 0x757   :  { %v1402_v55 = vsel %vm427_vm8, %v1401_v52, %v1400_v53  ;;  %v1405_v56 = vrot.slane %v1392_v50, 1 }
 0x758   :  { %v1404_v57 = vsel %vm430_vm9, %v1403_v54, %v1402_v55 }
 0x759   :  { %v1406_v58 = vsel %vm433_vm10, %v1405_v56, %v1404_v57 }
 0x75a   :  { %v1407_v59 = vpack.c.b16 %v1406_v58, %v1406_v58 }
 0x75c   :  { %3309 = vmatmul.mubr.msk.bf16.vlgmr.msra.gmra.mrb[16].mxu1 %vm249_vm2, %v1407_v59 }
 0x82f   :  { %v1445_v18 = vpop.f32.mrb[16].mxu1 }
 0x830   :  { %v1452_v5 = vrot.slane %v1445_v18, 1  ;;  %v1453_v6 = vrot.slane %v1445_v18, 2  ;;  %v1454_v7 = vrot.slane %v1445_v18, 3  ;;  %v1455_v8 = vrot.slane %v1445_v18, 4  ;;  %v3310_v9 = vpop.f32.mrb[17].mxu1 }
 0x831   :  { %v1456_v11 = vrot.slane %v1445_v18, 5  ;;  %v1457_v12 = vrot.slane %v1445_v18, 6  ;;  %v1467_v14 = vadd.f32 %v1445_v18, %v1361_v2  ;;  %v1448_v15 = vpop.f32.mrb[18].mxu1  ;;  %v1458_v17 = vrot.slane %v1445_v18, 7 }
 0x832   :  { %v1468_v19 = vadd.f32 %v1452_v5, %v1362_v3  ;;  %v1469_v20 = vadd.f32 %v1453_v6, %v1363_v4  ;;  %v1470_v21 = vadd.f32 %v1454_v7, %v1364_v10  ;;  %v3311_v23 = vpop.f32.mrb[19].mxu1  ;;  %v1471_v25 = vadd.f32 %v1455_v8, %v1365_v16 }
 0x833   :  { %v1472_v27 = vadd.f32 %v1456_v11, %v1366_v24  ;;  %v1473_v29 = vadd.f32 %v1457_v12, %v1367_v26  ;;  %v1483_v30 = vmul.f32 0.70710677, %v1467_v14  ;;  %v1474_v31 = vadd.f32 %v1458_v17, %v1368_v28  ;;  %v1677_v24 = vld [vmem:[%s4475_s6 + $0x10] sm:$0xff]  ;;  %v1660_v28 = vld [vmem:[#allocation10 + $0x8] sm:$0xff] }
 0x834   :  { %v1484_v32 = vmul.f32 0.70710677, %v1468_v19  ;;  %v1485_v33 = vmul.f32 0.70710677, %v1469_v20  ;;  %v1486_v34 = vmul.f32 0.70710677, %v1470_v21 }
 0x835   :  { %v1487_v35 = vmul.f32 0.70710677, %v1471_v25  ;;  %3541 = verf.f32 %v1483_v30  ;;  %v1488_v36 = vmul.f32 0.70710677, %v1472_v27  ;;  %v1489_v37 = vmul.f32 0.70710677, %v1473_v29 }
 0x836   :  { %3543 = verf.f32 %v1484_v32  ;;  %v1490_v38 = vmul.f32 0.70710677, %v1474_v31  ;;  %v1475_v41 = vmul.f32 0.5, %v1467_v14  ;;  %v1476_v44 = vmul.f32 0.5, %v1468_v19  ;;  %v1659_v26 = vld [vmem:[#allocation10] sm:$0xff]  ;;  %v1662_v30 = vld [vmem:[#allocation10 + $0x18] sm:$0xff] }
 0x837   :  { %3545 = verf.f32 %v1485_v33  ;;  %v1477_v47 = vmul.f32 0.5, %v1469_v20  ;;  %v1478_v51 = vmul.f32 0.5, %v1470_v21  ;;  %v1479_v55 = vmul.f32 0.5, %v1471_v25  ;;  %v1675_v20 = vld [vmem:[%s4475_s6] sm:$0xff]  ;;  %v1676_v21 = vld [vmem:[%s4475_s6 + $0x8] sm:$0xff]  ;;  %v1678_v25 = vld [vmem:[%s4475_s6 + $0x18] sm:$0xff] }
 0x838   :  { %3547 = verf.f32 %v1486_v34  ;;  %v1480_v59 = vmul.f32 0.5, %v1472_v27  ;;  %v1481_v62 = vmul.f32 0.5, %v1473_v29  ;;  %v1482_v2 = vmul.f32 0.5, %v1474_v31  ;;  %v1661_v29 = vld [vmem:[#allocation10 + $0x10] sm:$0xff] }
 0x839   :  { %3549 = verf.f32 %v1487_v35  ;;  %v1679_v23 = vpack.c.bf16 %v1676_v21, %v1675_v20  ;;  %v1680_v27 = vpack.c.bf16 %v1678_v25, %v1677_v24  ;;  %v4304_v31 = vpack.c.bf16 %v1660_v28, %v1659_v26  ;;  %v3146_v33 = vld [vmem:[%s4474_s5] ss:$0 sm:$0xff] }
 0x83a   :  { %3551 = verf.f32 %v1488_v36  ;;  %v4307_v32 = vpack.c.bf16 %v1662_v30, %v1661_v29 }
 0x83b   :  { %3553 = verf.f32 %v1489_v37  ;;  %3324 = vmatprep.subr.bf16.mxu1 %v1679_v23 }
 0x83c   :  { %3555 = verf.f32 %v1490_v38  ;;  %3325 = vmatpush3.bf16.msra.mxu1 %v1679_v23 }
 0x83d   :  { %3326 = vmatprep.subr.bf16.mxu1 %v1680_v27 }
 0x83f   :  { %v3542_v39 = vpop.eup %3541 }
 0x840   :  { %v3544_v40 = vpop.eup %3543  ;;  %v1499_v42 = vadd.f32 1.0, %v3542_v39  ;;  %3327 = vmatpush3.bf16.msra.mxu1 %v1680_v27 }
 0x841   :  { %v3546_v43 = vpop.eup %3545  ;;  %v1500_v45 = vadd.f32 1.0, %v3544_v40  ;;  %3344 = vmatprep.subr.bf16.mxu1 %v3898_v0 }
 0x842   :  { %v3548_v46 = vpop.eup %3547  ;;  %v1501_v48 = vadd.f32 1.0, %v3546_v43  ;;  %v1507_v49 = vmul.f32 %v1499_v42, %v1475_v41 }
 0x843   :  { %v3550_v50 = vpop.eup %3549  ;;  %v1502_v52 = vadd.f32 1.0, %v3548_v46  ;;  %v1508_v53 = vmul.f32 %v1500_v45, %v1476_v44 }
 0x844   :  { %v3552_v54 = vpop.eup %3551  ;;  %v1503_v56 = vadd.f32 1.0, %v3550_v50  ;;  %v1509_v57 = vmul.f32 %v1501_v48, %v1477_v47  ;;  %1515 = vst.msk [vmem:[#allocation3 + $0x7] sm:$0x1] %vm373_vm3, %v1507_v49 }
 0x845   :  { %v3554_v58 = vpop.eup %3553  ;;  %v1504_v60 = vadd.f32 1.0, %v3552_v54  ;;  %v1510_v61 = vmul.f32 %v1502_v52, %v1478_v51  ;;  %1516 = vst.msk [vmem:[#allocation3 + $0xf] sm:$0x1] %vm373_vm3, %v1508_v53 }
 0x846   :  { %v3556_v13 = vpop.eup %3555  ;;  %v1505_v63 = vadd.f32 1.0, %v3554_v58  ;;  %v1511_v1 = vmul.f32 %v1503_v56, %v1479_v55  ;;  %1517 = vst.msk [vmem:[#allocation3 + $0x17] sm:$0x1] %vm373_vm3, %v1509_v57 }
 0x847   :  { %v1506_v3 = vadd.f32 1.0, %v3556_v13  ;;  %v1512_v4 = vmul.f32 %v1504_v60, %v1480_v59  ;;  %1518 = vst.msk [vmem:[#allocation3 + $0x1f] sm:$0x1] %vm373_vm3, %v1510_v61 }
 0x848   :  { %v1513_v18 = vmul.f32 %v1505_v63, %v1481_v62  ;;  %1519 = vst.msk [vmem:[#allocation3 + $0x27] sm:$0x1] %vm373_vm3, %v1511_v1 }
 0x849   :  { %v1514_v5 = vmul.f32 %v1506_v3, %v1482_v2  ;;  %1520 = vst.msk [vmem:[#allocation3 + $0x2f] sm:$0x1] %vm373_vm3, %v1512_v4 }
 0x84a   :  { %1521 = vst.msk [vmem:[#allocation3 + $0x37] sm:$0x1] %vm373_vm3, %v1513_v18 }
 0x84b   :  { %1522 = vst.msk [vmem:[#allocation3 + $0x3f] sm:$0x1] %vm373_vm3, %v1514_v5  ;;  %v1523_v6 = vld [vmem:[#allocation3] sm:$0xff] }
 0x84c   :  { %v1524_v7 = vld [vmem:[#allocation3 + $0x8] sm:$0xff] }
 0x84d   :  { %v1531_v8 = vpack.c.bf16 %v1524_v7, %v1523_v6  ;;  %v1525_v9 = vld [vmem:[#allocation3 + $0x10] sm:$0xff] }
 0x84e   :  { %v1526_v10 = vld [vmem:[#allocation3 + $0x18] sm:$0xff] }
 0x84f   :  { %3316 = vmatprep.mubr.msk.bf16.mxu0 %vm249_vm2, %v1531_v8  ;;  %v1532_v11 = vpack.c.bf16 %v1526_v10, %v1525_v9  ;;  %v1527_v12 = vld [vmem:[#allocation3 + $0x20] sm:$0xff] }
 0x850   :  { %v1528_v14 = vld [vmem:[#allocation3 + $0x28] sm:$0xff] }
 0x851   :  { %3317 = vmatmul.mubr.msk.bf16.vlgmr.msra.gmra.mrb[20].mxu0 %vm249_vm2, %v1532_v11  ;;  %v1533_v15 = vpack.c.bf16 %v1528_v14, %v1527_v12  ;;  %v1529_v16 = vld [vmem:[#allocation3 + $0x30] sm:$0xff] }
 0x852   :  { %v1530_v17 = vld [vmem:[#allocation3 + $0x38] sm:$0xff]  ;;  %3337 = vmatpush3.bf16.msra.mxu0 %v4304_v31 }
 0x853   :  { %3320 = vmatprep.mubr.msk.bf16.mxu0 %vm249_vm2, %v1533_v15  ;;  %v1534_v19 = vpack.c.bf16 %v1530_v17, %v1529_v16  ;;  %3338 = vmatprep.subr.bf16.mxu0 %v3898_v0 }
 0x856   :  { %3339 = vmatpush3.bf16.msra.mxu0 %v4307_v32 }
 0x857   :  { %3352 = vmatprep.subr.bf16.mxu0 %v3898_v0 }
 0x859   :  { %3321 = vmatmul.mubr.msk.bf16.gmra.mrb[24].mxu0 %vm249_vm2, %v1534_v19 }
 0x85a   :  { %3340 = vmatprep.mubr.msk.bf16.mxu0 %vm3899_vm0, %v3898_v0 }
 0x861   :  { %3341 = vmatmul.mubr.bf16.vlgmr.msra.gmra.mrb[28].mxu0 %v3900_v22 }
 0x862   :  { %3353 = vmatpush3.bf16.msra.mxu0 %v4304_v31  ;;  %3356 = vmatprep.mubr.msk.bf16.mxu0 %vm3899_vm0, %v3898_v0 }
 0x863   :  { %3354 = vmatprep.subr.bf16.mxu0 %v3898_v0 }
 0x866   :  { %3355 = vmatpush3.bf16.msra.mxu0 %v4307_v32 }
 0x867   :  { %3368 = vmatprep.subr.bf16.mxu0 %v3898_v0 }
 0x924   :  { %v3318_v34 = vpop.f32.mrb[20].mxu0 }
 0x925   :  { %v1597_v35 = vadd.f32 %v3318_v34, %v3146_v33  ;;  %v1588_v36 = vpop.f32.mrb[21].mxu0 }
 0x926   :  { %v1589_v37 = vadd.f32 %v3146_v33, %v1588_v36  ;;  %v3319_v22 = vpop.f32.mrb[22].mxu0 }
 0x927   :  { %v1629_v38 = vmul.f32 0.70710677, %v1597_v35  ;;  %v1600_v39 = vadd.f32 %v3319_v22, %v3146_v33  ;;  %v1591_v40 = vpop.f32.mrb[23].mxu0  ;;  %v1621_v62 = vmul.f32 0.5, %v1597_v35 }
 0x928   :  { %v1627_v41 = vmul.f32 0.70710677, %v1589_v37  ;;  %v1592_v42 = vadd.f32 %v3146_v33, %v1591_v40  ;;  %v1619_v2 = vmul.f32 0.5, %v1589_v37  ;;  %v3151_v37 = vld [vmem:[#allocation12] ss:$0 sm:$0xff] }
 0x929   :  { %3557 = verf.f32 %v1629_v38  ;;  %v1630_v43 = vmul.f32 0.70710677, %v1600_v39  ;;  %v1622_v63 = vmul.f32 0.5, %v1600_v39 }
 0x92a   :  { %3559 = verf.f32 %v1627_v41  ;;  %v1628_v44 = vmul.f32 0.70710677, %v1592_v42  ;;  %v1620_v3 = vmul.f32 0.5, %v1592_v42 }
 0x92b   :  { %3561 = verf.f32 %v1630_v43 }
 0x92c   :  { %3563 = verf.f32 %v1628_v44  ;;  %v3322_v45 = vpop.f32.mrb[24].mxu0 }
 0x92d   :  { %v1613_v46 = vadd.f32 %v3322_v45, %v3146_v33  ;;  %v1604_v47 = vpop.f32.mrb[25].mxu0 }
 0x92e   :  { %v1605_v48 = vadd.f32 %v3146_v33, %v1604_v47  ;;  %v3323_v49 = vpop.f32.mrb[26].mxu0 }
 0x92f   :  { %v1633_v50 = vmul.f32 0.70710677, %v1613_v46  ;;  %v1616_v51 = vadd.f32 %v3323_v49, %v3146_v33  ;;  %v1607_v52 = vpop.f32.mrb[27].mxu0  ;;  %v1625_v17 = vmul.f32 0.5, %v1613_v46 }
 0x930   :  { %v1631_v53 = vmul.f32 0.70710677, %v1605_v48  ;;  %v1608_v54 = vadd.f32 %v3146_v33, %v1607_v52  ;;  %v1623_v21 = vmul.f32 0.5, %v1605_v48 }
 0x931   :  { %3565 = verf.f32 %v1633_v50  ;;  %v1634_v55 = vmul.f32 0.70710677, %v1616_v51  ;;  %v1626_v19 = vmul.f32 0.5, %v1616_v51 }
 0x932   :  { %3567 = verf.f32 %v1631_v53  ;;  %v1632_v56 = vmul.f32 0.70710677, %v1608_v54  ;;  %v1624_v23 = vmul.f32 0.5, %v1608_v54 }
 0x933   :  { %v3558_v57 = vpop.eup %3557  ;;  %3569 = verf.f32 %v1634_v55 }
 0x934   :  { %v3560_v58 = vpop.eup %3559  ;;  %v1645_v59 = vadd.f32 1.0, %v3558_v57  ;;  %3571 = verf.f32 %v1632_v56  ;;  %v1815_v33 = vpop.f32.mrb[28].mxu0 }
 0x935   :  { %v3562_v60 = vpop.eup %3561  ;;  %v1643_v61 = vadd.f32 1.0, %v3560_v58  ;;  %v3342_v34 = vpop.f32.mrb[29].mxu0  ;;  %v1823_v45 = vrot.slane %v1815_v33, 2  ;;  %v1824_v48 = vrot.slane %v1815_v33, 3  ;;  %v1822_v51 = vrot.slane %v1815_v33, 1 }
 0x936   :  { %v3564_v13 = vpop.eup %3563  ;;  %v1646_v1 = vadd.f32 1.0, %v3562_v60  ;;  %v1653_v18 = vmul.f32 %v1645_v59, %v1621_v62  ;;  %v1818_v35 = vpop.f32.mrb[30].mxu0 }
 0x937   :  { %v1644_v4 = vadd.f32 1.0, %v3564_v13  ;;  %v1651_v6 = vmul.f32 %v1643_v61, %v1619_v2  ;;  %v3343_v36 = vpop.f32.mrb[31].mxu0  ;;  %v1827_v2 = vrot.slane %v1815_v33, 6 }
 0x938   :  { %v1654_v5 = vmul.f32 %v1646_v1, %v1622_v63 }
 0x939   :  { %v1652_v7 = vmul.f32 %v1644_v4, %v1620_v3 }
 0x93a   :  { %v1672_v8 = vpack.c.bf16 %v1654_v5, %v1653_v18  ;;  %v1825_v5 = vrot.slane %v1815_v33, 4 }
 0x93b   :  { %v3566_v9 = vpop.eup %3565  ;;  %v1671_v10 = vpack.c.bf16 %v1652_v7, %v1651_v6  ;;  %v1828_v6 = vrot.slane %v1815_v33, 7 }
 0x93c   :  { %v3568_v11 = vpop.eup %3567  ;;  %v1649_v12 = vadd.f32 1.0, %v3566_v9  ;;  %v1826_v9 = vrot.slane %v1815_v33, 5 }
 0x93d   :  { %v3570_v14 = vpop.eup %3569  ;;  %v1647_v15 = vadd.f32 1.0, %v3568_v11  ;;  %3328 = vmatprep.mubr.msk.bf16.mxu1 %vm249_vm2, %v1671_v10 }
 0x93e   :  { %v3572_v16 = vpop.eup %3571  ;;  %v1650_v20 = vadd.f32 1.0, %v3570_v14  ;;  %3329 = vmatmul.mubr.msk.bf16.vlgmr.msra.gmra.mrb[20].mxu1 %vm249_vm2, %v1672_v8  ;;  %v1657_v25 = vmul.f32 %v1649_v12, %v1625_v17 }
 0x93f   :  { %v1648_v24 = vadd.f32 1.0, %v3572_v16  ;;  %3345 = vmatpush3.bf16.msra.mxu1 %v4304_v31  ;;  %v1655_v27 = vmul.f32 %v1647_v15, %v1623_v21 }
 0x940   :  { %v1658_v26 = vmul.f32 %v1650_v20, %v1626_v19  ;;  %3346 = vmatprep.subr.bf16.mxu1 %v3898_v0 }
 0x941   :  { %v1656_v28 = vmul.f32 %v1648_v24, %v1624_v23 }
 0x942   :  { %v1674_v29 = vpack.c.bf16 %v1658_v26, %v1657_v25 }
 0x943   :  { %v1673_v30 = vpack.c.bf16 %v1656_v28, %v1655_v27  ;;  %3347 = vmatpush3.bf16.msra.mxu1 %v4307_v32 }
 0x944   :  { %3360 = vmatprep.subr.bf16.mxu1 %v3898_v0 }
 0x945   :  { %3332 = vmatprep.mubr.msk.bf16.mxu1 %vm249_vm2, %v1673_v30 }
 0x946   :  { %3333 = vmatmul.mubr.msk.bf16.gmra.mrb[24].mxu1 %vm249_vm2, %v1674_v29 }
 0x947   :  { %3348 = vmatprep.mubr.msk.bf16.mxu1 %vm3899_vm0, %v3898_v0 }
 0xa11   :  { %v3330_v22 = vpop.f32.mrb[20].mxu1 }
 0xa12   :  { %v1743_v38 = vadd.f32 %v3330_v22, %v3151_v37  ;;  %v1734_v39 = vpop.f32.mrb[21].mxu1 }
 0xa13   :  { %v1735_v40 = vadd.f32 %v3151_v37, %v1734_v39  ;;  %v3331_v41 = vpop.f32.mrb[22].mxu1 }
 0xa14   :  { %1767 = vst.msk [vmem:[#allocation2 + $0x10] sm:$0xff] %vm249_vm2, %v1743_v38  ;;  %v1746_v42 = vadd.f32 %v3331_v41, %v3151_v37  ;;  %v1737_v43 = vpop.f32.mrb[23].mxu1 }
 0xa15   :  { %1765 = vst.msk [vmem:[#allocation2] sm:$0xff] %vm249_vm2, %v1735_v40  ;;  %v1738_v44 = vadd.f32 %v3151_v37, %v1737_v43 }
 0xa16   :  { %1768 = vst.msk [vmem:[#allocation2 + $0x18] sm:$0xff] %vm249_vm2, %v1746_v42 }
 0xa17   :  { %1766 = vst.msk [vmem:[#allocation2 + $0x8] sm:$0xff] %vm249_vm2, %v1738_v44 }
 0xa19   :  { %v3334_v46 = vpop.f32.mrb[24].mxu1 }
 0xa1a   :  { %v1759_v47 = vadd.f32 %v3334_v46, %v3151_v37  ;;  %v1750_v49 = vpop.f32.mrb[25].mxu1 }
 0xa1b   :  { %v1775_v50 = vld [vmem:[#allocation2 + $0x10] sm:$0x1]  ;;  %v1751_v52 = vadd.f32 %v3151_v37, %v1750_v49  ;;  %v3335_v53 = vpop.f32.mrb[26].mxu1 }
 0xa1c   :  { %1771 = vst.msk [vmem:[#allocation2 + $0x30] sm:$0xff] %vm249_vm2, %v1759_v47  ;;  %v1773_v54 = vld [vmem:[#allocation2] sm:$0x1]  ;;  %v1839_v55 = vadd.f32 %v1823_v45, %v1775_v50  ;;  %v1762_v56 = vadd.f32 %v3335_v53, %v3151_v37  ;;  %v1753_v57 = vpop.f32.mrb[27].mxu1 }
 0xa1d   :  { %v1776_v58 = vld [vmem:[#allocation2 + $0x18] sm:$0x1]  ;;  %v1837_v59 = vadd.f32 %v1815_v33, %v1773_v54  ;;  %1769 = vst.msk [vmem:[#allocation2 + $0x20] sm:$0xff] %vm249_vm2, %v1751_v52  ;;  %v1754_v60 = vadd.f32 %v3151_v37, %v1753_v57 }
 0xa1e   :  { %v1774_v61 = vld [vmem:[#allocation2 + $0x8] sm:$0x1]  ;;  %v1840_v13 = vadd.f32 %v1824_v48, %v1776_v58  ;;  %v1855_v62 = vmul.f32 0.70710677, %v1839_v55  ;;  %1772 = vst.msk [vmem:[#allocation2 + $0x38] sm:$0xff] %vm249_vm2, %v1762_v56  ;;  %v1847_v24 = vmul.f32 0.5, %v1839_v55 }
 0xa1f   :  { %v1838_v63 = vadd.f32 %v1822_v51, %v1774_v61  ;;  %v1853_v1 = vmul.f32 0.70710677, %v1837_v59  ;;  %1770 = vst.msk [vmem:[#allocation2 + $0x28] sm:$0xff] %vm249_vm2, %v1754_v60  ;;  %v1845_v27 = vmul.f32 0.5, %v1837_v59 }
 0xa20   :  { %v1856_v3 = vmul.f32 0.70710677, %v1840_v13  ;;  %3573 = verf.f32 %v1855_v62  ;;  %v1848_v30 = vmul.f32 0.5, %v1840_v13 }
 0xa21   :  { %v1854_v4 = vmul.f32 0.70710677, %v1838_v63  ;;  %3575 = verf.f32 %v1853_v1  ;;  %v1846_v35 = vmul.f32 0.5, %v1838_v63 }
 0xa22   :  { %3577 = verf.f32 %v1856_v3 }
 0xa23   :  { %v1779_v18 = vld [vmem:[#allocation2 + $0x30] sm:$0x1]  ;;  %3579 = verf.f32 %v1854_v4 }
 0xa24   :  { %v1843_v7 = vadd.f32 %v1827_v2, %v1779_v18  ;;  %v1777_v8 = vld [vmem:[#allocation2 + $0x20] sm:$0x1] }
 0xa25   :  { %v1780_v10 = vld [vmem:[#allocation2 + $0x38] sm:$0x1]  ;;  %v1841_v11 = vadd.f32 %v1825_v5, %v1777_v8 }
 0xa26   :  { %v1859_v12 = vmul.f32 0.70710677, %v1843_v7  ;;  %v1778_v14 = vld [vmem:[#allocation2 + $0x28] sm:$0x1]  ;;  %v1844_v15 = vadd.f32 %v1828_v6, %v1780_v10  ;;  %v1851_v44 = vmul.f32 0.5, %v1843_v7 }
 0xa27   :  { %v1842_v16 = vadd.f32 %v1826_v9, %v1778_v14  ;;  %v1857_v17 = vmul.f32 0.70710677, %v1841_v11  ;;  %v1849_v50 = vmul.f32 0.5, %v1841_v11 }
 0xa28   :  { %3581 = verf.f32 %v1859_v12  ;;  %v1860_v19 = vmul.f32 0.70710677, %v1844_v15  ;;  %v1852_v55 = vmul.f32 0.5, %v1844_v15 }
 0xa29   :  { %v1858_v20 = vmul.f32 0.70710677, %v1842_v16  ;;  %3583 = verf.f32 %v1857_v17  ;;  %v1850_v54 = vmul.f32 0.5, %v1842_v16 }
 0xa2a   :  { %v3574_v21 = vpop.eup %3573  ;;  %3585 = verf.f32 %v1860_v19 }
 0xa2b   :  { %v3576_v23 = vpop.eup %3575  ;;  %v1871_v25 = vadd.f32 1.0, %v3574_v21  ;;  %3587 = verf.f32 %v1858_v20 }
 0xa2c   :  { %v3578_v26 = vpop.eup %3577  ;;  %v1869_v28 = vadd.f32 1.0, %v3576_v23 }
 0xa2d   :  { %v3580_v29 = vpop.eup %3579  ;;  %v1872_v33 = vadd.f32 1.0, %v3578_v26  ;;  %v1879_v34 = vmul.f32 %v1871_v25, %v1847_v24  ;;  %v1885_v24 = vld [vmem:[#allocation2 + $0x1] sm:$0x1]  ;;  %v1887_v25 = vld [vmem:[#allocation2 + $0x11] sm:$0x1] }
 0xa2e   :  { %v1870_v36 = vadd.f32 1.0, %v3580_v29  ;;  %v1877_v37 = vmul.f32 %v1869_v28, %v1845_v27  ;;  %v1888_v26 = vld [vmem:[#allocation2 + $0x19] sm:$0x1] }
 0xa2f   :  { %v1880_v22 = vmul.f32 %v1872_v33, %v1848_v30  ;;  %v1895_v39 = vpack.c.bf16 %v1879_v34, %v1879_v34 }
 0xa30   :  { %v1878_v38 = vmul.f32 %v1870_v36, %v1846_v35  ;;  %v1893_v41 = vpack.c.bf16 %v1877_v37, %v1877_v37  ;;  %v1886_v35 = vld [vmem:[#allocation2 + $0x9] sm:$0x1] }
 0xa31   :  { %v1896_v46 = vpack.c.bf16 %v1880_v22, %v1880_v22  ;;  %v1911_v49 = vunpack.c.l.b16 %v1895_v39  ;;  %v1889_v39 = vld [vmem:[#allocation2 + $0x21] sm:$0x1] }
 0xa32   :  { %v3582_v40 = vpop.eup %3581  ;;  %v1894_v42 = vpack.c.bf16 %v1878_v38, %v1878_v38  ;;  %v1909_v57 = vunpack.c.l.b16 %v1893_v41 }
 0xa33   :  { %v3584_v43 = vpop.eup %3583  ;;  %v1875_v45 = vadd.f32 1.0, %v3582_v40  ;;  %v1912_v61 = vunpack.c.l.b16 %v1896_v46  ;;  %v1919_v1 = vrot.slane %v1911_v49, 6  ;;  %v1892_v49 = vld [vmem:[#allocation2 + $0x39] sm:$0x1] }
 0xa34   :  { %v3586_v47 = vpop.eup %3585  ;;  %v1910_v48 = vunpack.c.l.b16 %v1894_v42  ;;  %v1873_v51 = vadd.f32 1.0, %v3584_v43 }
 0xa35   :  { %v3588_v52 = vpop.eup %3587  ;;  %v1883_v53 = vmul.f32 %v1875_v45, %v1851_v44  ;;  %v1876_v56 = vadd.f32 1.0, %v3586_v47  ;;  %v1921_v7 = vrot.slane %v1912_v61, 5  ;;  %v1890_v45 = vld [vmem:[#allocation2 + $0x29] sm:$0x1]  ;;  %v1891_v47 = vld [vmem:[#allocation2 + $0x31] sm:$0x1] }
 0xa36   :  { %v1917_v58 = vrot.slane %v1910_v48, 7  ;;  %v1874_v59 = vadd.f32 1.0, %v3588_v52  ;;  %v1881_v60 = vmul.f32 %v1873_v51, %v1849_v50 }
 0xa37   :  { %v1884_v13 = vmul.f32 %v1876_v56, %v1852_v55  ;;  %v1899_v62 = vpack.c.bf16 %v1883_v53, %v1883_v53 }
 0xa38   :  { %v1918_v63 = vsel %vm415_vm4, %v1917_v58, %v1909_v57  ;;  %v1882_v2 = vmul.f32 %v1874_v59, %v1850_v54  ;;  %v1897_v3 = vpack.c.bf16 %v1881_v60, %v1881_v60 }
 0xa39   :  { %v1900_v4 = vpack.c.bf16 %v1884_v13, %v1884_v13  ;;  %v1920_v6 = vsel %vm418_vm5, %v1919_v1, %v1918_v63  ;;  %v1915_v8 = vunpack.c.l.b16 %v1899_v62 }
 0xa3a   :  { %v1898_v18 = vpack.c.bf16 %v1882_v2, %v1882_v2  ;;  %v1913_v5 = vunpack.c.l.b16 %v1897_v3  ;;  %v1922_v12 = vsel %vm421_vm6, %v1921_v7, %v1920_v6 }
 0xa3b   :  { %v1916_v10 = vunpack.c.l.b16 %v1900_v4  ;;  %v1927_v16 = vrot.slane %v1915_v8, 2 }
 0xa3c   :  { %v1914_v9 = vunpack.c.l.b16 %v1898_v18  ;;  %v1923_v11 = vrot.slane %v1913_v5, 4 }
 0xa3d   :  { %v1929_v19 = vrot.slane %v1916_v10, 1 }
 0xa3e   :  { %v1924_v14 = vsel %vm424_vm7, %v1923_v11, %v1922_v12  ;;  %v1925_v15 = vrot.slane %v1914_v9, 3 }
 0xa40   :  { %v1926_v17 = vsel %vm427_vm8, %v1925_v15, %v1924_v14 }
 0xa41   :  { %v1928_v20 = vsel %vm430_vm9, %v1927_v16, %v1926_v17 }
 0xa42   :  { %v1930_v21 = vsel %vm433_vm10, %v1929_v19, %v1928_v20 }
 0xa43   :  { %v1931_v23 = vpack.c.b16 %v1930_v21, %v1930_v21 }
 0xa45   :  { %3349 = vmatmul.mubr.msk.bf16.vlgmr.msra.gmra.mrb[28].mxu1 %vm249_vm2, %v1931_v23 }
 0xa46   :  { %3361 = vmatpush3.bf16.msra.mxu1 %v4304_v31  ;;  %3364 = vmatprep.mubr.msk.bf16.mxu1 %vm3899_vm0, %v3898_v0 }
 0xa47   :  { %3362 = vmatprep.subr.bf16.mxu1 %v3898_v0 }
 0xa4a   :  { %3363 = vmatpush3.bf16.msra.mxu1 %v4307_v32 }
 0xa4b   :  { %3376 = vmatprep.subr.bf16.mxu1 %v3898_v0 }
 0xb18   :  { %v1969_v27 = vpop.f32.mrb[28].mxu1 }
 0xb19   :  { %v1976_v28 = vrot.slane %v1969_v27, 1  ;;  %v1977_v29 = vrot.slane %v1969_v27, 2  ;;  %v1978_v30 = vrot.slane %v1969_v27, 3  ;;  %v1979_v33 = vrot.slane %v1969_v27, 4  ;;  %v3350_v34 = vpop.f32.mrb[29].mxu1 }
 0xb1a   :  { %v1980_v36 = vrot.slane %v1969_v27, 5  ;;  %v1981_v37 = vrot.slane %v1969_v27, 6  ;;  %v1991_v22 = vadd.f32 %v1969_v27, %v1885_v24  ;;  %v1972_v38 = vpop.f32.mrb[30].mxu1  ;;  %v1982_v40 = vrot.slane %v1969_v27, 7 }
 0xb1b   :  { %v1992_v41 = vadd.f32 %v1976_v28, %v1886_v35  ;;  %v1993_v42 = vadd.f32 %v1977_v29, %v1887_v25  ;;  %v1994_v43 = vadd.f32 %v1978_v30, %v1888_v26  ;;  %v3351_v44 = vpop.f32.mrb[31].mxu1  ;;  %v1995_v46 = vadd.f32 %v1979_v33, %v1889_v39 }
 0xb1c   :  { %v1996_v48 = vadd.f32 %v1980_v36, %v1890_v45  ;;  %v1997_v50 = vadd.f32 %v1981_v37, %v1891_v47  ;;  %v2007_v51 = vmul.f32 0.70710677, %v1991_v22  ;;  %v1998_v53 = vadd.f32 %v1982_v40, %v1892_v49 }
 0xb1d   :  { %v2008_v52 = vmul.f32 0.70710677, %v1992_v41  ;;  %v2009_v54 = vmul.f32 0.70710677, %v1993_v42  ;;  %v2010_v55 = vmul.f32 0.70710677, %v1994_v43 }
 0xb1e   :  { %v2011_v56 = vmul.f32 0.70710677, %v1995_v46  ;;  %3589 = verf.f32 %v2007_v51  ;;  %v2012_v57 = vmul.f32 0.70710677, %v1996_v48  ;;  %v2013_v58 = vmul.f32 0.70710677, %v1997_v50 }
 0xb1f   :  { %3591 = verf.f32 %v2008_v52  ;;  %v2014_v59 = vmul.f32 0.70710677, %v1998_v53  ;;  %v1999_v13 = vmul.f32 0.5, %v1991_v22  ;;  %v2000_v1 = vmul.f32 0.5, %v1992_v41 }
 0xb20   :  { %3593 = verf.f32 %v2009_v54  ;;  %v2001_v4 = vmul.f32 0.5, %v1993_v42  ;;  %v2002_v7 = vmul.f32 0.5, %v1994_v43  ;;  %v2003_v8 = vmul.f32 0.5, %v1995_v46 }
 0xb21   :  { %3595 = verf.f32 %v2010_v55  ;;  %v2004_v12 = vmul.f32 0.5, %v1996_v48  ;;  %v2005_v21 = vmul.f32 0.5, %v1997_v50  ;;  %v2006_v26 = vmul.f32 0.5, %v1998_v53 }
 0xb22   :  { %3597 = verf.f32 %v2011_v56 }
 0xb23   :  { %3599 = verf.f32 %v2012_v57 }
 0xb24   :  { %3601 = verf.f32 %v2013_v58 }
 0xb25   :  { %3603 = verf.f32 %v2014_v59 }
 0xb28   :  { %v3590_v60 = vpop.eup %3589 }
 0xb29   :  { %v3592_v61 = vpop.eup %3591  ;;  %v2023_v62 = vadd.f32 1.0, %v3590_v60 }
 0xb2a   :  { %v3594_v63 = vpop.eup %3593  ;;  %v2024_v2 = vadd.f32 1.0, %v3592_v61 }
 0xb2b   :  { %v3596_v3 = vpop.eup %3595  ;;  %v2025_v18 = vadd.f32 1.0, %v3594_v63  ;;  %v2031_v5 = vmul.f32 %v2023_v62, %v1999_v13  ;;  %v2039_v13 = vld [vmem:[#allocation2 + $0x2] sm:$0x1]  ;;  %v2040_v62 = vld [vmem:[#allocation2 + $0xa] sm:$0x1] }
 0xb2c   :  { %v3598_v6 = vpop.eup %3597  ;;  %v2026_v9 = vadd.f32 1.0, %v3596_v3  ;;  %v2032_v10 = vmul.f32 %v2024_v2, %v2000_v1  ;;  %v2041_v63 = vld [vmem:[#allocation2 + $0x12] sm:$0x1] }
 0xb2d   :  { %v3600_v11 = vpop.eup %3599  ;;  %v2033_v14 = vmul.f32 %v2025_v18, %v2001_v4  ;;  %v2047_v15 = vpack.c.bf16 %v2031_v5, %v2031_v5  ;;  %v2027_v16 = vadd.f32 1.0, %v3598_v6  ;;  %v2042_v6 = vld [vmem:[#allocation2 + $0x1a] sm:$0x1] }
 0xb2e   :  { %v3602_v17 = vpop.eup %3601  ;;  %v2034_v19 = vmul.f32 %v2026_v9, %v2002_v7  ;;  %v2048_v20 = vpack.c.bf16 %v2032_v10, %v2032_v10  ;;  %v2028_v23 = vadd.f32 1.0, %v3600_v11  ;;  %v2043_v11 = vld [vmem:[#allocation2 + $0x22] sm:$0x1] }
 0xb2f   :  { %v3604_v24 = vpop.eup %3603  ;;  %v2049_v25 = vpack.c.bf16 %v2033_v14, %v2033_v14  ;;  %v2029_v27 = vadd.f32 1.0, %v3602_v17  ;;  %v2035_v28 = vmul.f32 %v2027_v16, %v2003_v8  ;;  %v2063_v35 = vunpack.c.l.b16 %v2047_v15 }
 0xb30   :  { %v2050_v29 = vpack.c.bf16 %v2034_v19, %v2034_v19  ;;  %v2064_v30 = vunpack.c.l.b16 %v2048_v20  ;;  %v2030_v33 = vadd.f32 1.0, %v3604_v24  ;;  %v2036_v34 = vmul.f32 %v2028_v23, %v2004_v12  ;;  %v2044_v19 = vld [vmem:[#allocation2 + $0x2a] sm:$0x1]  ;;  %v2046_v24 = vld [vmem:[#allocation2 + $0x3a] sm:$0x1] }
 0xb31   :  { %v2065_v36 = vunpack.c.l.b16 %v2049_v25  ;;  %v2037_v37 = vmul.f32 %v2029_v27, %v2005_v21  ;;  %v2051_v22 = vpack.c.bf16 %v2035_v28, %v2035_v28  ;;  %v2045_v21 = vld [vmem:[#allocation2 + $0x32] sm:$0x1] }
 0xb32   :  { %v2071_v38 = vrot.slane %v2064_v30, 7  ;;  %v2038_v39 = vmul.f32 %v2030_v33, %v2006_v26  ;;  %v2052_v40 = vpack.c.bf16 %v2036_v34, %v2036_v34  ;;  %v2066_v41 = vunpack.c.l.b16 %v2050_v29 }
 0xb33   :  { %v2073_v42 = vrot.slane %v2065_v36, 6  ;;  %v2053_v43 = vpack.c.bf16 %v2037_v37, %v2037_v37  ;;  %v2067_v44 = vunpack.c.l.b16 %v2051_v22 }
 0xb34   :  { %v2054_v45 = vpack.c.bf16 %v2038_v39, %v2038_v39  ;;  %v2068_v46 = vunpack.c.l.b16 %v2052_v40  ;;  %v2072_v47 = vsel %vm415_vm4, %v2071_v38, %v2063_v35  ;;  %v2075_v48 = vrot.slane %v2066_v41, 5 }
 0xb35   :  { %v2069_v49 = vunpack.c.l.b16 %v2053_v43  ;;  %v2074_v50 = vsel %vm418_vm5, %v2073_v42, %v2072_v47  ;;  %v2077_v51 = vrot.slane %v2067_v44, 4 }
 0xb36   :  { %v2070_v52 = vunpack.c.l.b16 %v2054_v45  ;;  %v2076_v53 = vsel %vm421_vm6, %v2075_v48, %v2074_v50  ;;  %v2079_v54 = vrot.slane %v2068_v46, 3 }
 0xb37   :  { %v2078_v55 = vsel %vm424_vm7, %v2077_v51, %v2076_v53  ;;  %v2081_v56 = vrot.slane %v2069_v49, 2 }
 0xb38   :  { %v2080_v57 = vsel %vm427_vm8, %v2079_v54, %v2078_v55  ;;  %v2083_v58 = vrot.slane %v2070_v52, 1 }
 0xb39   :  { %v2082_v59 = vsel %vm430_vm9, %v2081_v56, %v2080_v57 }
 0xb3a   :  { %v2084_v60 = vsel %vm433_vm10, %v2083_v58, %v2082_v59 }
 0xb3b   :  { %v2085_v61 = vpack.c.b16 %v2084_v60, %v2084_v60 }
 0xb3d   :  { %3357 = vmatmul.mubr.msk.bf16.vlgmr.msra.gmra.mrb[32].mxu0 %vm249_vm2, %v2085_v61 }
 0xb3e   :  { %3369 = vmatpush3.bf16.msra.mxu0 %v4304_v31  ;;  %3372 = vmatprep.mubr.msk.bf16.mxu0 %vm3899_vm0, %v3898_v0 }
 0xb3f   :  { %3370 = vmatprep.subr.bf16.mxu0 %v3898_v0 }
 0xb42   :  { %3371 = vmatpush3.bf16.msra.mxu0 %v4307_v32 }
 0xb43   :  { %3384 = vmatprep.subr.bf16.mxu0 %v3898_v0 }
 0xc10   :  { %v2123_v1 = vpop.f32.mrb[32].mxu0 }
 0xc11   :  { %v2130_v2 = vrot.slane %v2123_v1, 1  ;;  %v2131_v3 = vrot.slane %v2123_v1, 2  ;;  %v2132_v4 = vrot.slane %v2123_v1, 3  ;;  %v2133_v18 = vrot.slane %v2123_v1, 4  ;;  %v3358_v5 = vpop.f32.mrb[33].mxu0 }
 0xc12   :  { %v2134_v7 = vrot.slane %v2123_v1, 5  ;;  %v2135_v8 = vrot.slane %v2123_v1, 6  ;;  %v2145_v9 = vadd.f32 %v2123_v1, %v2039_v13  ;;  %v2126_v10 = vpop.f32.mrb[34].mxu0  ;;  %v2136_v12 = vrot.slane %v2123_v1, 7 }
 0xc13   :  { %v2146_v14 = vadd.f32 %v2130_v2, %v2040_v62  ;;  %v2147_v15 = vadd.f32 %v2131_v3, %v2041_v63  ;;  %v2148_v16 = vadd.f32 %v2132_v4, %v2042_v6  ;;  %v3359_v17 = vpop.f32.mrb[35].mxu0  ;;  %v2149_v20 = vadd.f32 %v2133_v18, %v2043_v11 }
 0xc14   :  { %v2150_v23 = vadd.f32 %v2134_v7, %v2044_v19  ;;  %v2151_v25 = vadd.f32 %v2135_v8, %v2045_v21  ;;  %v2161_v26 = vmul.f32 0.70710677, %v2145_v9  ;;  %v2152_v28 = vadd.f32 %v2136_v12, %v2046_v24 }
 0xc15   :  { %v2162_v27 = vmul.f32 0.70710677, %v2146_v14  ;;  %v2163_v29 = vmul.f32 0.70710677, %v2147_v15  ;;  %v2164_v30 = vmul.f32 0.70710677, %v2148_v16 }
 0xc16   :  { %v2165_v33 = vmul.f32 0.70710677, %v2149_v20  ;;  %3605 = verf.f32 %v2161_v26  ;;  %v2166_v34 = vmul.f32 0.70710677, %v2150_v23  ;;  %v2167_v35 = vmul.f32 0.70710677, %v2151_v25 }
 0xc17   :  { %3607 = verf.f32 %v2162_v27  ;;  %v2168_v36 = vmul.f32 0.70710677, %v2152_v28  ;;  %v2153_v38 = vmul.f32 0.5, %v2145_v9  ;;  %v2154_v41 = vmul.f32 0.5, %v2146_v14 }
 0xc18   :  { %3609 = verf.f32 %v2163_v29  ;;  %v2155_v44 = vmul.f32 0.5, %v2147_v15  ;;  %v2156_v48 = vmul.f32 0.5, %v2148_v16  ;;  %v2157_v49 = vmul.f32 0.5, %v2149_v20 }
 0xc19   :  { %3611 = verf.f32 %v2164_v30  ;;  %v2158_v53 = vmul.f32 0.5, %v2150_v23  ;;  %v2159_v60 = vmul.f32 0.5, %v2151_v25  ;;  %v2160_v63 = vmul.f32 0.5, %v2152_v28 }
 0xc1a   :  { %3613 = verf.f32 %v2165_v33 }
 0xc1b   :  { %3615 = verf.f32 %v2166_v34 }
 0xc1c   :  { %3617 = verf.f32 %v2167_v35 }
 0xc1d   :  { %3619 = verf.f32 %v2168_v36 }
 0xc20   :  { %v3606_v37 = vpop.eup %3605 }
 0xc21   :  { %v3608_v22 = vpop.eup %3607  ;;  %v2177_v39 = vadd.f32 1.0, %v3606_v37 }
 0xc22   :  { %v3610_v40 = vpop.eup %3609  ;;  %v2178_v42 = vadd.f32 1.0, %v3608_v22 }
 0xc23   :  { %v3612_v43 = vpop.eup %3611  ;;  %v2179_v45 = vadd.f32 1.0, %v3610_v40  ;;  %v2185_v46 = vmul.f32 %v2177_v39, %v2153_v38  ;;  %v2193_v38 = vld [vmem:[#allocation2 + $0x3] sm:$0x1]  ;;  %v2194_v39 = vld [vmem:[#allocation2 + $0xb] sm:$0x1] }
 0xc24   :  { %v3614_v47 = vpop.eup %3613  ;;  %v2180_v50 = vadd.f32 1.0, %v3612_v43  ;;  %v2186_v51 = vmul.f32 %v2178_v42, %v2154_v41  ;;  %v2195_v40 = vld [vmem:[#allocation2 + $0x13] sm:$0x1] }
 0xc25   :  { %v3616_v52 = vpop.eup %3615  ;;  %v2187_v54 = vmul.f32 %v2179_v45, %v2155_v44  ;;  %v2201_v55 = vpack.c.bf16 %v2185_v46, %v2185_v46  ;;  %v2181_v56 = vadd.f32 1.0, %v3614_v47  ;;  %v2196_v47 = vld [vmem:[#allocation2 + $0x1b] sm:$0x1] }
 0xc26   :  { %v3618_v57 = vpop.eup %3617  ;;  %v2188_v58 = vmul.f32 %v2180_v50, %v2156_v48  ;;  %v2202_v59 = vpack.c.bf16 %v2186_v51, %v2186_v51  ;;  %v2182_v61 = vadd.f32 1.0, %v3616_v52  ;;  %v2197_v52 = vld [vmem:[#allocation2 + $0x23] sm:$0x1] }
 0xc27   :  { %v3620_v13 = vpop.eup %3619  ;;  %v2203_v62 = vpack.c.bf16 %v2187_v54, %v2187_v54  ;;  %v2183_v1 = vadd.f32 1.0, %v3618_v57  ;;  %v2189_v2 = vmul.f32 %v2181_v56, %v2157_v49  ;;  %v2217_v6 = vunpack.c.l.b16 %v2201_v55 }
 0xc28   :  { %v2204_v3 = vpack.c.bf16 %v2188_v58, %v2188_v58  ;;  %v2218_v4 = vunpack.c.l.b16 %v2202_v59  ;;  %v2184_v18 = vadd.f32 1.0, %v3620_v13  ;;  %v2190_v5 = vmul.f32 %v2182_v61, %v2158_v53  ;;  %v2198_v58 = vld [vmem:[#allocation2 + $0x2b] sm:$0x1]  ;;  %v2200_v13 = vld [vmem:[#allocation2 + $0x3b] sm:$0x1] }
 0xc29   :  { %v2219_v7 = vunpack.c.l.b16 %v2203_v62  ;;  %v2191_v8 = vmul.f32 %v2183_v1, %v2159_v60  ;;  %v2205_v9 = vpack.c.bf16 %v2189_v2, %v2189_v2  ;;  %v2199_v60 = vld [vmem:[#allocation2 + $0x33] sm:$0x1] }
 0xc2a   :  { %v2225_v10 = vrot.slane %v2218_v4, 7  ;;  %v2192_v11 = vmul.f32 %v2184_v18, %v2160_v63  ;;  %v2206_v12 = vpack.c.bf16 %v2190_v5, %v2190_v5  ;;  %v2220_v14 = vunpack.c.l.b16 %v2204_v3 }
 0xc2b   :  { %v2227_v15 = vrot.slane %v2219_v7, 6  ;;  %v2207_v16 = vpack.c.bf16 %v2191_v8, %v2191_v8  ;;  %v2221_v17 = vunpack.c.l.b16 %v2205_v9 }
 0xc2c   :  { %v2208_v19 = vpack.c.bf16 %v2192_v11, %v2192_v11  ;;  %v2222_v20 = vunpack.c.l.b16 %v2206_v12  ;;  %v2226_v21 = vsel %vm415_vm4, %v2225_v10, %v2217_v6  ;;  %v2229_v23 = vrot.slane %v2220_v14, 5 }
 0xc2d   :  { %v2223_v24 = vunpack.c.l.b16 %v2207_v16  ;;  %v2228_v25 = vsel %vm418_vm5, %v2227_v15, %v2226_v21  ;;  %v2231_v26 = vrot.slane %v2221_v17, 4 }
 0xc2e   :  { %v2224_v27 = vunpack.c.l.b16 %v2208_v19  ;;  %v2230_v28 = vsel %vm421_vm6, %v2229_v23, %v2228_v25  ;;  %v2233_v29 = vrot.slane %v2222_v20, 3 }
 0xc2f   :  { %v2232_v30 = vsel %vm424_vm7, %v2231_v26, %v2230_v28  ;;  %v2235_v33 = vrot.slane %v2223_v24, 2 }
 0xc30   :  { %v2234_v34 = vsel %vm427_vm8, %v2233_v29, %v2232_v30  ;;  %v2237_v35 = vrot.slane %v2224_v27, 1 }
 0xc31   :  { %v2236_v36 = vsel %vm430_vm9, %v2235_v33, %v2234_v34 }
 0xc32   :  { %v2238_v37 = vsel %vm433_vm10, %v2237_v35, %v2236_v36 }
 0xc33   :  { %v2239_v22 = vpack.c.b16 %v2238_v37, %v2238_v37 }
 0xc35   :  { %3365 = vmatmul.mubr.msk.bf16.vlgmr.msra.gmra.mrb[32].mxu1 %vm249_vm2, %v2239_v22 }
 0xc36   :  { %3377 = vmatpush3.bf16.msra.mxu1 %v4304_v31  ;;  %3380 = vmatprep.mubr.msk.bf16.mxu1 %vm3899_vm0, %v3898_v0 }
 0xc37   :  { %3378 = vmatprep.subr.bf16.mxu1 %v3898_v0 }
 0xc3a   :  { %3379 = vmatpush3.bf16.msra.mxu1 %v4307_v32 }
 0xc3b   :  { %3392 = vmatprep.subr.bf16.mxu1 %v3898_v0 }
 0xd08   :  { %v2277_v41 = vpop.f32.mrb[32].mxu1 }
 0xd09   :  { %v2284_v42 = vrot.slane %v2277_v41, 1  ;;  %v2285_v43 = vrot.slane %v2277_v41, 2  ;;  %v2286_v44 = vrot.slane %v2277_v41, 3  ;;  %v2287_v45 = vrot.slane %v2277_v41, 4  ;;  %v3366_v46 = vpop.f32.mrb[33].mxu1 }
 0xd0a   :  { %v2288_v48 = vrot.slane %v2277_v41, 5  ;;  %v2289_v49 = vrot.slane %v2277_v41, 6  ;;  %v2299_v50 = vadd.f32 %v2277_v41, %v2193_v38  ;;  %v2280_v51 = vpop.f32.mrb[34].mxu1  ;;  %v2290_v53 = vrot.slane %v2277_v41, 7 }
 0xd0b   :  { %v2300_v54 = vadd.f32 %v2284_v42, %v2194_v39  ;;  %v2301_v55 = vadd.f32 %v2285_v43, %v2195_v40  ;;  %v2302_v56 = vadd.f32 %v2286_v44, %v2196_v47  ;;  %v3367_v57 = vpop.f32.mrb[35].mxu1  ;;  %v2303_v59 = vadd.f32 %v2287_v45, %v2197_v52 }
 0xd0c   :  { %v2304_v61 = vadd.f32 %v2288_v48, %v2198_v58  ;;  %v2305_v62 = vadd.f32 %v2289_v49, %v2199_v60  ;;  %v2315_v63 = vmul.f32 0.70710677, %v2299_v50  ;;  %v2306_v2 = vadd.f32 %v2290_v53, %v2200_v13 }
 0xd0d   :  { %v2316_v1 = vmul.f32 0.70710677, %v2300_v54  ;;  %v2317_v3 = vmul.f32 0.70710677, %v2301_v55  ;;  %v2318_v4 = vmul.f32 0.70710677, %v2302_v56 }
 0xd0e   :  { %v2319_v18 = vmul.f32 0.70710677, %v2303_v59  ;;  %3621 = verf.f32 %v2315_v63  ;;  %v2320_v5 = vmul.f32 0.70710677, %v2304_v61  ;;  %v2321_v6 = vmul.f32 0.70710677, %v2305_v62 }
 0xd0f   :  { %3623 = verf.f32 %v2316_v1  ;;  %v2322_v7 = vmul.f32 0.70710677, %v2306_v2  ;;  %v2307_v10 = vmul.f32 0.5, %v2299_v50  ;;  %v2308_v14 = vmul.f32 0.5, %v2300_v54 }
 0xd10   :  { %3625 = verf.f32 %v2317_v3  ;;  %v2309_v17 = vmul.f32 0.5, %v2301_v55  ;;  %v2310_v23 = vmul.f32 0.5, %v2302_v56  ;;  %v2311_v24 = vmul.f32 0.5, %v2303_v59 }
 0xd11   :  { %3627 = verf.f32 %v2318_v4  ;;  %v2312_v28 = vmul.f32 0.5, %v2304_v61  ;;  %v2313_v37 = vmul.f32 0.5, %v2305_v62  ;;  %v2314_v40 = vmul.f32 0.5, %v2306_v2 }
 0xd12   :  { %3629 = verf.f32 %v2319_v18 }
 0xd13   :  { %3631 = verf.f32 %v2320_v5 }
 0xd14   :  { %3633 = verf.f32 %v2321_v6 }
 0xd15   :  { %3635 = verf.f32 %v2322_v7 }
 0xd18   :  { %v3622_v8 = vpop.eup %3621 }
 0xd19   :  { %v3624_v9 = vpop.eup %3623  ;;  %v2331_v11 = vadd.f32 1.0, %v3622_v8 }
 0xd1a   :  { %v3626_v12 = vpop.eup %3625  ;;  %v2332_v15 = vadd.f32 1.0, %v3624_v9 }
 0xd1b   :  { %v3628_v16 = vpop.eup %3627  ;;  %v2333_v19 = vadd.f32 1.0, %v3626_v12  ;;  %v2339_v20 = vmul.f32 %v2331_v11, %v2307_v10  ;;  %v2347_v10 = vld [vmem:[#allocation2 + $0x4] sm:$0x1]  ;;  %v2348_v11 = vld [vmem:[#allocation2 + $0xc] sm:$0x1] }
 0xd1c   :  { %v3630_v21 = vpop.eup %3629  ;;  %v2334_v25 = vadd.f32 1.0, %v3628_v16  ;;  %v2340_v26 = vmul.f32 %v2332_v15, %v2308_v14  ;;  %v2349_v12 = vld [vmem:[#allocation2 + $0x14] sm:$0x1] }
 0xd1d   :  { %v3632_v27 = vpop.eup %3631  ;;  %v2341_v29 = vmul.f32 %v2333_v19, %v2309_v17  ;;  %v2355_v30 = vpack.c.bf16 %v2339_v20, %v2339_v20  ;;  %v2335_v33 = vadd.f32 1.0, %v3630_v21  ;;  %v2350_v21 = vld [vmem:[#allocation2 + $0x1c] sm:$0x1] }
 0xd1e   :  { %v3634_v34 = vpop.eup %3633  ;;  %v2342_v35 = vmul.f32 %v2334_v25, %v2310_v23  ;;  %v2356_v36 = vpack.c.bf16 %v2340_v26, %v2340_v26  ;;  %v2336_v22 = vadd.f32 1.0, %v3632_v27  ;;  %v2351_v27 = vld [vmem:[#allocation2 + $0x24] sm:$0x1] }
 0xd1f   :  { %v3636_v38 = vpop.eup %3635  ;;  %v2357_v39 = vpack.c.bf16 %v2341_v29, %v2341_v29  ;;  %v2337_v41 = vadd.f32 1.0, %v3634_v34  ;;  %v2343_v42 = vmul.f32 %v2335_v33, %v2311_v24  ;;  %v2371_v47 = vunpack.c.l.b16 %v2355_v30 }
 0xd20   :  { %v2358_v43 = vpack.c.bf16 %v2342_v35, %v2342_v35  ;;  %v2372_v44 = vunpack.c.l.b16 %v2356_v36  ;;  %v2338_v45 = vadd.f32 1.0, %v3636_v38  ;;  %v2344_v46 = vmul.f32 %v2336_v22, %v2312_v28  ;;  %v2352_v35 = vld [vmem:[#allocation2 + $0x2c] sm:$0x1]  ;;  %v2354_v38 = vld [vmem:[#allocation2 + $0x3c] sm:$0x1] }
 0xd21   :  { %v2373_v48 = vunpack.c.l.b16 %v2357_v39  ;;  %v2345_v49 = vmul.f32 %v2337_v41, %v2313_v37  ;;  %v2359_v50 = vpack.c.bf16 %v2343_v42, %v2343_v42  ;;  %v2353_v37 = vld [vmem:[#allocation2 + $0x34] sm:$0x1] }
 0xd22   :  { %v2379_v51 = vrot.slane %v2372_v44, 7  ;;  %v2346_v52 = vmul.f32 %v2338_v45, %v2314_v40  ;;  %v2360_v53 = vpack.c.bf16 %v2344_v46, %v2344_v46  ;;  %v2374_v54 = vunpack.c.l.b16 %v2358_v43 }
 0xd23   :  { %v2381_v55 = vrot.slane %v2373_v48, 6  ;;  %v2361_v56 = vpack.c.bf16 %v2345_v49, %v2345_v49  ;;  %v2375_v57 = vunpack.c.l.b16 %v2359_v50 }
 0xd24   :  { %v2362_v58 = vpack.c.bf16 %v2346_v52, %v2346_v52  ;;  %v2376_v59 = vunpack.c.l.b16 %v2360_v53  ;;  %v2380_v60 = vsel %vm415_vm4, %v2379_v51, %v2371_v47  ;;  %v2383_v61 = vrot.slane %v2374_v54, 5 }
 0xd25   :  { %v2377_v13 = vunpack.c.l.b16 %v2361_v56  ;;  %v2382_v62 = vsel %vm418_vm5, %v2381_v55, %v2380_v60  ;;  %v2385_v63 = vrot.slane %v2375_v57, 4 }
 0xd26   :  { %v2378_v1 = vunpack.c.l.b16 %v2362_v58  ;;  %v2384_v2 = vsel %vm421_vm6, %v2383_v61, %v2382_v62  ;;  %v2387_v3 = vrot.slane %v2376_v59, 3 }
 0xd27   :  { %v2386_v4 = vsel %vm424_vm7, %v2385_v63, %v2384_v2  ;;  %v2389_v18 = vrot.slane %v2377_v13, 2 }
 0xd28   :  { %v2388_v5 = vsel %vm427_vm8, %v2387_v3, %v2386_v4  ;;  %v2391_v6 = vrot.slane %v2378_v1, 1 }
 0xd29   :  { %v2390_v7 = vsel %vm430_vm9, %v2389_v18, %v2388_v5 }
 0xd2a   :  { %v2392_v8 = vsel %vm433_vm10, %v2391_v6, %v2390_v7 }
 0xd2b   :  { %v2393_v9 = vpack.c.b16 %v2392_v8, %v2392_v8 }
 0xd2d   :  { %3373 = vmatmul.mubr.msk.bf16.vlgmr.msra.gmra.mrb[36].mxu0 %vm249_vm2, %v2393_v9 }
 0xd2e   :  { %3385 = vmatpush3.bf16.msra.mxu0 %v4304_v31  ;;  %3388 = vmatprep.mubr.msk.bf16.mxu0 %vm3899_vm0, %v3898_v0 }
 0xd2f   :  { %3386 = vmatprep.subr.bf16.mxu0 %v3898_v0 }
 0xd32   :  { %3387 = vmatpush3.bf16.msra.mxu0 %v4307_v32 }
 0xd33   :  { %3400 = vmatprep.subr.bf16.mxu0 %v3898_v0 }
 0xe00   :  { %v2431_v14 = vpop.f32.mrb[36].mxu0 }
 0xe01   :  { %v2438_v15 = vrot.slane %v2431_v14, 1  ;;  %v2439_v16 = vrot.slane %v2431_v14, 2  ;;  %v2440_v17 = vrot.slane %v2431_v14, 3  ;;  %v2441_v19 = vrot.slane %v2431_v14, 4  ;;  %v3374_v20 = vpop.f32.mrb[37].mxu0 }
 0xe02   :  { %v2442_v23 = vrot.slane %v2431_v14, 5  ;;  %v2443_v24 = vrot.slane %v2431_v14, 6  ;;  %v2453_v25 = vadd.f32 %v2431_v14, %v2347_v10  ;;  %v2434_v26 = vpop.f32.mrb[38].mxu0  ;;  %v2444_v28 = vrot.slane %v2431_v14, 7 }
 0xe03   :  { %v2454_v29 = vadd.f32 %v2438_v15, %v2348_v11  ;;  %v2455_v30 = vadd.f32 %v2439_v16, %v2349_v12  ;;  %v2456_v33 = vadd.f32 %v2440_v17, %v2350_v21  ;;  %v3375_v34 = vpop.f32.mrb[39].mxu0  ;;  %v2457_v36 = vadd.f32 %v2441_v19, %v2351_v27 }
 0xe04   :  { %v2458_v22 = vadd.f32 %v2442_v23, %v2352_v35  ;;  %v2459_v39 = vadd.f32 %v2443_v24, %v2353_v37  ;;  %v2469_v40 = vmul.f32 0.70710677, %v2453_v25  ;;  %v2460_v42 = vadd.f32 %v2444_v28, %v2354_v38 }
 0xe05   :  { %v2470_v41 = vmul.f32 0.70710677, %v2454_v29  ;;  %v2471_v43 = vmul.f32 0.70710677, %v2455_v30  ;;  %v2472_v44 = vmul.f32 0.70710677, %v2456_v33 }
 0xe06   :  { %v2473_v45 = vmul.f32 0.70710677, %v2457_v36  ;;  %3637 = verf.f32 %v2469_v40  ;;  %v2474_v46 = vmul.f32 0.70710677, %v2458_v22  ;;  %v2475_v47 = vmul.f32 0.70710677, %v2459_v39 }
 0xe07   :  { %3639 = verf.f32 %v2470_v41  ;;  %v2476_v48 = vmul.f32 0.70710677, %v2460_v42  ;;  %v2461_v51 = vmul.f32 0.5, %v2453_v25  ;;  %v2462_v54 = vmul.f32 0.5, %v2454_v29 }
 0xe08   :  { %3641 = verf.f32 %v2471_v43  ;;  %v2463_v57 = vmul.f32 0.5, %v2455_v30  ;;  %v2464_v61 = vmul.f32 0.5, %v2456_v33  ;;  %v2465_v13 = vmul.f32 0.5, %v2457_v36 }
 0xe09   :  { %3643 = verf.f32 %v2472_v44  ;;  %v2466_v2 = vmul.f32 0.5, %v2458_v22  ;;  %v2467_v8 = vmul.f32 0.5, %v2459_v39  ;;  %v2468_v12 = vmul.f32 0.5, %v2460_v42 }
 0xe0a   :  { %3645 = verf.f32 %v2473_v45 }
 0xe0b   :  { %3647 = verf.f32 %v2474_v46 }
 0xe0c   :  { %3649 = verf.f32 %v2475_v47 }
 0xe0d   :  { %3651 = verf.f32 %v2476_v48 }
 0xe10   :  { %v3638_v49 = vpop.eup %3637 }
 0xe11   :  { %v3640_v50 = vpop.eup %3639  ;;  %v2485_v52 = vadd.f32 1.0, %v3638_v49 }
 0xe12   :  { %v3642_v53 = vpop.eup %3641  ;;  %v2486_v55 = vadd.f32 1.0, %v3640_v50 }
 0xe13   :  { %v3644_v56 = vpop.eup %3643  ;;  %v2487_v58 = vadd.f32 1.0, %v3642_v53  ;;  %v2493_v59 = vmul.f32 %v2485_v52, %v2461_v51  ;;  %v2501_v51 = vld [vmem:[#allocation2 + $0x5] sm:$0x1]  ;;  %v2502_v52 = vld [vmem:[#allocation2 + $0xd] sm:$0x1] }
 0xe14   :  { %v3646_v60 = vpop.eup %3645  ;;  %v2488_v62 = vadd.f32 1.0, %v3644_v56  ;;  %v2494_v63 = vmul.f32 %v2486_v55, %v2462_v54  ;;  %v2503_v53 = vld [vmem:[#allocation2 + $0x15] sm:$0x1] }
 0xe15   :  { %v3648_v1 = vpop.eup %3647  ;;  %v2495_v3 = vmul.f32 %v2487_v58, %v2463_v57  ;;  %v2509_v4 = vpack.c.bf16 %v2493_v59, %v2493_v59  ;;  %v2489_v18 = vadd.f32 1.0, %v3646_v60  ;;  %v2504_v60 = vld [vmem:[#allocation2 + $0x1d] sm:$0x1] }
 0xe16   :  { %v3650_v5 = vpop.eup %3649  ;;  %v2496_v6 = vmul.f32 %v2488_v62, %v2464_v61  ;;  %v2510_v7 = vpack.c.bf16 %v2494_v63, %v2494_v63  ;;  %v2490_v9 = vadd.f32 1.0, %v3648_v1  ;;  %v2505_v63 = vld [vmem:[#allocation2 + $0x25] sm:$0x1] }
 0xe17   :  { %v3652_v10 = vpop.eup %3651  ;;  %v2511_v11 = vpack.c.bf16 %v2495_v3, %v2495_v3  ;;  %v2491_v14 = vadd.f32 1.0, %v3650_v5  ;;  %v2497_v15 = vmul.f32 %v2489_v18, %v2465_v13  ;;  %v2525_v21 = vunpack.c.l.b16 %v2509_v4  ;;  %v2506_v18 = vld [vmem:[#allocation2 + $0x2d] sm:$0x1] }
 0xe18   :  { %v2512_v16 = vpack.c.bf16 %v2496_v6, %v2496_v6  ;;  %v2526_v17 = vunpack.c.l.b16 %v2510_v7  ;;  %v2492_v19 = vadd.f32 1.0, %v3652_v10  ;;  %v2498_v20 = vmul.f32 %v2490_v9, %v2466_v2  ;;  %v2507_v6 = vld [vmem:[#allocation2 + $0x35] sm:$0x1] }
 0xe19   :  { %v2527_v23 = vunpack.c.l.b16 %v2511_v11  ;;  %v2499_v24 = vmul.f32 %v2491_v14, %v2467_v8  ;;  %v2513_v25 = vpack.c.bf16 %v2497_v15, %v2497_v15  ;;  %v2508_v8 = vld [vmem:[#allocation2 + $0x3d] sm:$0x1] }
 0xe1a   :  { %v2533_v26 = vrot.slane %v2526_v17, 7  ;;  %v2500_v27 = vmul.f32 %v2492_v19, %v2468_v12  ;;  %v2514_v28 = vpack.c.bf16 %v2498_v20, %v2498_v20  ;;  %v2528_v29 = vunpack.c.l.b16 %v2512_v16 }
 0xe1b   :  { %v2535_v30 = vrot.slane %v2527_v23, 6  ;;  %v2515_v33 = vpack.c.bf16 %v2499_v24, %v2499_v24  ;;  %v2529_v34 = vunpack.c.l.b16 %v2513_v25 }
 0xe1c   :  { %v2516_v35 = vpack.c.bf16 %v2500_v27, %v2500_v27  ;;  %v2530_v36 = vunpack.c.l.b16 %v2514_v28  ;;  %v2534_v37 = vsel %vm415_vm4, %v2533_v26, %v2525_v21  ;;  %v2537_v22 = vrot.slane %v2528_v29, 5 }
 0xe1d   :  { %v2531_v38 = vunpack.c.l.b16 %v2515_v33  ;;  %v2536_v39 = vsel %vm418_vm5, %v2535_v30, %v2534_v37  ;;  %v2539_v40 = vrot.slane %v2529_v34, 4 }
 0xe1e   :  { %v2532_v41 = vunpack.c.l.b16 %v2516_v35  ;;  %v2538_v42 = vsel %vm421_vm6, %v2537_v22, %v2536_v39  ;;  %v2541_v43 = vrot.slane %v2530_v36, 3 }
 0xe1f   :  { %v2540_v44 = vsel %vm424_vm7, %v2539_v40, %v2538_v42  ;;  %v2543_v45 = vrot.slane %v2531_v38, 2 }
 0xe20   :  { %v2542_v46 = vsel %vm427_vm8, %v2541_v43, %v2540_v44  ;;  %v2545_v47 = vrot.slane %v2532_v41, 1 }
 0xe21   :  { %v2544_v48 = vsel %vm430_vm9, %v2543_v45, %v2542_v46 }
 0xe22   :  { %v2546_v49 = vsel %vm433_vm10, %v2545_v47, %v2544_v48 }
 0xe23   :  { %v2547_v50 = vpack.c.b16 %v2546_v49, %v2546_v49 }
 0xe25   :  { %3381 = vmatmul.mubr.msk.bf16.vlgmr.msra.gmra.mrb[36].mxu1 %vm249_vm2, %v2547_v50 }
 0xe26   :  { %3393 = vmatpush3.bf16.msra.mxu1 %v4304_v31  ;;  %3396 = vmatprep.mubr.msk.bf16.mxu1 %vm3899_vm0, %v3898_v0 }
 0xe27   :  { %3394 = vmatprep.subr.bf16.mxu1 %v3898_v0 }
 0xe2a   :  { %3395 = vmatpush3.bf16.msra.mxu1 %v4307_v32 }
 0xe2b   :  { %3408 = vmatprep.subr.bf16.mxu1 %v3898_v0 }
 0xef8   :  { %v2585_v54 = vpop.f32.mrb[36].mxu1 }
 0xef9   :  { %v2592_v55 = vrot.slane %v2585_v54, 1  ;;  %v2593_v56 = vrot.slane %v2585_v54, 2  ;;  %v2594_v57 = vrot.slane %v2585_v54, 3  ;;  %v2595_v58 = vrot.slane %v2585_v54, 4  ;;  %v3382_v59 = vpop.f32.mrb[37].mxu1 }
 0xefa   :  { %v2596_v31 = vrot.slane %v2585_v54, 5  ;;  %v2597_v61 = vrot.slane %v2585_v54, 6  ;;  %v2607_v13 = vadd.f32 %v2585_v54, %v2501_v51  ;;  %v2588_v62 = vpop.f32.mrb[38].mxu1  ;;  %v2598_v1 = vrot.slane %v2585_v54, 7 }
 0xefb   :  { %v2608_v2 = vadd.f32 %v2592_v55, %v2502_v52  ;;  %v2609_v32 = vadd.f32 %v2593_v56, %v2503_v53  ;;  %v2610_v3 = vadd.f32 %v2594_v57, %v2504_v60  ;;  %v3383_v4 = vpop.f32.mrb[39].mxu1  ;;  %v2611_v5 = vadd.f32 %v2595_v58, %v2505_v63 }
 0xefc   :  { %v2612_v7 = vadd.f32 %v2596_v31, %v2506_v18  ;;  %v2613_v9 = vadd.f32 %v2597_v61, %v2507_v6  ;;  %v2623_v10 = vmul.f32 0.70710677, %v2607_v13  ;;  %v2614_v12 = vadd.f32 %v2598_v1, %v2508_v8 }
 0xefd   :  { %v2624_v11 = vmul.f32 0.70710677, %v2608_v2  ;;  %v2625_v14 = vmul.f32 0.70710677, %v2609_v32  ;;  %v2626_v15 = vmul.f32 0.70710677, %v2610_v3 }
 0xefe   :  { %v2627_v16 = vmul.f32 0.70710677, %v2611_v5  ;;  %3653 = verf.f32 %v2623_v10  ;;  %v2628_v17 = vmul.f32 0.70710677, %v2612_v7  ;;  %v2629_v19 = vmul.f32 0.70710677, %v2613_v9 }
 0xeff   :  { %3655 = verf.f32 %v2624_v11  ;;  %v2630_v20 = vmul.f32 0.70710677, %v2614_v12  ;;  %v2615_v24 = vmul.f32 0.5, %v2607_v13  ;;  %v2616_v27 = vmul.f32 0.5, %v2608_v2 }
 0xf00   :  { %3657 = verf.f32 %v2625_v14  ;;  %v2617_v30 = vmul.f32 0.5, %v2609_v32  ;;  %v2618_v36 = vmul.f32 0.5, %v2610_v3  ;;  %v2619_v37 = vmul.f32 0.5, %v2611_v5 }
 0xf01   :  { %3659 = verf.f32 %v2626_v15  ;;  %v2620_v40 = vmul.f32 0.5, %v2612_v7  ;;  %v2621_v47 = vmul.f32 0.5, %v2613_v9  ;;  %v2622_v51 = vmul.f32 0.5, %v2614_v12 }
 0xf02   :  { %3661 = verf.f32 %v2627_v16 }
 0xf03   :  { %3663 = verf.f32 %v2628_v17 }
 0xf04   :  { %3665 = verf.f32 %v2629_v19 }
 0xf05   :  { %3667 = verf.f32 %v2630_v20 }
 0xf08   :  { %v3654_v21 = vpop.eup %3653 }
 0xf09   :  { %v3656_v23 = vpop.eup %3655  ;;  %v2639_v25 = vadd.f32 1.0, %v3654_v21  ;;  %v2655_v21 = vld [vmem:[#allocation2 + $0x6] sm:$0x1] }
 0xf0a   :  { %v3658_v26 = vpop.eup %3657  ;;  %v2640_v28 = vadd.f32 1.0, %v3656_v23  ;;  %v2656_v23 = vld [vmem:[#allocation2 + $0xe] sm:$0x1] }
 0xf0b   :  { %v3660_v29 = vpop.eup %3659  ;;  %v2641_v33 = vadd.f32 1.0, %v3658_v26  ;;  %v2647_v34 = vmul.f32 %v2639_v25, %v2615_v24  ;;  %v2657_v24 = vld [vmem:[#allocation2 + $0x16] sm:$0x1] }
 0xf0c   :  { %v3662_v35 = vpop.eup %3661  ;;  %v2642_v22 = vadd.f32 1.0, %v3660_v29  ;;  %v2648_v38 = vmul.f32 %v2640_v28, %v2616_v27 }
 0xf0d   :  { %v3664_v39 = vpop.eup %3663  ;;  %v2649_v41 = vmul.f32 %v2641_v33, %v2617_v30  ;;  %v2663_v42 = vpack.c.bf16 %v2647_v34, %v2647_v34  ;;  %v2643_v43 = vadd.f32 1.0, %v3662_v35  ;;  %v2658_v33 = vld [vmem:[#allocation2 + $0x1e] sm:$0x1] }
 0xf0e   :  { %v3666_v44 = vpop.eup %3665  ;;  %v2650_v45 = vmul.f32 %v2642_v22, %v2618_v36  ;;  %v2664_v46 = vpack.c.bf16 %v2648_v38, %v2648_v38  ;;  %v2644_v48 = vadd.f32 1.0, %v3664_v39  ;;  %v2659_v22 = vld [vmem:[#allocation2 + $0x26] sm:$0x1] }
 0xf0f   :  { %v3668_v49 = vpop.eup %3667  ;;  %v2665_v50 = vpack.c.bf16 %v2649_v41, %v2649_v41  ;;  %v2645_v52 = vadd.f32 1.0, %v3666_v44  ;;  %v2651_v53 = vmul.f32 %v2643_v43, %v2619_v37  ;;  %v2679_v58 = vunpack.c.l.b16 %v2663_v42  ;;  %v2660_v43 = vld [vmem:[#allocation2 + $0x2e] sm:$0x1] }
 0xf10   :  { %v2666_v54 = vpack.c.bf16 %v2650_v45, %v2650_v45  ;;  %v2680_v55 = vunpack.c.l.b16 %v2664_v46  ;;  %v2646_v56 = vadd.f32 1.0, %v3668_v49  ;;  %v2652_v57 = vmul.f32 %v2644_v48, %v2620_v40  ;;  %v2661_v45 = vld [vmem:[#allocation2 + $0x36] sm:$0x1] }
 0xf11   :  { %v2681_v59 = vunpack.c.l.b16 %v2665_v50  ;;  %v2653_v60 = vmul.f32 %v2645_v52, %v2621_v47  ;;  %v2667_v31 = vpack.c.bf16 %v2651_v53, %v2651_v53  ;;  %v2662_v47 = vld [vmem:[#allocation2 + $0x3e] sm:$0x1] }
 0xf12   :  { %v2687_v61 = vrot.slane %v2680_v55, 7  ;;  %v2654_v13 = vmul.f32 %v2646_v56, %v2622_v51  ;;  %v2668_v62 = vpack.c.bf16 %v2652_v57, %v2652_v57  ;;  %v2682_v63 = vunpack.c.l.b16 %v2666_v54 }
 0xf13   :  { %v2689_v1 = vrot.slane %v2681_v59, 6  ;;  %v2669_v2 = vpack.c.bf16 %v2653_v60, %v2653_v60  ;;  %v2683_v32 = vunpack.c.l.b16 %v2667_v31 }
 0xf14   :  { %v2670_v3 = vpack.c.bf16 %v2654_v13, %v2654_v13  ;;  %v2684_v4 = vunpack.c.l.b16 %v2668_v62  ;;  %v2688_v18 = vsel %vm415_vm4, %v2687_v61, %v2679_v58  ;;  %v2691_v5 = vrot.slane %v2682_v63, 5 }
 0xf15   :  { %v2685_v6 = vunpack.c.l.b16 %v2669_v2  ;;  %v2690_v7 = vsel %vm418_vm5, %v2689_v1, %v2688_v18  ;;  %v2693_v8 = vrot.slane %v2683_v32, 4 }
 0xf16   :  { %v2686_v9 = vunpack.c.l.b16 %v2670_v3  ;;  %v2692_v10 = vsel %vm421_vm6, %v2691_v5, %v2690_v7  ;;  %v2695_v11 = vrot.slane %v2684_v4, 3 }
 0xf17   :  { %v2694_v12 = vsel %vm424_vm7, %v2693_v8, %v2692_v10  ;;  %v2697_v14 = vrot.slane %v2685_v6, 2 }
 0xf18   :  { %v2696_v15 = vsel %vm427_vm8, %v2695_v11, %v2694_v12  ;;  %v2699_v16 = vrot.slane %v2686_v9, 1 }
 0xf19   :  { %v2698_v17 = vsel %vm430_vm9, %v2697_v14, %v2696_v15 }
 0xf1a   :  { %v2700_v19 = vsel %vm433_vm10, %v2699_v16, %v2698_v17 }
 0xf1b   :  { %v2701_v20 = vpack.c.b16 %v2700_v19, %v2700_v19 }
 0xf1d   :  { %3389 = vmatmul.mubr.msk.bf16.vlgmr.msra.gmra.mrb[40].mxu0 %vm249_vm2, %v2701_v20 }
 0xf1e   :  { %3404 = vmatprep.mubr.msk.bf16.mxu0 %vm3899_vm0, %v3898_v0 }
 0xff0   :  { %v2739_v25 = vpop.f32.mrb[40].mxu0 }
 0xff1   :  { %v2746_v26 = vrot.slane %v2739_v25, 1  ;;  %v2747_v27 = vrot.slane %v2739_v25, 2  ;;  %v2748_v28 = vrot.slane %v2739_v25, 3  ;;  %v2749_v29 = vrot.slane %v2739_v25, 4  ;;  %v3390_v30 = vpop.f32.mrb[41].mxu0 }
 0xff2   :  { %v2750_v34 = vrot.slane %v2739_v25, 5  ;;  %v2751_v35 = vrot.slane %v2739_v25, 6  ;;  %v2761_v36 = vadd.f32 %v2739_v25, %v2655_v21  ;;  %v2742_v37 = vpop.f32.mrb[42].mxu0  ;;  %v2752_v38 = vrot.slane %v2739_v25, 7 }
 0xff3   :  { %v2762_v39 = vadd.f32 %v2746_v26, %v2656_v23  ;;  %v2763_v40 = vadd.f32 %v2747_v27, %v2657_v24  ;;  %v2764_v41 = vadd.f32 %v2748_v28, %v2658_v33  ;;  %v3391_v42 = vpop.f32.mrb[43].mxu0  ;;  %v2765_v44 = vadd.f32 %v2749_v29, %v2659_v22 }
 0xff4   :  { %v2766_v46 = vadd.f32 %v2750_v34, %v2660_v43  ;;  %v2767_v48 = vadd.f32 %v2751_v35, %v2661_v45  ;;  %v2777_v49 = vmul.f32 0.70710677, %v2761_v36  ;;  %v2768_v51 = vadd.f32 %v2752_v38, %v2662_v47 }
 0xff5   :  { %v2778_v50 = vmul.f32 0.70710677, %v2762_v39  ;;  %v2779_v52 = vmul.f32 0.70710677, %v2763_v40  ;;  %v2780_v53 = vmul.f32 0.70710677, %v2764_v41 }
 0xff6   :  { %v2781_v54 = vmul.f32 0.70710677, %v2765_v44  ;;  %3669 = verf.f32 %v2777_v49  ;;  %v2782_v55 = vmul.f32 0.70710677, %v2766_v46  ;;  %v2783_v56 = vmul.f32 0.70710677, %v2767_v48 }
 0xff7   :  { %3671 = verf.f32 %v2778_v50  ;;  %v2784_v57 = vmul.f32 0.70710677, %v2768_v51  ;;  %v2769_v60 = vmul.f32 0.5, %v2761_v36  ;;  %v2770_v13 = vmul.f32 0.5, %v2762_v39 }
 0xff8   :  { %3673 = verf.f32 %v2779_v52  ;;  %v2771_v1 = vmul.f32 0.5, %v2763_v40  ;;  %v2772_v4 = vmul.f32 0.5, %v2764_v41  ;;  %v2773_v18 = vmul.f32 0.5, %v2765_v44 }
 0xff9   :  { %3675 = verf.f32 %v2780_v53  ;;  %v2774_v8 = vmul.f32 0.5, %v2766_v46  ;;  %v2775_v16 = vmul.f32 0.5, %v2767_v48  ;;  %v2776_v21 = vmul.f32 0.5, %v2768_v51 }
 0xffa   :  { %3677 = verf.f32 %v2781_v54 }
 0xffb   :  { %3679 = verf.f32 %v2782_v55 }
 0xffc   :  { %3681 = verf.f32 %v2783_v56 }
 0xffd   :  { %3683 = verf.f32 %v2784_v57 }
0x1000   :  { %v3670_v58 = vpop.eup %3669 }
0x1001   :  { %v3672_v59 = vpop.eup %3671  ;;  %v2793_v31 = vadd.f32 1.0, %v3670_v58  ;;  %v1665_v58 = vld [vmem:[#allocation13] sm:$0xff] }
0x1002   :  { %v3674_v61 = vpop.eup %3673  ;;  %v2794_v62 = vadd.f32 1.0, %v3672_v59  ;;  %v1666_v59 = vld [vmem:[#allocation13 + $0x8] sm:$0xff] }
0x1003   :  { %v3676_v63 = vpop.eup %3675  ;;  %v2795_v2 = vadd.f32 1.0, %v3674_v61  ;;  %v2801_v32 = vmul.f32 %v2793_v31, %v2769_v60  ;;  %v1667_v60 = vld [vmem:[#allocation13 + $0x10] sm:$0xff]  ;;  %v1669_v31 = vpack.c.bf16 %v1666_v59, %v1665_v58  ;;  %v1668_v61 = vld [vmem:[#allocation13 + $0x18] sm:$0xff] }
0x1004   :  { %v3678_v3 = vpop.eup %3677  ;;  %v2796_v5 = vadd.f32 1.0, %v3676_v63  ;;  %v2802_v6 = vmul.f32 %v2794_v62, %v2770_v13  ;;  %v1670_v13 = vpack.c.bf16 %v1668_v61, %v1667_v60  ;;  %v2809_v62 = vld [vmem:[#allocation2 + $0x7] sm:$0x1]  ;;  %v2810_v63 = vld [vmem:[#allocation2 + $0xf] sm:$0x1] }
0x1005   :  { %v3680_v7 = vpop.eup %3679  ;;  %v2803_v9 = vmul.f32 %v2795_v2, %v2771_v1  ;;  %v2817_v10 = vpack.c.bf16 %v2801_v32, %v2801_v32  ;;  %v2797_v11 = vadd.f32 1.0, %v3678_v3  ;;  %3401 = vmatpush3.bf16.msra.mxu0 %v1669_v31  ;;  %v2811_v1 = vld [vmem:[#allocation2 + $0x17] sm:$0x1] }
0x1006   :  { %v3682_v12 = vpop.eup %3681  ;;  %v2804_v14 = vmul.f32 %v2796_v5, %v2772_v4  ;;  %v2818_v15 = vpack.c.bf16 %v2802_v6, %v2802_v6  ;;  %v2798_v17 = vadd.f32 1.0, %v3680_v7  ;;  %3402 = vmatprep.subr.bf16.mxu0 %v3898_v0  ;;  %v2812_v6 = vld [vmem:[#allocation2 + $0x1f] sm:$0x1] }
0x1007   :  { %v3684_v19 = vpop.eup %3683  ;;  %v2819_v20 = vpack.c.bf16 %v2803_v9, %v2803_v9  ;;  %v2799_v23 = vadd.f32 1.0, %v3682_v12  ;;  %v2805_v24 = vmul.f32 %v2797_v11, %v2773_v18  ;;  %v2833_v29 = vunpack.c.l.b16 %v2817_v10  ;;  %v2813_v11 = vld [vmem:[#allocation2 + $0x27] sm:$0x1] }
0x1008   :  { %v2820_v25 = vpack.c.bf16 %v2804_v14, %v2804_v14  ;;  %v2834_v26 = vunpack.c.l.b16 %v2818_v15  ;;  %v2800_v27 = vadd.f32 1.0, %v3684_v19  ;;  %v2806_v28 = vmul.f32 %v2798_v17, %v2774_v8  ;;  %v2814_v19 = vld [vmem:[#allocation2 + $0x2f] sm:$0x1] }
0x1009   :  { %v2835_v30 = vunpack.c.l.b16 %v2819_v20  ;;  %v2807_v33 = vmul.f32 %v2799_v23, %v2775_v16  ;;  %v2821_v34 = vpack.c.bf16 %v2805_v24, %v2805_v24  ;;  %3403 = vmatpush3.bf16.msra.mxu0 %v1670_v13  ;;  %v2816_v24 = vld [vmem:[#allocation2 + $0x3f] sm:$0x1] }
0x100a   :  { %v2841_v35 = vrot.slane %v2834_v26, 7  ;;  %v2808_v36 = vmul.f32 %v2800_v27, %v2776_v21  ;;  %v2822_v37 = vpack.c.bf16 %v2806_v28, %v2806_v28  ;;  %v2836_v22 = vunpack.c.l.b16 %v2820_v25  ;;  %v2815_v21 = vld [vmem:[#allocation2 + $0x37] sm:$0x1] }
0x100b   :  { %v2843_v38 = vrot.slane %v2835_v30, 6  ;;  %v2823_v39 = vpack.c.bf16 %v2807_v33, %v2807_v33  ;;  %v2837_v40 = vunpack.c.l.b16 %v2821_v34 }
0x100c   :  { %v2824_v41 = vpack.c.bf16 %v2808_v36, %v2808_v36  ;;  %v2838_v42 = vunpack.c.l.b16 %v2822_v37  ;;  %v2842_v43 = vsel %vm415_vm4, %v2841_v35, %v2833_v29  ;;  %v2845_v44 = vrot.slane %v2836_v22, 5 }
0x100d   :  { %v2839_v45 = vunpack.c.l.b16 %v2823_v39  ;;  %v2844_v46 = vsel %vm418_vm5, %v2843_v38, %v2842_v43  ;;  %v2847_v47 = vrot.slane %v2837_v40, 4 }
0x100e   :  { %v2840_v48 = vunpack.c.l.b16 %v2824_v41  ;;  %v2846_v49 = vsel %vm421_vm6, %v2845_v44, %v2844_v46  ;;  %v2849_v50 = vrot.slane %v2838_v42, 3 }
0x100f   :  { %v2848_v51 = vsel %vm424_vm7, %v2847_v47, %v2846_v49  ;;  %v2851_v52 = vrot.slane %v2839_v45, 2 }
0x1010   :  { %v2850_v53 = vsel %vm427_vm8, %v2849_v50, %v2848_v51  ;;  %v2853_v54 = vrot.slane %v2840_v48, 1 }
0x1011   :  { %v2852_v55 = vsel %vm430_vm9, %v2851_v52, %v2850_v53 }
0x1012   :  { %v2854_v56 = vsel %vm433_vm10, %v2853_v54, %v2852_v55 }
0x1013   :  { %v2855_v57 = vpack.c.b16 %v2854_v56, %v2854_v56 }
0x1015   :  { %3397 = vmatmul.mubr.msk.bf16.vlgmr.msra.gmra.mrb[40].mxu1 %vm249_vm2, %v2855_v57 }
0x1016   :  { %3412 = vmatprep.mubr.msk.bf16.mxu1 %vm3899_vm0, %v3898_v0 }
0x10e8   :  { %v2893_v2 = vpop.f32.mrb[40].mxu1 }
0x10e9   :  { %v2900_v32 = vrot.slane %v2893_v2, 1  ;;  %v2901_v3 = vrot.slane %v2893_v2, 2  ;;  %v2902_v4 = vrot.slane %v2893_v2, 3  ;;  %v2903_v18 = vrot.slane %v2893_v2, 4  ;;  %v3398_v5 = vpop.f32.mrb[41].mxu1 }
0x10ea   :  { %v2904_v7 = vrot.slane %v2893_v2, 5  ;;  %v2905_v8 = vrot.slane %v2893_v2, 6  ;;  %v2915_v9 = vadd.f32 %v2893_v2, %v2809_v62  ;;  %v2896_v10 = vpop.f32.mrb[42].mxu1  ;;  %v2906_v12 = vrot.slane %v2893_v2, 7 }
0x10eb   :  { %v2916_v14 = vadd.f32 %v2900_v32, %v2810_v63  ;;  %v2917_v15 = vadd.f32 %v2901_v3, %v2811_v1  ;;  %v2918_v16 = vadd.f32 %v2902_v4, %v2812_v6  ;;  %v3399_v17 = vpop.f32.mrb[43].mxu1  ;;  %v2919_v20 = vadd.f32 %v2903_v18, %v2813_v11 }
0x10ec   :  { %v2920_v23 = vadd.f32 %v2904_v7, %v2814_v19  ;;  %v2921_v25 = vadd.f32 %v2905_v8, %v2815_v21  ;;  %v2931_v26 = vmul.f32 0.70710677, %v2915_v9  ;;  %v2922_v28 = vadd.f32 %v2906_v12, %v2816_v24 }
0x10ed   :  { %v2932_v27 = vmul.f32 0.70710677, %v2916_v14  ;;  %v2933_v29 = vmul.f32 0.70710677, %v2917_v15  ;;  %v2934_v30 = vmul.f32 0.70710677, %v2918_v16 }
0x10ee   :  { %v2935_v33 = vmul.f32 0.70710677, %v2919_v20  ;;  %3685 = verf.f32 %v2931_v26  ;;  %v2936_v34 = vmul.f32 0.70710677, %v2920_v23  ;;  %v2937_v35 = vmul.f32 0.70710677, %v2921_v25 }
0x10ef   :  { %3687 = verf.f32 %v2932_v27  ;;  %v2938_v36 = vmul.f32 0.70710677, %v2922_v28  ;;  %v2923_v38 = vmul.f32 0.5, %v2915_v9  ;;  %v2924_v41 = vmul.f32 0.5, %v2916_v14 }
0x10f0   :  { %3689 = verf.f32 %v2933_v29  ;;  %v2925_v44 = vmul.f32 0.5, %v2917_v15  ;;  %v2926_v48 = vmul.f32 0.5, %v2918_v16  ;;  %v2927_v49 = vmul.f32 0.5, %v2919_v20 }
0x10f1   :  { %3691 = verf.f32 %v2934_v30  ;;  %v2928_v53 = vmul.f32 0.5, %v2920_v23  ;;  %v2929_v60 = vmul.f32 0.5, %v2921_v25  ;;  %v2930_v62 = vmul.f32 0.5, %v2922_v28 }
0x10f2   :  { %3693 = verf.f32 %v2935_v33 }
0x10f3   :  { %3695 = verf.f32 %v2936_v34 }
0x10f4   :  { %3697 = verf.f32 %v2937_v35 }
0x10f5   :  { %3699 = verf.f32 %v2938_v36 }
0x10f8   :  { %v3686_v37 = vpop.eup %3685 }
0x10f9   :  { %v3688_v22 = vpop.eup %3687  ;;  %v2947_v39 = vadd.f32 1.0, %v3686_v37  ;;  %v3058_v37 = vld [vmem:[%s4480_s11] sm:$0xff] }
0x10fa   :  { %v3690_v40 = vpop.eup %3689  ;;  %v2948_v42 = vadd.f32 1.0, %v3688_v22  ;;  %v3059_v22 = vld [vmem:[%s4480_s11 + $0x8] sm:$0xff] }
0x10fb   :  { %v3692_v43 = vpop.eup %3691  ;;  %v2949_v45 = vadd.f32 1.0, %v3690_v40  ;;  %v2955_v46 = vmul.f32 %v2947_v39, %v2923_v38  ;;  %v3060_v38 = vld [vmem:[%s4480_s11 + $0x10] sm:$0xff]  ;;  %v3062_v39 = vpack.c.bf16 %v3059_v22, %v3058_v37  ;;  %v3061_v40 = vld [vmem:[%s4480_s11 + $0x18] sm:$0xff] }
0x10fc   :  { %v3694_v47 = vpop.eup %3693  ;;  %v2950_v50 = vadd.f32 1.0, %v3692_v43  ;;  %v2956_v51 = vmul.f32 %v2948_v42, %v2924_v41  ;;  %v3063_v41 = vpack.c.bf16 %v3061_v40, %v3060_v38  ;;  %v3163_v42 = vld [vmem:[#allocation15] ss:$0 sm:$0xff] }
0x10fd   :  { %v3696_v52 = vpop.eup %3695  ;;  %v2957_v54 = vmul.f32 %v2949_v45, %v2925_v44  ;;  %v2963_v55 = vpack.c.bf16 %v2955_v46, %v2955_v46  ;;  %v2951_v56 = vadd.f32 1.0, %v3694_v47  ;;  %3409 = vmatpush3.bf16.msra.mxu1 %v3062_v39 }
0x10fe   :  { %v3698_v57 = vpop.eup %3697  ;;  %v2958_v58 = vmul.f32 %v2950_v50, %v2926_v48  ;;  %v2964_v59 = vpack.c.bf16 %v2956_v51, %v2956_v51  ;;  %v2952_v31 = vadd.f32 1.0, %v3696_v52  ;;  %3410 = vmatprep.subr.bf16.mxu1 %v3898_v0  ;;  %v3165_v0 = vld [vmem:[%s4481_s12] ss:$0 sm:$0xff] }
0x10ff   :  { %v3700_v61 = vpop.eup %3699  ;;  %v2965_v13 = vpack.c.bf16 %v2957_v54, %v2957_v54  ;;  %v2953_v63 = vadd.f32 1.0, %v3698_v57  ;;  %v2959_v1 = vmul.f32 %v2951_v56, %v2927_v49  ;;  %v2986_v18 = vunpack.c.l.b16 %v2963_v55 }
0x1100   :  { %v2966_v2 = vpack.c.bf16 %v2958_v58, %v2958_v58  ;;  %v2987_v32 = vunpack.c.l.b16 %v2964_v59  ;;  %v2954_v3 = vadd.f32 1.0, %v3700_v61  ;;  %v2960_v4 = vmul.f32 %v2952_v31, %v2928_v53 }
0x1101   :  { %v2988_v5 = vunpack.c.l.b16 %v2965_v13  ;;  %v2961_v6 = vmul.f32 %v2953_v63, %v2929_v60  ;;  %v2967_v7 = vpack.c.bf16 %v2959_v1, %v2959_v1  ;;  %3411 = vmatpush3.bf16.msra.mxu1 %v3063_v41 }
0x1102   :  { %v2994_v8 = vrot.slane %v2987_v32, 7  ;;  %v2962_v9 = vmul.f32 %v2954_v3, %v2930_v62  ;;  %v2968_v10 = vpack.c.bf16 %v2960_v4, %v2960_v4  ;;  %v2989_v11 = vunpack.c.l.b16 %v2966_v2 }
0x1103   :  { %v2996_v12 = vrot.slane %v2988_v5, 6  ;;  %v2969_v14 = vpack.c.bf16 %v2961_v6, %v2961_v6  ;;  %v2990_v15 = vunpack.c.l.b16 %v2967_v7 }
0x1104   :  { %v2970_v16 = vpack.c.bf16 %v2962_v9, %v2962_v9  ;;  %v2991_v17 = vunpack.c.l.b16 %v2968_v10  ;;  %v2995_v19 = vsel %vm415_vm4, %v2994_v8, %v2986_v18  ;;  %v2998_v20 = vrot.slane %v2989_v11, 5 }
0x1105   :  { %v2992_v21 = vunpack.c.l.b16 %v2969_v14  ;;  %v2997_v23 = vsel %vm418_vm5, %v2996_v12, %v2995_v19  ;;  %v3000_v24 = vrot.slane %v2990_v15, 4 }
0x1106   :  { %v2993_v25 = vunpack.c.l.b16 %v2970_v16  ;;  %v2999_v26 = vsel %vm421_vm6, %v2998_v20, %v2997_v23  ;;  %v3002_v27 = vrot.slane %v2991_v17, 3 }
0x1107   :  { %v3001_v28 = vsel %vm424_vm7, %v3000_v24, %v2999_v26  ;;  %v3004_v29 = vrot.slane %v2992_v21, 2 }
0x1108   :  { %v3003_v30 = vsel %vm427_vm8, %v3002_v27, %v3001_v28  ;;  %v3006_v33 = vrot.slane %v2993_v25, 1 }
0x1109   :  { %v3005_v34 = vsel %vm430_vm9, %v3004_v29, %v3003_v30 }
0x110a   :  { %v3007_v35 = vsel %vm433_vm10, %v3006_v33, %v3005_v34 }
0x110b   :  { %v3008_v36 = vpack.c.b16 %v3007_v35, %v3007_v35 }
0x110d   :  { %3405 = vmatmul.mubr.msk.bf16.vlgmr.msra.gmra.mrb[44].mxu0 %vm249_vm2, %v3008_v36 }
0x11e0   :  { %v3046_v43 = vpop.f32.mrb[44].mxu0 }
0x11e1   :  { %v3047_v44 = vadd.f32 %v3163_v42, %v3046_v43  ;;  %v3406_v45 = vpop.f32.mrb[45].mxu0 }
0x11e2   :  { %v3049_v46 = vpop.f32.mrb[46].mxu0 }
0x11e3   :  { %v3053_v47 = vmul.f32 0.70710677, %v3047_v44  ;;  %v3407_v48 = vpop.f32.mrb[47].mxu0  ;;  %v3052_v50 = vmul.f32 0.5, %v3047_v44 }
0x11e5   :  { %3701 = verf.f32 %v3053_v47 }
0x11ef   :  { %v3702_v49 = vpop.eup %3701 }
0x11f0   :  { %v3055_v51 = vadd.f32 1.0, %v3702_v49 }
0x11f2   :  { %v3056_v52 = vmul.f32 %v3055_v51, %v3052_v50 }
0x11f4   :  { %v3057_v53 = vpack.c.bf16 %v3056_v52, %v3056_v52 }
0x11f6   :  { %3413 = vmatmul.mubr.msk.bf16.vlgmr.msra.gmra.mrb[44].mxu1 %vm249_vm2, %v3057_v53 }
0x12c9   :  { %v3108_v54 = vpop.f32.mrb[44].mxu1 }
0x12ca   :  { %v3109_v55 = vadd.f32 %v3165_v0, %v3108_v54  ;;  %v3414_v56 = vpop.f32.mrb[45].mxu1 }
0x12cb   :  { %v3111_v57 = vpop.f32.mrb[46].mxu1 }
0x12cc   :  { %v3415_v58 = vpop.f32.mrb[47].mxu1  ;;  %3115 = vst.msk [vmem:[#allocation16] sm:$0xff] %vm3114_vm11, %v3109_v55 }
0x12cd   :  { %3868 = shalt.err (!%p3865_p4)
}
0x12ce   :  { %s3869_s12 = scalar_lea.hbm %s4482_s13, 128 }
0x12cf   :  { %p3870_p5 = scmp.ne.s32.totalorder %s4482_s13, %s3869_s12  ;;  %p3873_p6 = scmp.lt.u32.totalorder %s3869_s12, %s4482_s13 }
0x12d1   :  { %p3875_p7 = pnand %p3873_p6, %p3870_p5 }
0x12d3   :  { %3878 = shalt.err (!%p3875_p7)
}
0x12d4   :  { %3125 = dma.vmem_to_hbm [thread:$0]  %s3123_s25, 128, %s4482_s13, [#allocation6]  }
0x12d5   :  { %3887 = dma.done.wait [#allocation6], 128  }
0x12d6   :  { %3888 = vsyncadd [#allocation6], 4294967168 }
0x12d7   :  { %3129 = vsyncpa [#allocation5], 1 }
0x12d8   :  { %3130 = vsyncpa [#allocation8], 1 }
0x12d9   :  { %3131 = vsyncpa [#allocation11], 1 }
0x12da   :  { %3132 = vsyncpa [#allocation14], 1 }
0x12db   :  { %3133 = vsyncpa [#allocation6], 1 }

</bundles_post_ra>
